<compile_context>
chip_gen: v7x
topology: tpu7x:2x2x1
jax: 0.10.0
libtpu: 0.0.40
codegen_flags: <defaults>
</compile_context>

<pallas_src>
import math
import numpy as np
import jax
import jax.numpy as jnp
from jax.experimental import pallas as pl
from jax.experimental.pallas import tpu as pltpu

_PREC = jax.lax.Precision.HIGHEST   # reference-only


def _band_attention_kernel(x_ref,
                           w1_ref, b1_ref, w2_ref, b2_ref, w3_ref, b3_ref,
                           w4_ref, b4_ref, w5_ref, b5_ref,
                           wa1_ref, ba1_ref, wa2_ref, ba2_ref,
                           prelu_ref, temp_ref, thr_ref,
                           out_ref):
    DF = 64    # conv_block always ends with 64 channels

    def shifted_taps(x):
        """H-pad once; build the three W-shifted copies (kx = 0,1,2) in bf16.

        The +-1 column shifts run as XLU rotations (pltpu.roll) with an iota border
        mask instead of materializing sublane-unaligned slice copies per tap."""
        h, w, cin = x.shape
        zrow = jnp.zeros((1, w, cin), x.dtype)
        xp = jnp.concatenate([zrow, x, zrow], axis=0)                 # (h+2, w, cin) f32
        col = jax.lax.broadcasted_iota(jnp.int32, xp.shape, 1)
        # roll(x, s)[j] = x[(j - s) mod w]  (jnp.roll semantics)
        x_l = jnp.where(col > 0, pltpu.roll(xp, shift=1, axis=1), 0.0)        # in[:, j-1]
        x_r = jnp.where(col < w - 1, pltpu.roll(xp, shift=w - 1, axis=1), 0.0)  # in[:, j+1]
        return (x_l.astype(jnp.bfloat16),
                xp.astype(jnp.bfloat16),
                x_r.astype(jnp.bfloat16))

    def conv3x3_relu(x, w_ref, b_ref):
        """3x3 same conv + ReLU: 9 whole-image bf16 matmuls, f32 accumulation."""
        h, w, cin = x.shape
        cout = b_ref.shape[1]
        taps = shifted_taps(x)
        acc = jnp.zeros((h * w, cout), jnp.float32)
        for ky in range(3):
            for kx in range(3):
                patch = taps[kx][ky:ky + h].reshape(h * w, cin)
                acc = acc + jnp.dot(patch, w_ref[ky, kx],
                                    preferred_element_type=jnp.float32)
        return jnp.maximum(acc + b_ref[...], 0.0).reshape(h, w, cout)

    def conv3x3_relu_im2col(x, w_ref, b_ref):
        """Layer-1 variant (tiny Cin): im2col to K = 9*Cin and one MXU matmul."""
        h, w, cin = x.shape
        cout = b_ref.shape[1]
        taps = shifted_taps(x)
        cols = jnp.concatenate(taps, axis=2)                          # (h+2, w, 3*cin)  kx-minor
        big = jnp.concatenate([cols[ky:ky + h] for ky in range(3)],
                              axis=2)                                 # (h, w, 9*cin)    ky-major
        acc = jnp.dot(big.reshape(h * w, 9 * cin), w_ref[...],
                      preferred_element_type=jnp.float32)
        return jnp.maximum(acc + b_ref[...], 0.0).reshape(h, w, cout)

    def maxpool2x2(x):
        h, w, c = x.shape
        xr = x.reshape(h // 2, 2, w, c)
        r = jnp.maximum(xr[:, 0, :, :], xr[:, 1, :, :])               # rows pooled
        # Column pass kept as per-pair slices (proven lowering); W <= 16 here.
        cols = [jnp.maximum(r[:, 2 * j:2 * j + 1, :], r[:, 2 * j + 1:2 * j + 2, :])
                for j in range(w // 2)]
        return jnp.concatenate(cols, axis=1)                          # (h//2, w//2, c)

    # ---- conv_block ----
    x0 = x_ref[0]                                                     # (H, W, C) f32
    h = conv3x3_relu_im2col(x0, w1_ref, b1_ref)                       # -> 128 ch
    h = maxpool2x2(h)
    h = conv3x3_relu(h, w2_ref, b2_ref)                               # -> 96 ch
    h = conv3x3_relu(h, w3_ref, b3_ref)                               # -> 64 ch
    h = maxpool2x2(h)
    h = conv3x3_relu(h, w4_ref, b4_ref)                               # -> 48 ch
    h = conv3x3_relu(h, w5_ref, b5_ref)                               # -> 64 ch

    # ---- AdaptiveAvgPool2d((1,1)) -> (1, 64) feature vector ----
    hp, wp = h.shape[0], h.shape[1]
    v_row = jnp.sum(h.reshape(hp * wp, DF), axis=0, keepdims=True) * (1.0 / (hp * wp))

    # ---- attention tail (folded Conv1d / PReLU / Conv1d / AvgPool1d), f32 on VPU ----
    pre = jnp.sum(wa1_ref[...] * v_row, axis=1, keepdims=True) + ba1_ref[...]   # (t1*Cr, 1)
    a = prelu_ref[0]
    act = jnp.where(pre >= 0.0, pre, a * pre)                                    # PReLU
    att = jnp.sum(wa2_ref[...] * act, axis=0, keepdims=True) + ba2_ref[...]      # (1, C)

    # ---- temperature scaling + sparse gating ----
    scaled = att / temp_ref[0]
    gate = jnp.where(scaled >= thr_ref[0], jax.nn.sigmoid(scaled),
                     jnp.zeros_like(scaled))                                     # (1, C)
    out_ref[...] = gate.reshape(1, 1, gate.shape[-1])


def prepare_params(params):
    """One-time host-side (numpy) parameter prep: bf16 conv weights, im2col-reshaped
    layer-1 weight, and the attention Conv1d tail folded into two dense matrices."""
    (w1, b1, w2, b2, w3, b3, w4, b4, w5, b5,
     wa1, ba1, prelu_a, wa2, ba2, temp, thr) = params
    w1_np = np.asarray(w1, np.float32)
    c_in = w1_np.shape[2]
    wa1_np = np.asarray(wa1, np.float32)
    wa2_np = np.asarray(wa2, np.float32)
    KL, Cr = wa1_np.shape
    C = wa2_np.shape[2]
    DF = np.asarray(w5).shape[3]          # 64
    t1 = DF - KL + 1                      # 33 conv1d-1 output positions
    t2 = t1 - KL + 1                      # 2  conv1d-2 output positions (avg-pooled)

    # layer-1 im2col weight: (3,3,Cin,128) -> (9*Cin, 128), bf16
    w1i = jnp.asarray(w1_np.reshape(9 * c_in, w1_np.shape[3]), dtype=jnp.bfloat16)
    w2b, w3b, w4b, w5b = (jnp.asarray(np.asarray(w, np.float32), dtype=jnp.bfloat16)
                          for w in (w2, w3, w4, w5))

    # Conv1d(1 -> Cr, k=KL) folded into a banded matrix, stored transposed: (t1*Cr, DF)
    wa1_big = np.zeros((DF, t1 * Cr), np.float32)
    for t in range(t1):
        wa1_big[t:t + KL, t * Cr:(t + 1) * Cr] = wa1_np
    wa1T = jnp.asarray(np.ascontiguousarray(wa1_big.T))
    ba1_col = jnp.asarray(np.tile(np.asarray(ba1, np.float32).reshape(1, Cr),
                                  (t1, 1)).reshape(t1 * Cr, 1))

    # Conv1d(Cr -> C, k=KL) + AdaptiveAvgPool1d(1) folded into (t1*Cr, C)
    wa2_big = np.zeros((t1 * Cr, C), np.float32)
    for tp in range(t2):
        for k in range(KL):
            wa2_big[(tp + k) * Cr:(tp + k + 1) * Cr, :] += wa2_np[k]
    wa2f = jnp.asarray(wa2_big / float(t2))
    ba2_row = jnp.asarray(np.asarray(ba2, np.float32).reshape(1, C))

    b1, b2, b3, b4, b5 = (jnp.asarray(np.asarray(b, np.float32)) for b in (b1, b2, b3, b4, b5))

    return (w1i, b1, w2b, b2, w3b, b3, w4b, b4, w5b, b5,
            wa1T, ba1_col, wa2f, ba2_row,
            jnp.asarray(prelu_a), jnp.asarray(temp), jnp.asarray(thr))


def band_attention_block(x_nchw, prepared):
    """x_nchw: (B, C, H, W) float32 — same convention as the PyTorch module."""
    (w1i, b1, w2, b2, w3, b3, w4, b4, w5, b5,
     wa1T, ba1c, wa2f, ba2r, prelu_a, temp, thr) = prepared
    B, C, H, W = x_nchw.shape
    assert H % 4 == 0 and W % 4 == 0, "conv_block needs H, W divisible by 4"

    x_nhwc = jnp.transpose(x_nchw, (0, 2, 3, 1))

    big_args = [w1i, b1, w2, b2, w3, b3, w4, b4, w5, b5, wa1T, ba1c, wa2f, ba2r]

    def vmem_spec(a):
        n = a.ndim
        return pl.BlockSpec(a.shape, lambda b, n=n: (0,) * n)

    smem_spec = pl.BlockSpec(memory_space=pltpu.MemorySpace.SMEM)

    gate = pl.pallas_call(
        _band_attention_kernel,
        out_shape=jax.ShapeDtypeStruct((B, 1, C), jnp.float32),
        grid=(B,),
        in_specs=[pl.BlockSpec((1, H, W, C), lambda b: (b, 0, 0, 0))]
                 + [vmem_spec(a) for a in big_args] + [smem_spec] * 3,
        out_specs=pl.BlockSpec((1, 1, C), lambda b: (b, 0, 0)),
        compiler_params=pltpu.CompilerParams(dimension_semantics=("parallel",)),
    )(x_nhwc, *big_args, prelu_a, temp, thr)

    # Band re-weighting (and layout) stay in the wrapper: the kernel output is just
    # the tiny gate, so no full-image masked stores / transpose-back are needed.
    return x_nchw * gate.reshape(B, C)[:, :, None, None]


def reference_forward(x_nchw, params):
    """Pure-JAX reference with the same semantics and bf16 rounding points."""
    (w1, b1, w2, b2, w3, b3, w4, b4, w5, b5,
     wa1, ba1, prelu_a, wa2, ba2, temp, thr) = params
    x = jnp.transpose(x_nchw, (0, 2, 3, 1))

    def conv(h, w, b):
        y = jax.lax.conv_general_dilated(
            h.astype(jnp.bfloat16), w.astype(jnp.bfloat16), (1, 1), ((1, 1), (1, 1)),
            dimension_numbers=("NHWC", "HWIO", "NHWC"),
            preferred_element_type=jnp.float32)
        return jnp.maximum(y + b, 0.0)

    def maxpool(h):
        return jax.lax.reduce_window(h, -jnp.inf, jax.lax.max,
                                     (1, 2, 2, 1), (1, 2, 2, 1), "VALID")

    h = maxpool(conv(x, w1, b1))
    h = conv(h, w2, b2)
    h = maxpool(conv(h, w3, b3))
    h = conv(h, w4, b4)
    h = conv(h, w5, b5)
    v = jnp.mean(h, axis=(1, 2))                                          # (B, 64)

    idx1 = jnp.arange(33)[:, None] + jnp.arange(32)[None, :]
    h1 = jnp.einsum("btk,kc->btc", v[:, idx1], wa1, precision=_PREC) + ba1
    h1 = jnp.where(h1 >= 0.0, h1, prelu_a[0] * h1)
    idx2 = jnp.arange(2)[:, None] + jnp.arange(32)[None, :]
    o2 = jnp.einsum("btkc,kcd->btd", h1[:, idx2, :], wa2, precision=_PREC) + ba2
    att = jnp.mean(o2, axis=1)                                            # (B, C)
    scaled = att / temp[0]
    gate = jnp.where(scaled >= thr[0], jax.nn.sigmoid(scaled), 0.0)
    return x_nchw * gate[:, :, None, None]


if __name__ == "__main__":
    B, C, H, W = 2, 4, 16, 16          # in_channels = 4 spectral bands, 16x16 spatial
    Cr = C // 2                        # reduction ratio r = 2

    key = jax.random.PRNGKey(0)
    ks = jax.random.split(key, 16)

    def conv2d_w(k, cin, cout):
        return jax.random.normal(k, (3, 3, cin, cout), jnp.float32) * math.sqrt(2.0 / (9 * cin))

    def bias(k, cout):
        return jax.random.normal(k, (1, cout), jnp.float32) * 0.05

    w1, b1 = conv2d_w(ks[0], C, 128), bias(ks[1], 128)
    w2, b2 = conv2d_w(ks[2], 128, 96), bias(ks[3], 96)
    w3, b3 = conv2d_w(ks[4], 96, 64), bias(ks[5], 64)
    w4, b4 = conv2d_w(ks[6], 64, 48), bias(ks[7], 48)
    w5, b5 = conv2d_w(ks[8], 48, 64), bias(ks[9], 64)
    # Conv1d(1, Cr, k=32) weight stored as (k, out) ; Conv1d(Cr, C, k=32) as (k, in, out)
    wa1 = jax.random.normal(ks[10], (32, Cr), jnp.float32) * math.sqrt(1.0 / 32)
    ba1 = jax.random.normal(ks[11], (1, Cr), jnp.float32) * 0.05
    wa2 = jax.random.normal(ks[12], (32, Cr, C), jnp.float32) * math.sqrt(1.0 / (32 * Cr))
    ba2 = jax.random.normal(ks[13], (1, C), jnp.float32) * 0.05
    prelu_a = jnp.full((1,), 0.25, jnp.float32)          # nn.PReLU() default
    temperature = jnp.full((1,), 0.7, jnp.float32)
    threshold = jnp.full((1,), 0.07, jnp.float32)

    params = (w1, b1, w2, b2, w3, b3, w4, b4, w5, b5,
              wa1, ba1, prelu_a, wa2, ba2, temperature, threshold)
    prepared = prepare_params(params)                     # one-time numpy folding

    x = jax.random.normal(ks[14], (B, C, H, W), jnp.float32)

    out = jax.jit(band_attention_block)(x, prepared)
    out = jax.block_until_ready(out)

    ref = reference_forward(x, params)
    np.testing.assert_allclose(np.asarray(out), np.asarray(ref), rtol=1e-2, atol=1e-2)
    assert out.shape == (B, C, H, W)

    print("KERNEL_OK")
</pallas_src>

<mosaic_0001>
module attributes {stable_mosaic.version = 11 : i64} {
  func.func @_band_attention_kernel(%arg0: i32, %arg1: memref<1x16x16x4xf32, #tpu.memory_space<vmem>>, %arg2: memref<36x128xbf16, #tpu.memory_space<vmem>>, %arg3: memref<1x128xf32, #tpu.memory_space<vmem>>, %arg4: memref<3x3x128x96xbf16, #tpu.memory_space<vmem>>, %arg5: memref<1x96xf32, #tpu.memory_space<vmem>>, %arg6: memref<3x3x96x64xbf16, #tpu.memory_space<vmem>>, %arg7: memref<1x64xf32, #tpu.memory_space<vmem>>, %arg8: memref<3x3x64x48xbf16, #tpu.memory_space<vmem>>, %arg9: memref<1x48xf32, #tpu.memory_space<vmem>>, %arg10: memref<3x3x48x64xbf16, #tpu.memory_space<vmem>>, %arg11: memref<1x64xf32, #tpu.memory_space<vmem>>, %arg12: memref<66x64xf32, #tpu.memory_space<vmem>>, %arg13: memref<66x1xf32, #tpu.memory_space<vmem>>, %arg14: memref<66x4xf32, #tpu.memory_space<vmem>>, %arg15: memref<1x4xf32, #tpu.memory_space<vmem>>, %arg16: memref<1xf32, #tpu.memory_space<smem>>, %arg17: memref<1xf32, #tpu.memory_space<smem>>, %arg18: memref<1xf32, #tpu.memory_space<smem>>, %arg19: memref<1x1x4xf32, #tpu.memory_space<vmem>>) attributes {dimension_semantics = [#tpu.dimension_semantics<parallel>], iteration_bounds = array<i64: 2>, scalar_prefetch = 0 : i64, scratch_operands = 0 : i64, tpu.core_type = #tpu.core_type<tc>, window_params = [{transform_indices = @transform_0, window_bounds = array<i64: 1, 16, 16, 4>}, {pipeline_mode = #tpu.pipeline_mode<synchronous>, transform_indices = @transform_1, window_bounds = array<i64: 36, 128>}, {pipeline_mode = #tpu.pipeline_mode<synchronous>, transform_indices = @transform_2, window_bounds = array<i64: 1, 128>}, {pipeline_mode = #tpu.pipeline_mode<synchronous>, transform_indices = @transform_3, window_bounds = array<i64: 3, 3, 128, 96>}, {pipeline_mode = #tpu.pipeline_mode<synchronous>, transform_indices = @transform_4, window_bounds = array<i64: 1, 96>}, {pipeline_mode = #tpu.pipeline_mode<synchronous>, transform_indices = @transform_5, window_bounds = array<i64: 3, 3, 96, 64>}, {pipeline_mode = #tpu.pipeline_mode<synchronous>, transform_indices = @transform_6, window_bounds = array<i64: 1, 64>}, {pipeline_mode = #tpu.pipeline_mode<synchronous>, transform_indices = @transform_7, window_bounds = array<i64: 3, 3, 64, 48>}, {pipeline_mode = #tpu.pipeline_mode<synchronous>, transform_indices = @transform_8, window_bounds = array<i64: 1, 48>}, {pipeline_mode = #tpu.pipeline_mode<synchronous>, transform_indices = @transform_9, window_bounds = array<i64: 3, 3, 48, 64>}, {pipeline_mode = #tpu.pipeline_mode<synchronous>, transform_indices = @transform_10, window_bounds = array<i64: 1, 64>}, {pipeline_mode = #tpu.pipeline_mode<synchronous>, transform_indices = @transform_11, window_bounds = array<i64: 66, 64>}, {pipeline_mode = #tpu.pipeline_mode<synchronous>, transform_indices = @transform_12, window_bounds = array<i64: 66, 1>}, {pipeline_mode = #tpu.pipeline_mode<synchronous>, transform_indices = @transform_13, window_bounds = array<i64: 66, 4>}, {pipeline_mode = #tpu.pipeline_mode<synchronous>, transform_indices = @transform_14, window_bounds = array<i64: 1, 4>}, {transform_indices = @transform_15, window_bounds = array<i64: 1>}, {transform_indices = @transform_16, window_bounds = array<i64: 1>}, {transform_indices = @transform_17, window_bounds = array<i64: 1>}, {transform_indices = @transform_18, window_bounds = array<i64: 1, 1, 4>}]} {
    %c0 = arith.constant 0 : index
    %c0_0 = arith.constant 0 : index
    %c0_1 = arith.constant 0 : index
    %c0_2 = arith.constant 0 : index
    %0 = vector.load %arg1[%c0, %c0_0, %c0_1, %c0_2] : memref<1x16x16x4xf32, #tpu.memory_space<vmem>>, vector<1x16x16x4xf32>
    %1 = vector.shape_cast %0 : vector<1x16x16x4xf32> to vector<16x16x4xf32>
    %cst = arith.constant 0.000000e+00 : f32
    %2 = vector.broadcast %cst : f32 to vector<1x16x4xf32>
    %3 = tpu.concatenate %2, %1, %2 in 0 : vector<1x16x4xf32>, vector<16x16x4xf32>, vector<1x16x4xf32> -> vector<18x16x4xf32>
    %4 = tpu.iota {dimensions = array<i32: 1>} : vector<18x16x4xi32>
    %c0_i32 = arith.constant 0 : i32
    %5 = vector.broadcast %c0_i32 : i32 to vector<18x16x4xi32>
    %6 = arith.cmpi sgt, %4, %5 : vector<18x16x4xi32>
    %c1_i32 = arith.constant 1 : i32
    %7 = tpu.dynamic_rotate %3 by %c1_i32 dim 1 : vector<18x16x4xf32>, i32 -> vector<18x16x4xf32>
    %cst_3 = arith.constant 0.000000e+00 : f32
    %8 = vector.broadcast %cst_3 : f32 to vector<18x16x4xf32>
    %9 = arith.select %6, %7, %8 : vector<18x16x4xi1>, vector<18x16x4xf32>
    %c15_i32 = arith.constant 15 : i32
    %10 = vector.broadcast %c15_i32 : i32 to vector<18x16x4xi32>
    %11 = arith.cmpi slt, %4, %10 : vector<18x16x4xi32>
    %c15_i32_4 = arith.constant 15 : i32
    %12 = tpu.dynamic_rotate %3 by %c15_i32_4 dim 1 : vector<18x16x4xf32>, i32 -> vector<18x16x4xf32>
    %cst_5 = arith.constant 0.000000e+00 : f32
    %13 = vector.broadcast %cst_5 : f32 to vector<18x16x4xf32>
    %14 = arith.select %11, %12, %13 : vector<18x16x4xi1>, vector<18x16x4xf32>
    %15 = arith.truncf %9 : vector<18x16x4xf32> to vector<18x16x4xbf16>
    %16 = arith.truncf %3 : vector<18x16x4xf32> to vector<18x16x4xbf16>
    %17 = arith.truncf %14 : vector<18x16x4xf32> to vector<18x16x4xbf16>
    %18 = tpu.concatenate %15, %16, %17 in 2 : vector<18x16x4xbf16>, vector<18x16x4xbf16>, vector<18x16x4xbf16> -> vector<18x16x12xbf16>
    %19 = vector.extract_strided_slice %18 {offsets = [0, 0, 0], sizes = [16, 16, 12], strides = [1, 1, 1]} : vector<18x16x12xbf16> to vector<16x16x12xbf16>
    %20 = vector.extract_strided_slice %18 {offsets = [1, 0, 0], sizes = [16, 16, 12], strides = [1, 1, 1]} : vector<18x16x12xbf16> to vector<16x16x12xbf16>
    %21 = vector.extract_strided_slice %18 {offsets = [2, 0, 0], sizes = [16, 16, 12], strides = [1, 1, 1]} : vector<18x16x12xbf16> to vector<16x16x12xbf16>
    %22 = tpu.concatenate %19, %20, %21 in 2 : vector<16x16x12xbf16>, vector<16x16x12xbf16>, vector<16x16x12xbf16> -> vector<16x16x36xbf16>
    %23 = vector.shape_cast %22 : vector<16x16x36xbf16> to vector<256x36xbf16>
    %c0_6 = arith.constant 0 : index
    %c0_7 = arith.constant 0 : index
    %24 = vector.load %arg2[%c0_6, %c0_7] : memref<36x128xbf16, #tpu.memory_space<vmem>>, vector<36x128xbf16>
    %cst_8 = arith.constant dense<0.000000e+00> : vector<256x128xf32>
    %25 = tpu.matmul %23, %24, %cst_8 {dimension_numbers = #tpu.dot_dimension_numbers<[1], [0], [0], [1], [0, 0, 1, 1], [], []>} : vector<256x36xbf16>, vector<36x128xbf16>, vector<256x128xf32> -> vector<256x128xf32>
    %c0_9 = arith.constant 0 : index
    %c0_10 = arith.constant 0 : index
    %26 = vector.load %arg3[%c0_9, %c0_10] : memref<1x128xf32, #tpu.memory_space<vmem>>, vector<1x128xf32>
    %27 = vector.broadcast %26 : vector<1x128xf32> to vector<256x128xf32>
    %28 = arith.addf %25, %27 : vector<256x128xf32>
    %cst_11 = arith.constant 0.000000e+00 : f32
    %29 = vector.broadcast %cst_11 : f32 to vector<256x128xf32>
    %30 = arith.maximumf %28, %29 : vector<256x128xf32>
    %31 = vector.shape_cast %30 : vector<256x128xf32> to vector<16x16x128xf32>
    %32 = vector.shape_cast %31 : vector<16x16x128xf32> to vector<8x2x16x128xf32>
    %33 = vector.extract_strided_slice %32 {offsets = [0, 0, 0, 0], sizes = [8, 1, 16, 128], strides = [1, 1, 1, 1]} : vector<8x2x16x128xf32> to vector<8x1x16x128xf32>
    %34 = vector.shape_cast %33 : vector<8x1x16x128xf32> to vector<8x16x128xf32>
    %35 = vector.extract_strided_slice %32 {offsets = [0, 1, 0, 0], sizes = [8, 1, 16, 128], strides = [1, 1, 1, 1]} : vector<8x2x16x128xf32> to vector<8x1x16x128xf32>
    %36 = vector.shape_cast %35 : vector<8x1x16x128xf32> to vector<8x16x128xf32>
    %37 = arith.maximumf %34, %36 : vector<8x16x128xf32>
    %38 = vector.extract_strided_slice %37 {offsets = [0, 0, 0], sizes = [8, 1, 128], strides = [1, 1, 1]} : vector<8x16x128xf32> to vector<8x1x128xf32>
    %39 = vector.extract_strided_slice %37 {offsets = [0, 1, 0], sizes = [8, 1, 128], strides = [1, 1, 1]} : vector<8x16x128xf32> to vector<8x1x128xf32>
    %40 = arith.maximumf %38, %39 : vector<8x1x128xf32>
    %41 = vector.extract_strided_slice %37 {offsets = [0, 2, 0], sizes = [8, 1, 128], strides = [1, 1, 1]} : vector<8x16x128xf32> to vector<8x1x128xf32>
    %42 = vector.extract_strided_slice %37 {offsets = [0, 3, 0], sizes = [8, 1, 128], strides = [1, 1, 1]} : vector<8x16x128xf32> to vector<8x1x128xf32>
    %43 = arith.maximumf %41, %42 : vector<8x1x128xf32>
    %44 = vector.extract_strided_slice %37 {offsets = [0, 4, 0], sizes = [8, 1, 128], strides = [1, 1, 1]} : vector<8x16x128xf32> to vector<8x1x128xf32>
    %45 = vector.extract_strided_slice %37 {offsets = [0, 5, 0], sizes = [8, 1, 128], strides = [1, 1, 1]} : vector<8x16x128xf32> to vector<8x1x128xf32>
    %46 = arith.maximumf %44, %45 : vector<8x1x128xf32>
    %47 = vector.extract_strided_slice %37 {offsets = [0, 6, 0], sizes = [8, 1, 128], strides = [1, 1, 1]} : vector<8x16x128xf32> to vector<8x1x128xf32>
    %48 = vector.extract_strided_slice %37 {offsets = [0, 7, 0], sizes = [8, 1, 128], strides = [1, 1, 1]} : vector<8x16x128xf32> to vector<8x1x128xf32>
    %49 = arith.maximumf %47, %48 : vector<8x1x128xf32>
    %50 = vector.extract_strided_slice %37 {offsets = [0, 8, 0], sizes = [8, 1, 128], strides = [1, 1, 1]} : vector<8x16x128xf32> to vector<8x1x128xf32>
    %51 = vector.extract_strided_slice %37 {offsets = [0, 9, 0], sizes = [8, 1, 128], strides = [1, 1, 1]} : vector<8x16x128xf32> to vector<8x1x128xf32>
    %52 = arith.maximumf %50, %51 : vector<8x1x128xf32>
    %53 = vector.extract_strided_slice %37 {offsets = [0, 10, 0], sizes = [8, 1, 128], strides = [1, 1, 1]} : vector<8x16x128xf32> to vector<8x1x128xf32>
    %54 = vector.extract_strided_slice %37 {offsets = [0, 11, 0], sizes = [8, 1, 128], strides = [1, 1, 1]} : vector<8x16x128xf32> to vector<8x1x128xf32>
    %55 = arith.maximumf %53, %54 : vector<8x1x128xf32>
    %56 = vector.extract_strided_slice %37 {offsets = [0, 12, 0], sizes = [8, 1, 128], strides = [1, 1, 1]} : vector<8x16x128xf32> to vector<8x1x128xf32>
    %57 = vector.extract_strided_slice %37 {offsets = [0, 13, 0], sizes = [8, 1, 128], strides = [1, 1, 1]} : vector<8x16x128xf32> to vector<8x1x128xf32>
    %58 = arith.maximumf %56, %57 : vector<8x1x128xf32>
    %59 = vector.extract_strided_slice %37 {offsets = [0, 14, 0], sizes = [8, 1, 128], strides = [1, 1, 1]} : vector<8x16x128xf32> to vector<8x1x128xf32>
    %60 = vector.extract_strided_slice %37 {offsets = [0, 15, 0], sizes = [8, 1, 128], strides = [1, 1, 1]} : vector<8x16x128xf32> to vector<8x1x128xf32>
    %61 = arith.maximumf %59, %60 : vector<8x1x128xf32>
    %62 = tpu.concatenate %40, %43, %46, %49, %52, %55, %58, %61 in 1 : vector<8x1x128xf32>, vector<8x1x128xf32>, vector<8x1x128xf32>, vector<8x1x128xf32>, vector<8x1x128xf32>, vector<8x1x128xf32>, vector<8x1x128xf32>, vector<8x1x128xf32> -> vector<8x8x128xf32>
    %cst_12 = arith.constant 0.000000e+00 : f32
    %63 = vector.broadcast %cst_12 : f32 to vector<1x8x128xf32>
    %64 = tpu.concatenate %63, %62, %63 in 0 : vector<1x8x128xf32>, vector<8x8x128xf32>, vector<1x8x128xf32> -> vector<10x8x128xf32>
    %65 = tpu.iota {dimensions = array<i32: 1>} : vector<10x8x128xi32>
    %c0_i32_13 = arith.constant 0 : i32
    %66 = vector.broadcast %c0_i32_13 : i32 to vector<10x8x128xi32>
    %67 = arith.cmpi sgt, %65, %66 : vector<10x8x128xi32>
    %c1_i32_14 = arith.constant 1 : i32
    %68 = tpu.dynamic_rotate %64 by %c1_i32_14 dim 1 : vector<10x8x128xf32>, i32 -> vector<10x8x128xf32>
    %cst_15 = arith.constant 0.000000e+00 : f32
    %69 = vector.broadcast %cst_15 : f32 to vector<10x8x128xf32>
    %70 = arith.select %67, %68, %69 : vector<10x8x128xi1>, vector<10x8x128xf32>
    %c7_i32 = arith.constant 7 : i32
    %71 = vector.broadcast %c7_i32 : i32 to vector<10x8x128xi32>
    %72 = arith.cmpi slt, %65, %71 : vector<10x8x128xi32>
    %c7_i32_16 = arith.constant 7 : i32
    %73 = tpu.dynamic_rotate %64 by %c7_i32_16 dim 1 : vector<10x8x128xf32>, i32 -> vector<10x8x128xf32>
    %cst_17 = arith.constant 0.000000e+00 : f32
    %74 = vector.broadcast %cst_17 : f32 to vector<10x8x128xf32>
    %75 = arith.select %72, %73, %74 : vector<10x8x128xi1>, vector<10x8x128xf32>
    %76 = arith.truncf %70 : vector<10x8x128xf32> to vector<10x8x128xbf16>
    %77 = arith.truncf %64 : vector<10x8x128xf32> to vector<10x8x128xbf16>
    %78 = arith.truncf %75 : vector<10x8x128xf32> to vector<10x8x128xbf16>
    %cst_18 = arith.constant 0.000000e+00 : f32
    %79 = vector.broadcast %cst_18 : f32 to vector<64x96xf32>
    %80 = vector.extract_strided_slice %76 {offsets = [0, 0, 0], sizes = [8, 8, 128], strides = [1, 1, 1]} : vector<10x8x128xbf16> to vector<8x8x128xbf16>
    %81 = vector.shape_cast %80 : vector<8x8x128xbf16> to vector<64x128xbf16>
    %c0_19 = arith.constant 0 : index
    %c0_20 = arith.constant 0 : index
    %c0_21 = arith.constant 0 : index
    %c0_22 = arith.constant 0 : index
    %82 = vector.load %arg4[%c0_19, %c0_20, %c0_21, %c0_22] : memref<3x3x128x96xbf16, #tpu.memory_space<vmem>>, vector<1x1x128x96xbf16>
    %83 = vector.shape_cast %82 : vector<1x1x128x96xbf16> to vector<128x96xbf16>
    %cst_23 = arith.constant dense<0.000000e+00> : vector<64x96xf32>
    %84 = tpu.matmul %81, %83, %cst_23 {dimension_numbers = #tpu.dot_dimension_numbers<[1], [0], [0], [1], [0, 0, 1, 1], [], []>} : vector<64x128xbf16>, vector<128x96xbf16>, vector<64x96xf32> -> vector<64x96xf32>
    %85 = arith.addf %79, %84 : vector<64x96xf32>
    %86 = vector.extract_strided_slice %77 {offsets = [0, 0, 0], sizes = [8, 8, 128], strides = [1, 1, 1]} : vector<10x8x128xbf16> to vector<8x8x128xbf16>
    %87 = vector.shape_cast %86 : vector<8x8x128xbf16> to vector<64x128xbf16>
    %c0_24 = arith.constant 0 : index
    %c1 = arith.constant 1 : index
    %c0_25 = arith.constant 0 : index
    %c0_26 = arith.constant 0 : index
    %88 = vector.load %arg4[%c0_24, %c1, %c0_25, %c0_26] : memref<3x3x128x96xbf16, #tpu.memory_space<vmem>>, vector<1x1x128x96xbf16>
    %89 = vector.shape_cast %88 : vector<1x1x128x96xbf16> to vector<128x96xbf16>
    %cst_27 = arith.constant dense<0.000000e+00> : vector<64x96xf32>
    %90 = tpu.matmul %87, %89, %cst_27 {dimension_numbers = #tpu.dot_dimension_numbers<[1], [0], [0], [1], [0, 0, 1, 1], [], []>} : vector<64x128xbf16>, vector<128x96xbf16>, vector<64x96xf32> -> vector<64x96xf32>
    %91 = arith.addf %85, %90 : vector<64x96xf32>
    %92 = vector.extract_strided_slice %78 {offsets = [0, 0, 0], sizes = [8, 8, 128], strides = [1, 1, 1]} : vector<10x8x128xbf16> to vector<8x8x128xbf16>
    %93 = vector.shape_cast %92 : vector<8x8x128xbf16> to vector<64x128xbf16>
    %c0_28 = arith.constant 0 : index
    %c2 = arith.constant 2 : index
    %c0_29 = arith.constant 0 : index
    %c0_30 = arith.constant 0 : index
    %94 = vector.load %arg4[%c0_28, %c2, %c0_29, %c0_30] : memref<3x3x128x96xbf16, #tpu.memory_space<vmem>>, vector<1x1x128x96xbf16>
    %95 = vector.shape_cast %94 : vector<1x1x128x96xbf16> to vector<128x96xbf16>
    %cst_31 = arith.constant dense<0.000000e+00> : vector<64x96xf32>
    %96 = tpu.matmul %93, %95, %cst_31 {dimension_numbers = #tpu.dot_dimension_numbers<[1], [0], [0], [1], [0, 0, 1, 1], [], []>} : vector<64x128xbf16>, vector<128x96xbf16>, vector<64x96xf32> -> vector<64x96xf32>
    %97 = arith.addf %91, %96 : vector<64x96xf32>
    %98 = vector.extract_strided_slice %76 {offsets = [1, 0, 0], sizes = [8, 8, 128], strides = [1, 1, 1]} : vector<10x8x128xbf16> to vector<8x8x128xbf16>
    %99 = vector.shape_cast %98 : vector<8x8x128xbf16> to vector<64x128xbf16>
    %c1_32 = arith.constant 1 : index
    %c0_33 = arith.constant 0 : index
    %c0_34 = arith.constant 0 : index
    %c0_35 = arith.constant 0 : index
    %100 = vector.load %arg4[%c1_32, %c0_33, %c0_34, %c0_35] : memref<3x3x128x96xbf16, #tpu.memory_space<vmem>>, vector<1x1x128x96xbf16>
    %101 = vector.shape_cast %100 : vector<1x1x128x96xbf16> to vector<128x96xbf16>
    %cst_36 = arith.constant dense<0.000000e+00> : vector<64x96xf32>
    %102 = tpu.matmul %99, %101, %cst_36 {dimension_numbers = #tpu.dot_dimension_numbers<[1], [0], [0], [1], [0, 0, 1, 1], [], []>} : vector<64x128xbf16>, vector<128x96xbf16>, vector<64x96xf32> -> vector<64x96xf32>
    %103 = arith.addf %97, %102 : vector<64x96xf32>
    %104 = vector.extract_strided_slice %77 {offsets = [1, 0, 0], sizes = [8, 8, 128], strides = [1, 1, 1]} : vector<10x8x128xbf16> to vector<8x8x128xbf16>
    %105 = vector.shape_cast %104 : vector<8x8x128xbf16> to vector<64x128xbf16>
    %c1_37 = arith.constant 1 : index
    %c1_38 = arith.constant 1 : index
    %c0_39 = arith.constant 0 : index
    %c0_40 = arith.constant 0 : index
    %106 = vector.load %arg4[%c1_37, %c1_38, %c0_39, %c0_40] : memref<3x3x128x96xbf16, #tpu.memory_space<vmem>>, vector<1x1x128x96xbf16>
    %107 = vector.shape_cast %106 : vector<1x1x128x96xbf16> to vector<128x96xbf16>
    %cst_41 = arith.constant dense<0.000000e+00> : vector<64x96xf32>
    %108 = tpu.matmul %105, %107, %cst_41 {dimension_numbers = #tpu.dot_dimension_numbers<[1], [0], [0], [1], [0, 0, 1, 1], [], []>} : vector<64x128xbf16>, vector<128x96xbf16>, vector<64x96xf32> -> vector<64x96xf32>
    %109 = arith.addf %103, %108 : vector<64x96xf32>
    %110 = vector.extract_strided_slice %78 {offsets = [1, 0, 0], sizes = [8, 8, 128], strides = [1, 1, 1]} : vector<10x8x128xbf16> to vector<8x8x128xbf16>
    %111 = vector.shape_cast %110 : vector<8x8x128xbf16> to vector<64x128xbf16>
    %c1_42 = arith.constant 1 : index
    %c2_43 = arith.constant 2 : index
    %c0_44 = arith.constant 0 : index
    %c0_45 = arith.constant 0 : index
    %112 = vector.load %arg4[%c1_42, %c2_43, %c0_44, %c0_45] : memref<3x3x128x96xbf16, #tpu.memory_space<vmem>>, vector<1x1x128x96xbf16>
    %113 = vector.shape_cast %112 : vector<1x1x128x96xbf16> to vector<128x96xbf16>
    %cst_46 = arith.constant dense<0.000000e+00> : vector<64x96xf32>
    %114 = tpu.matmul %111, %113, %cst_46 {dimension_numbers = #tpu.dot_dimension_numbers<[1], [0], [0], [1], [0, 0, 1, 1], [], []>} : vector<64x128xbf16>, vector<128x96xbf16>, vector<64x96xf32> -> vector<64x96xf32>
    %115 = arith.addf %109, %114 : vector<64x96xf32>
    %116 = vector.extract_strided_slice %76 {offsets = [2, 0, 0], sizes = [8, 8, 128], strides = [1, 1, 1]} : vector<10x8x128xbf16> to vector<8x8x128xbf16>
    %117 = vector.shape_cast %116 : vector<8x8x128xbf16> to vector<64x128xbf16>
    %c2_47 = arith.constant 2 : index
    %c0_48 = arith.constant 0 : index
    %c0_49 = arith.constant 0 : index
    %c0_50 = arith.constant 0 : index
    %118 = vector.load %arg4[%c2_47, %c0_48, %c0_49, %c0_50] : memref<3x3x128x96xbf16, #tpu.memory_space<vmem>>, vector<1x1x128x96xbf16>
    %119 = vector.shape_cast %118 : vector<1x1x128x96xbf16> to vector<128x96xbf16>
    %cst_51 = arith.constant dense<0.000000e+00> : vector<64x96xf32>
    %120 = tpu.matmul %117, %119, %cst_51 {dimension_numbers = #tpu.dot_dimension_numbers<[1], [0], [0], [1], [0, 0, 1, 1], [], []>} : vector<64x128xbf16>, vector<128x96xbf16>, vector<64x96xf32> -> vector<64x96xf32>
    %121 = arith.addf %115, %120 : vector<64x96xf32>
    %122 = vector.extract_strided_slice %77 {offsets = [2, 0, 0], sizes = [8, 8, 128], strides = [1, 1, 1]} : vector<10x8x128xbf16> to vector<8x8x128xbf16>
    %123 = vector.shape_cast %122 : vector<8x8x128xbf16> to vector<64x128xbf16>
    %c2_52 = arith.constant 2 : index
    %c1_53 = arith.constant 1 : index
    %c0_54 = arith.constant 0 : index
    %c0_55 = arith.constant 0 : index
    %124 = vector.load %arg4[%c2_52, %c1_53, %c0_54, %c0_55] : memref<3x3x128x96xbf16, #tpu.memory_space<vmem>>, vector<1x1x128x96xbf16>
    %125 = vector.shape_cast %124 : vector<1x1x128x96xbf16> to vector<128x96xbf16>
    %cst_56 = arith.constant dense<0.000000e+00> : vector<64x96xf32>
    %126 = tpu.matmul %123, %125, %cst_56 {dimension_numbers = #tpu.dot_dimension_numbers<[1], [0], [0], [1], [0, 0, 1, 1], [], []>} : vector<64x128xbf16>, vector<128x96xbf16>, vector<64x96xf32> -> vector<64x96xf32>
    %127 = arith.addf %121, %126 : vector<64x96xf32>
    %128 = vector.extract_strided_slice %78 {offsets = [2, 0, 0], sizes = [8, 8, 128], strides = [1, 1, 1]} : vector<10x8x128xbf16> to vector<8x8x128xbf16>
    %129 = vector.shape_cast %128 : vector<8x8x128xbf16> to vector<64x128xbf16>
    %c2_57 = arith.constant 2 : index
    %c2_58 = arith.constant 2 : index
    %c0_59 = arith.constant 0 : index
    %c0_60 = arith.constant 0 : index
    %130 = vector.load %arg4[%c2_57, %c2_58, %c0_59, %c0_60] : memref<3x3x128x96xbf16, #tpu.memory_space<vmem>>, vector<1x1x128x96xbf16>
    %131 = vector.shape_cast %130 : vector<1x1x128x96xbf16> to vector<128x96xbf16>
    %cst_61 = arith.constant dense<0.000000e+00> : vector<64x96xf32>
    %132 = tpu.matmul %129, %131, %cst_61 {dimension_numbers = #tpu.dot_dimension_numbers<[1], [0], [0], [1], [0, 0, 1, 1], [], []>} : vector<64x128xbf16>, vector<128x96xbf16>, vector<64x96xf32> -> vector<64x96xf32>
    %133 = arith.addf %127, %132 : vector<64x96xf32>
    %c0_62 = arith.constant 0 : index
    %c0_63 = arith.constant 0 : index
    %134 = vector.load %arg5[%c0_62, %c0_63] : memref<1x96xf32, #tpu.memory_space<vmem>>, vector<1x96xf32>
    %135 = vector.broadcast %134 : vector<1x96xf32> to vector<64x96xf32>
    %136 = arith.addf %133, %135 : vector<64x96xf32>
    %cst_64 = arith.constant 0.000000e+00 : f32
    %137 = vector.broadcast %cst_64 : f32 to vector<64x96xf32>
    %138 = arith.maximumf %136, %137 : vector<64x96xf32>
    %139 = vector.shape_cast %138 : vector<64x96xf32> to vector<8x8x96xf32>
    %cst_65 = arith.constant 0.000000e+00 : f32
    %140 = vector.broadcast %cst_65 : f32 to vector<1x8x96xf32>
    %141 = tpu.concatenate %140, %139, %140 in 0 : vector<1x8x96xf32>, vector<8x8x96xf32>, vector<1x8x96xf32> -> vector<10x8x96xf32>
    %142 = tpu.iota {dimensions = array<i32: 1>} : vector<10x8x96xi32>
    %c0_i32_66 = arith.constant 0 : i32
    %143 = vector.broadcast %c0_i32_66 : i32 to vector<10x8x96xi32>
    %144 = arith.cmpi sgt, %142, %143 : vector<10x8x96xi32>
    %c1_i32_67 = arith.constant 1 : i32
    %145 = tpu.dynamic_rotate %141 by %c1_i32_67 dim 1 : vector<10x8x96xf32>, i32 -> vector<10x8x96xf32>
    %cst_68 = arith.constant 0.000000e+00 : f32
    %146 = vector.broadcast %cst_68 : f32 to vector<10x8x96xf32>
    %147 = arith.select %144, %145, %146 : vector<10x8x96xi1>, vector<10x8x96xf32>
    %c7_i32_69 = arith.constant 7 : i32
    %148 = vector.broadcast %c7_i32_69 : i32 to vector<10x8x96xi32>
    %149 = arith.cmpi slt, %142, %148 : vector<10x8x96xi32>
    %c7_i32_70 = arith.constant 7 : i32
    %150 = tpu.dynamic_rotate %141 by %c7_i32_70 dim 1 : vector<10x8x96xf32>, i32 -> vector<10x8x96xf32>
    %cst_71 = arith.constant 0.000000e+00 : f32
    %151 = vector.broadcast %cst_71 : f32 to vector<10x8x96xf32>
    %152 = arith.select %149, %150, %151 : vector<10x8x96xi1>, vector<10x8x96xf32>
    %153 = arith.truncf %147 : vector<10x8x96xf32> to vector<10x8x96xbf16>
    %154 = arith.truncf %141 : vector<10x8x96xf32> to vector<10x8x96xbf16>
    %155 = arith.truncf %152 : vector<10x8x96xf32> to vector<10x8x96xbf16>
    %cst_72 = arith.constant 0.000000e+00 : f32
    %156 = vector.broadcast %cst_72 : f32 to vector<64x64xf32>
    %157 = vector.extract_strided_slice %153 {offsets = [0, 0, 0], sizes = [8, 8, 96], strides = [1, 1, 1]} : vector<10x8x96xbf16> to vector<8x8x96xbf16>
    %158 = vector.shape_cast %157 : vector<8x8x96xbf16> to vector<64x96xbf16>
    %c0_73 = arith.constant 0 : index
    %c0_74 = arith.constant 0 : index
    %c0_75 = arith.constant 0 : index
    %c0_76 = arith.constant 0 : index
    %159 = vector.load %arg6[%c0_73, %c0_74, %c0_75, %c0_76] : memref<3x3x96x64xbf16, #tpu.memory_space<vmem>>, vector<1x1x96x64xbf16>
    %160 = vector.shape_cast %159 : vector<1x1x96x64xbf16> to vector<96x64xbf16>
    %cst_77 = arith.constant dense<0.000000e+00> : vector<64x64xf32>
    %161 = tpu.matmul %158, %160, %cst_77 {dimension_numbers = #tpu.dot_dimension_numbers<[1], [0], [0], [1], [0, 0, 1, 1], [], []>} : vector<64x96xbf16>, vector<96x64xbf16>, vector<64x64xf32> -> vector<64x64xf32>
    %162 = arith.addf %156, %161 : vector<64x64xf32>
    %163 = vector.extract_strided_slice %154 {offsets = [0, 0, 0], sizes = [8, 8, 96], strides = [1, 1, 1]} : vector<10x8x96xbf16> to vector<8x8x96xbf16>
    %164 = vector.shape_cast %163 : vector<8x8x96xbf16> to vector<64x96xbf16>
    %c0_78 = arith.constant 0 : index
    %c1_79 = arith.constant 1 : index
    %c0_80 = arith.constant 0 : index
    %c0_81 = arith.constant 0 : index
    %165 = vector.load %arg6[%c0_78, %c1_79, %c0_80, %c0_81] : memref<3x3x96x64xbf16, #tpu.memory_space<vmem>>, vector<1x1x96x64xbf16>
    %166 = vector.shape_cast %165 : vector<1x1x96x64xbf16> to vector<96x64xbf16>
    %cst_82 = arith.constant dense<0.000000e+00> : vector<64x64xf32>
    %167 = tpu.matmul %164, %166, %cst_82 {dimension_numbers = #tpu.dot_dimension_numbers<[1], [0], [0], [1], [0, 0, 1, 1], [], []>} : vector<64x96xbf16>, vector<96x64xbf16>, vector<64x64xf32> -> vector<64x64xf32>
    %168 = arith.addf %162, %167 : vector<64x64xf32>
    %169 = vector.extract_strided_slice %155 {offsets = [0, 0, 0], sizes = [8, 8, 96], strides = [1, 1, 1]} : vector<10x8x96xbf16> to vector<8x8x96xbf16>
    %170 = vector.shape_cast %169 : vector<8x8x96xbf16> to vector<64x96xbf16>
    %c0_83 = arith.constant 0 : index
    %c2_84 = arith.constant 2 : index
    %c0_85 = arith.constant 0 : index
    %c0_86 = arith.constant 0 : index
    %171 = vector.load %arg6[%c0_83, %c2_84, %c0_85, %c0_86] : memref<3x3x96x64xbf16, #tpu.memory_space<vmem>>, vector<1x1x96x64xbf16>
    %172 = vector.shape_cast %171 : vector<1x1x96x64xbf16> to vector<96x64xbf16>
    %cst_87 = arith.constant dense<0.000000e+00> : vector<64x64xf32>
    %173 = tpu.matmul %170, %172, %cst_87 {dimension_numbers = #tpu.dot_dimension_numbers<[1], [0], [0], [1], [0, 0, 1, 1], [], []>} : vector<64x96xbf16>, vector<96x64xbf16>, vector<64x64xf32> -> vector<64x64xf32>
    %174 = arith.addf %168, %173 : vector<64x64xf32>
    %175 = vector.extract_strided_slice %153 {offsets = [1, 0, 0], sizes = [8, 8, 96], strides = [1, 1, 1]} : vector<10x8x96xbf16> to vector<8x8x96xbf16>
    %176 = vector.shape_cast %175 : vector<8x8x96xbf16> to vector<64x96xbf16>
    %c1_88 = arith.constant 1 : index
    %c0_89 = arith.constant 0 : index
    %c0_90 = arith.constant 0 : index
    %c0_91 = arith.constant 0 : index
    %177 = vector.load %arg6[%c1_88, %c0_89, %c0_90, %c0_91] : memref<3x3x96x64xbf16, #tpu.memory_space<vmem>>, vector<1x1x96x64xbf16>
    %178 = vector.shape_cast %177 : vector<1x1x96x64xbf16> to vector<96x64xbf16>
    %cst_92 = arith.constant dense<0.000000e+00> : vector<64x64xf32>
    %179 = tpu.matmul %176, %178, %cst_92 {dimension_numbers = #tpu.dot_dimension_numbers<[1], [0], [0], [1], [0, 0, 1, 1], [], []>} : vector<64x96xbf16>, vector<96x64xbf16>, vector<64x64xf32> -> vector<64x64xf32>
    %180 = arith.addf %174, %179 : vector<64x64xf32>
    %181 = vector.extract_strided_slice %154 {offsets = [1, 0, 0], sizes = [8, 8, 96], strides = [1, 1, 1]} : vector<10x8x96xbf16> to vector<8x8x96xbf16>
    %182 = vector.shape_cast %181 : vector<8x8x96xbf16> to vector<64x96xbf16>
    %c1_93 = arith.constant 1 : index
    %c1_94 = arith.constant 1 : index
    %c0_95 = arith.constant 0 : index
    %c0_96 = arith.constant 0 : index
    %183 = vector.load %arg6[%c1_93, %c1_94, %c0_95, %c0_96] : memref<3x3x96x64xbf16, #tpu.memory_space<vmem>>, vector<1x1x96x64xbf16>
    %184 = vector.shape_cast %183 : vector<1x1x96x64xbf16> to vector<96x64xbf16>
    %cst_97 = arith.constant dense<0.000000e+00> : vector<64x64xf32>
    %185 = tpu.matmul %182, %184, %cst_97 {dimension_numbers = #tpu.dot_dimension_numbers<[1], [0], [0], [1], [0, 0, 1, 1], [], []>} : vector<64x96xbf16>, vector<96x64xbf16>, vector<64x64xf32> -> vector<64x64xf32>
    %186 = arith.addf %180, %185 : vector<64x64xf32>
    %187 = vector.extract_strided_slice %155 {offsets = [1, 0, 0], sizes = [8, 8, 96], strides = [1, 1, 1]} : vector<10x8x96xbf16> to vector<8x8x96xbf16>
    %188 = vector.shape_cast %187 : vector<8x8x96xbf16> to vector<64x96xbf16>
    %c1_98 = arith.constant 1 : index
    %c2_99 = arith.constant 2 : index
    %c0_100 = arith.constant 0 : index
    %c0_101 = arith.constant 0 : index
    %189 = vector.load %arg6[%c1_98, %c2_99, %c0_100, %c0_101] : memref<3x3x96x64xbf16, #tpu.memory_space<vmem>>, vector<1x1x96x64xbf16>
    %190 = vector.shape_cast %189 : vector<1x1x96x64xbf16> to vector<96x64xbf16>
    %cst_102 = arith.constant dense<0.000000e+00> : vector<64x64xf32>
    %191 = tpu.matmul %188, %190, %cst_102 {dimension_numbers = #tpu.dot_dimension_numbers<[1], [0], [0], [1], [0, 0, 1, 1], [], []>} : vector<64x96xbf16>, vector<96x64xbf16>, vector<64x64xf32> -> vector<64x64xf32>
    %192 = arith.addf %186, %191 : vector<64x64xf32>
    %193 = vector.extract_strided_slice %153 {offsets = [2, 0, 0], sizes = [8, 8, 96], strides = [1, 1, 1]} : vector<10x8x96xbf16> to vector<8x8x96xbf16>
    %194 = vector.shape_cast %193 : vector<8x8x96xbf16> to vector<64x96xbf16>
    %c2_103 = arith.constant 2 : index
    %c0_104 = arith.constant 0 : index
    %c0_105 = arith.constant 0 : index
    %c0_106 = arith.constant 0 : index
    %195 = vector.load %arg6[%c2_103, %c0_104, %c0_105, %c0_106] : memref<3x3x96x64xbf16, #tpu.memory_space<vmem>>, vector<1x1x96x64xbf16>
    %196 = vector.shape_cast %195 : vector<1x1x96x64xbf16> to vector<96x64xbf16>
    %cst_107 = arith.constant dense<0.000000e+00> : vector<64x64xf32>
    %197 = tpu.matmul %194, %196, %cst_107 {dimension_numbers = #tpu.dot_dimension_numbers<[1], [0], [0], [1], [0, 0, 1, 1], [], []>} : vector<64x96xbf16>, vector<96x64xbf16>, vector<64x64xf32> -> vector<64x64xf32>
    %198 = arith.addf %192, %197 : vector<64x64xf32>
    %199 = vector.extract_strided_slice %154 {offsets = [2, 0, 0], sizes = [8, 8, 96], strides = [1, 1, 1]} : vector<10x8x96xbf16> to vector<8x8x96xbf16>
    %200 = vector.shape_cast %199 : vector<8x8x96xbf16> to vector<64x96xbf16>
    %c2_108 = arith.constant 2 : index
    %c1_109 = arith.constant 1 : index
    %c0_110 = arith.constant 0 : index
    %c0_111 = arith.constant 0 : index
    %201 = vector.load %arg6[%c2_108, %c1_109, %c0_110, %c0_111] : memref<3x3x96x64xbf16, #tpu.memory_space<vmem>>, vector<1x1x96x64xbf16>
    %202 = vector.shape_cast %201 : vector<1x1x96x64xbf16> to vector<96x64xbf16>
    %cst_112 = arith.constant dense<0.000000e+00> : vector<64x64xf32>
    %203 = tpu.matmul %200, %202, %cst_112 {dimension_numbers = #tpu.dot_dimension_numbers<[1], [0], [0], [1], [0, 0, 1, 1], [], []>} : vector<64x96xbf16>, vector<96x64xbf16>, vector<64x64xf32> -> vector<64x64xf32>
    %204 = arith.addf %198, %203 : vector<64x64xf32>
    %205 = vector.extract_strided_slice %155 {offsets = [2, 0, 0], sizes = [8, 8, 96], strides = [1, 1, 1]} : vector<10x8x96xbf16> to vector<8x8x96xbf16>
    %206 = vector.shape_cast %205 : vector<8x8x96xbf16> to vector<64x96xbf16>
    %c2_113 = arith.constant 2 : index
    %c2_114 = arith.constant 2 : index
    %c0_115 = arith.constant 0 : index
    %c0_116 = arith.constant 0 : index
    %207 = vector.load %arg6[%c2_113, %c2_114, %c0_115, %c0_116] : memref<3x3x96x64xbf16, #tpu.memory_space<vmem>>, vector<1x1x96x64xbf16>
    %208 = vector.shape_cast %207 : vector<1x1x96x64xbf16> to vector<96x64xbf16>
    %cst_117 = arith.constant dense<0.000000e+00> : vector<64x64xf32>
    %209 = tpu.matmul %206, %208, %cst_117 {dimension_numbers = #tpu.dot_dimension_numbers<[1], [0], [0], [1], [0, 0, 1, 1], [], []>} : vector<64x96xbf16>, vector<96x64xbf16>, vector<64x64xf32> -> vector<64x64xf32>
    %210 = arith.addf %204, %209 : vector<64x64xf32>
    %c0_118 = arith.constant 0 : index
    %c0_119 = arith.constant 0 : index
    %211 = vector.load %arg7[%c0_118, %c0_119] : memref<1x64xf32, #tpu.memory_space<vmem>>, vector<1x64xf32>
    %212 = vector.broadcast %211 : vector<1x64xf32> to vector<64x64xf32>
    %213 = arith.addf %210, %212 : vector<64x64xf32>
    %cst_120 = arith.constant 0.000000e+00 : f32
    %214 = vector.broadcast %cst_120 : f32 to vector<64x64xf32>
    %215 = arith.maximumf %213, %214 : vector<64x64xf32>
    %216 = vector.shape_cast %215 : vector<64x64xf32> to vector<8x8x64xf32>
    %217 = vector.shape_cast %216 : vector<8x8x64xf32> to vector<4x2x8x64xf32>
    %218 = vector.extract_strided_slice %217 {offsets = [0, 0, 0, 0], sizes = [4, 1, 8, 64], strides = [1, 1, 1, 1]} : vector<4x2x8x64xf32> to vector<4x1x8x64xf32>
    %219 = vector.shape_cast %218 : vector<4x1x8x64xf32> to vector<4x8x64xf32>
    %220 = vector.extract_strided_slice %217 {offsets = [0, 1, 0, 0], sizes = [4, 1, 8, 64], strides = [1, 1, 1, 1]} : vector<4x2x8x64xf32> to vector<4x1x8x64xf32>
    %221 = vector.shape_cast %220 : vector<4x1x8x64xf32> to vector<4x8x64xf32>
    %222 = arith.maximumf %219, %221 : vector<4x8x64xf32>
    %223 = vector.extract_strided_slice %222 {offsets = [0, 0, 0], sizes = [4, 1, 64], strides = [1, 1, 1]} : vector<4x8x64xf32> to vector<4x1x64xf32>
    %224 = vector.extract_strided_slice %222 {offsets = [0, 1, 0], sizes = [4, 1, 64], strides = [1, 1, 1]} : vector<4x8x64xf32> to vector<4x1x64xf32>
    %225 = arith.maximumf %223, %224 : vector<4x1x64xf32>
    %226 = vector.extract_strided_slice %222 {offsets = [0, 2, 0], sizes = [4, 1, 64], strides = [1, 1, 1]} : vector<4x8x64xf32> to vector<4x1x64xf32>
    %227 = vector.extract_strided_slice %222 {offsets = [0, 3, 0], sizes = [4, 1, 64], strides = [1, 1, 1]} : vector<4x8x64xf32> to vector<4x1x64xf32>
    %228 = arith.maximumf %226, %227 : vector<4x1x64xf32>
    %229 = vector.extract_strided_slice %222 {offsets = [0, 4, 0], sizes = [4, 1, 64], strides = [1, 1, 1]} : vector<4x8x64xf32> to vector<4x1x64xf32>
    %230 = vector.extract_strided_slice %222 {offsets = [0, 5, 0], sizes = [4, 1, 64], strides = [1, 1, 1]} : vector<4x8x64xf32> to vector<4x1x64xf32>
    %231 = arith.maximumf %229, %230 : vector<4x1x64xf32>
    %232 = vector.extract_strided_slice %222 {offsets = [0, 6, 0], sizes = [4, 1, 64], strides = [1, 1, 1]} : vector<4x8x64xf32> to vector<4x1x64xf32>
    %233 = vector.extract_strided_slice %222 {offsets = [0, 7, 0], sizes = [4, 1, 64], strides = [1, 1, 1]} : vector<4x8x64xf32> to vector<4x1x64xf32>
    %234 = arith.maximumf %232, %233 : vector<4x1x64xf32>
    %235 = tpu.concatenate %225, %228, %231, %234 in 1 : vector<4x1x64xf32>, vector<4x1x64xf32>, vector<4x1x64xf32>, vector<4x1x64xf32> -> vector<4x4x64xf32>
    %cst_121 = arith.constant 0.000000e+00 : f32
    %236 = vector.broadcast %cst_121 : f32 to vector<1x4x64xf32>
    %237 = tpu.concatenate %236, %235, %236 in 0 : vector<1x4x64xf32>, vector<4x4x64xf32>, vector<1x4x64xf32> -> vector<6x4x64xf32>
    %238 = tpu.iota {dimensions = array<i32: 1>} : vector<6x4x64xi32>
    %c0_i32_122 = arith.constant 0 : i32
    %239 = vector.broadcast %c0_i32_122 : i32 to vector<6x4x64xi32>
    %240 = arith.cmpi sgt, %238, %239 : vector<6x4x64xi32>
    %c1_i32_123 = arith.constant 1 : i32
    %241 = tpu.dynamic_rotate %237 by %c1_i32_123 dim 1 : vector<6x4x64xf32>, i32 -> vector<6x4x64xf32>
    %cst_124 = arith.constant 0.000000e+00 : f32
    %242 = vector.broadcast %cst_124 : f32 to vector<6x4x64xf32>
    %243 = arith.select %240, %241, %242 : vector<6x4x64xi1>, vector<6x4x64xf32>
    %c3_i32 = arith.constant 3 : i32
    %244 = vector.broadcast %c3_i32 : i32 to vector<6x4x64xi32>
    %245 = arith.cmpi slt, %238, %244 : vector<6x4x64xi32>
    %c3_i32_125 = arith.constant 3 : i32
    %246 = tpu.dynamic_rotate %237 by %c3_i32_125 dim 1 : vector<6x4x64xf32>, i32 -> vector<6x4x64xf32>
    %cst_126 = arith.constant 0.000000e+00 : f32
    %247 = vector.broadcast %cst_126 : f32 to vector<6x4x64xf32>
    %248 = arith.select %245, %246, %247 : vector<6x4x64xi1>, vector<6x4x64xf32>
    %249 = arith.truncf %243 : vector<6x4x64xf32> to vector<6x4x64xbf16>
    %250 = arith.truncf %237 : vector<6x4x64xf32> to vector<6x4x64xbf16>
    %251 = arith.truncf %248 : vector<6x4x64xf32> to vector<6x4x64xbf16>
    %cst_127 = arith.constant 0.000000e+00 : f32
    %252 = vector.broadcast %cst_127 : f32 to vector<16x48xf32>
    %253 = vector.extract_strided_slice %249 {offsets = [0, 0, 0], sizes = [4, 4, 64], strides = [1, 1, 1]} : vector<6x4x64xbf16> to vector<4x4x64xbf16>
    %254 = vector.shape_cast %253 : vector<4x4x64xbf16> to vector<16x64xbf16>
    %c0_128 = arith.constant 0 : index
    %c0_129 = arith.constant 0 : index
    %c0_130 = arith.constant 0 : index
    %c0_131 = arith.constant 0 : index
    %255 = vector.load %arg8[%c0_128, %c0_129, %c0_130, %c0_131] : memref<3x3x64x48xbf16, #tpu.memory_space<vmem>>, vector<1x1x64x48xbf16>
    %256 = vector.shape_cast %255 : vector<1x1x64x48xbf16> to vector<64x48xbf16>
    %cst_132 = arith.constant dense<0.000000e+00> : vector<16x48xf32>
    %257 = tpu.matmul %254, %256, %cst_132 {dimension_numbers = #tpu.dot_dimension_numbers<[1], [0], [0], [1], [0, 0, 1, 1], [], []>} : vector<16x64xbf16>, vector<64x48xbf16>, vector<16x48xf32> -> vector<16x48xf32>
    %258 = arith.addf %252, %257 : vector<16x48xf32>
    %259 = vector.extract_strided_slice %250 {offsets = [0, 0, 0], sizes = [4, 4, 64], strides = [1, 1, 1]} : vector<6x4x64xbf16> to vector<4x4x64xbf16>
    %260 = vector.shape_cast %259 : vector<4x4x64xbf16> to vector<16x64xbf16>
    %c0_133 = arith.constant 0 : index
    %c1_134 = arith.constant 1 : index
    %c0_135 = arith.constant 0 : index
    %c0_136 = arith.constant 0 : index
    %261 = vector.load %arg8[%c0_133, %c1_134, %c0_135, %c0_136] : memref<3x3x64x48xbf16, #tpu.memory_space<vmem>>, vector<1x1x64x48xbf16>
    %262 = vector.shape_cast %261 : vector<1x1x64x48xbf16> to vector<64x48xbf16>
    %cst_137 = arith.constant dense<0.000000e+00> : vector<16x48xf32>
    %263 = tpu.matmul %260, %262, %cst_137 {dimension_numbers = #tpu.dot_dimension_numbers<[1], [0], [0], [1], [0, 0, 1, 1], [], []>} : vector<16x64xbf16>, vector<64x48xbf16>, vector<16x48xf32> -> vector<16x48xf32>
    %264 = arith.addf %258, %263 : vector<16x48xf32>
    %265 = vector.extract_strided_slice %251 {offsets = [0, 0, 0], sizes = [4, 4, 64], strides = [1, 1, 1]} : vector<6x4x64xbf16> to vector<4x4x64xbf16>
    %266 = vector.shape_cast %265 : vector<4x4x64xbf16> to vector<16x64xbf16>
    %c0_138 = arith.constant 0 : index
    %c2_139 = arith.constant 2 : index
    %c0_140 = arith.constant 0 : index
    %c0_141 = arith.constant 0 : index
    %267 = vector.load %arg8[%c0_138, %c2_139, %c0_140, %c0_141] : memref<3x3x64x48xbf16, #tpu.memory_space<vmem>>, vector<1x1x64x48xbf16>
    %268 = vector.shape_cast %267 : vector<1x1x64x48xbf16> to vector<64x48xbf16>
    %cst_142 = arith.constant dense<0.000000e+00> : vector<16x48xf32>
    %269 = tpu.matmul %266, %268, %cst_142 {dimension_numbers = #tpu.dot_dimension_numbers<[1], [0], [0], [1], [0, 0, 1, 1], [], []>} : vector<16x64xbf16>, vector<64x48xbf16>, vector<16x48xf32> -> vector<16x48xf32>
    %270 = arith.addf %264, %269 : vector<16x48xf32>
    %271 = vector.extract_strided_slice %249 {offsets = [1, 0, 0], sizes = [4, 4, 64], strides = [1, 1, 1]} : vector<6x4x64xbf16> to vector<4x4x64xbf16>
    %272 = vector.shape_cast %271 : vector<4x4x64xbf16> to vector<16x64xbf16>
    %c1_143 = arith.constant 1 : index
    %c0_144 = arith.constant 0 : index
    %c0_145 = arith.constant 0 : index
    %c0_146 = arith.constant 0 : index
    %273 = vector.load %arg8[%c1_143, %c0_144, %c0_145, %c0_146] : memref<3x3x64x48xbf16, #tpu.memory_space<vmem>>, vector<1x1x64x48xbf16>
    %274 = vector.shape_cast %273 : vector<1x1x64x48xbf16> to vector<64x48xbf16>
    %cst_147 = arith.constant dense<0.000000e+00> : vector<16x48xf32>
    %275 = tpu.matmul %272, %274, %cst_147 {dimension_numbers = #tpu.dot_dimension_numbers<[1], [0], [0], [1], [0, 0, 1, 1], [], []>} : vector<16x64xbf16>, vector<64x48xbf16>, vector<16x48xf32> -> vector<16x48xf32>
    %276 = arith.addf %270, %275 : vector<16x48xf32>
    %277 = vector.extract_strided_slice %250 {offsets = [1, 0, 0], sizes = [4, 4, 64], strides = [1, 1, 1]} : vector<6x4x64xbf16> to vector<4x4x64xbf16>
    %278 = vector.shape_cast %277 : vector<4x4x64xbf16> to vector<16x64xbf16>
    %c1_148 = arith.constant 1 : index
    %c1_149 = arith.constant 1 : index
    %c0_150 = arith.constant 0 : index
    %c0_151 = arith.constant 0 : index
    %279 = vector.load %arg8[%c1_148, %c1_149, %c0_150, %c0_151] : memref<3x3x64x48xbf16, #tpu.memory_space<vmem>>, vector<1x1x64x48xbf16>
    %280 = vector.shape_cast %279 : vector<1x1x64x48xbf16> to vector<64x48xbf16>
    %cst_152 = arith.constant dense<0.000000e+00> : vector<16x48xf32>
    %281 = tpu.matmul %278, %280, %cst_152 {dimension_numbers = #tpu.dot_dimension_numbers<[1], [0], [0], [1], [0, 0, 1, 1], [], []>} : vector<16x64xbf16>, vector<64x48xbf16>, vector<16x48xf32> -> vector<16x48xf32>
    %282 = arith.addf %276, %281 : vector<16x48xf32>
    %283 = vector.extract_strided_slice %251 {offsets = [1, 0, 0], sizes = [4, 4, 64], strides = [1, 1, 1]} : vector<6x4x64xbf16> to vector<4x4x64xbf16>
    %284 = vector.shape_cast %283 : vector<4x4x64xbf16> to vector<16x64xbf16>
    %c1_153 = arith.constant 1 : index
    %c2_154 = arith.constant 2 : index
    %c0_155 = arith.constant 0 : index
    %c0_156 = arith.constant 0 : index
    %285 = vector.load %arg8[%c1_153, %c2_154, %c0_155, %c0_156] : memref<3x3x64x48xbf16, #tpu.memory_space<vmem>>, vector<1x1x64x48xbf16>
    %286 = vector.shape_cast %285 : vector<1x1x64x48xbf16> to vector<64x48xbf16>
    %cst_157 = arith.constant dense<0.000000e+00> : vector<16x48xf32>
    %287 = tpu.matmul %284, %286, %cst_157 {dimension_numbers = #tpu.dot_dimension_numbers<[1], [0], [0], [1], [0, 0, 1, 1], [], []>} : vector<16x64xbf16>, vector<64x48xbf16>, vector<16x48xf32> -> vector<16x48xf32>
    %288 = arith.addf %282, %287 : vector<16x48xf32>
    %289 = vector.extract_strided_slice %249 {offsets = [2, 0, 0], sizes = [4, 4, 64], strides = [1, 1, 1]} : vector<6x4x64xbf16> to vector<4x4x64xbf16>
    %290 = vector.shape_cast %289 : vector<4x4x64xbf16> to vector<16x64xbf16>
    %c2_158 = arith.constant 2 : index
    %c0_159 = arith.constant 0 : index
    %c0_160 = arith.constant 0 : index
    %c0_161 = arith.constant 0 : index
    %291 = vector.load %arg8[%c2_158, %c0_159, %c0_160, %c0_161] : memref<3x3x64x48xbf16, #tpu.memory_space<vmem>>, vector<1x1x64x48xbf16>
    %292 = vector.shape_cast %291 : vector<1x1x64x48xbf16> to vector<64x48xbf16>
    %cst_162 = arith.constant dense<0.000000e+00> : vector<16x48xf32>
    %293 = tpu.matmul %290, %292, %cst_162 {dimension_numbers = #tpu.dot_dimension_numbers<[1], [0], [0], [1], [0, 0, 1, 1], [], []>} : vector<16x64xbf16>, vector<64x48xbf16>, vector<16x48xf32> -> vector<16x48xf32>
    %294 = arith.addf %288, %293 : vector<16x48xf32>
    %295 = vector.extract_strided_slice %250 {offsets = [2, 0, 0], sizes = [4, 4, 64], strides = [1, 1, 1]} : vector<6x4x64xbf16> to vector<4x4x64xbf16>
    %296 = vector.shape_cast %295 : vector<4x4x64xbf16> to vector<16x64xbf16>
    %c2_163 = arith.constant 2 : index
    %c1_164 = arith.constant 1 : index
    %c0_165 = arith.constant 0 : index
    %c0_166 = arith.constant 0 : index
    %297 = vector.load %arg8[%c2_163, %c1_164, %c0_165, %c0_166] : memref<3x3x64x48xbf16, #tpu.memory_space<vmem>>, vector<1x1x64x48xbf16>
    %298 = vector.shape_cast %297 : vector<1x1x64x48xbf16> to vector<64x48xbf16>
    %cst_167 = arith.constant dense<0.000000e+00> : vector<16x48xf32>
    %299 = tpu.matmul %296, %298, %cst_167 {dimension_numbers = #tpu.dot_dimension_numbers<[1], [0], [0], [1], [0, 0, 1, 1], [], []>} : vector<16x64xbf16>, vector<64x48xbf16>, vector<16x48xf32> -> vector<16x48xf32>
    %300 = arith.addf %294, %299 : vector<16x48xf32>
    %301 = vector.extract_strided_slice %251 {offsets = [2, 0, 0], sizes = [4, 4, 64], strides = [1, 1, 1]} : vector<6x4x64xbf16> to vector<4x4x64xbf16>
    %302 = vector.shape_cast %301 : vector<4x4x64xbf16> to vector<16x64xbf16>
    %c2_168 = arith.constant 2 : index
    %c2_169 = arith.constant 2 : index
    %c0_170 = arith.constant 0 : index
    %c0_171 = arith.constant 0 : index
    %303 = vector.load %arg8[%c2_168, %c2_169, %c0_170, %c0_171] : memref<3x3x64x48xbf16, #tpu.memory_space<vmem>>, vector<1x1x64x48xbf16>
    %304 = vector.shape_cast %303 : vector<1x1x64x48xbf16> to vector<64x48xbf16>
    %cst_172 = arith.constant dense<0.000000e+00> : vector<16x48xf32>
    %305 = tpu.matmul %302, %304, %cst_172 {dimension_numbers = #tpu.dot_dimension_numbers<[1], [0], [0], [1], [0, 0, 1, 1], [], []>} : vector<16x64xbf16>, vector<64x48xbf16>, vector<16x48xf32> -> vector<16x48xf32>
    %306 = arith.addf %300, %305 : vector<16x48xf32>
    %c0_173 = arith.constant 0 : index
    %c0_174 = arith.constant 0 : index
    %307 = vector.load %arg9[%c0_173, %c0_174] : memref<1x48xf32, #tpu.memory_space<vmem>>, vector<1x48xf32>
    %308 = vector.broadcast %307 : vector<1x48xf32> to vector<16x48xf32>
    %309 = arith.addf %306, %308 : vector<16x48xf32>
    %cst_175 = arith.constant 0.000000e+00 : f32
    %310 = vector.broadcast %cst_175 : f32 to vector<16x48xf32>
    %311 = arith.maximumf %309, %310 : vector<16x48xf32>
    %312 = vector.shape_cast %311 : vector<16x48xf32> to vector<4x4x48xf32>
    %cst_176 = arith.constant 0.000000e+00 : f32
    %313 = vector.broadcast %cst_176 : f32 to vector<1x4x48xf32>
    %314 = tpu.concatenate %313, %312, %313 in 0 : vector<1x4x48xf32>, vector<4x4x48xf32>, vector<1x4x48xf32> -> vector<6x4x48xf32>
    %315 = tpu.iota {dimensions = array<i32: 1>} : vector<6x4x48xi32>
    %c0_i32_177 = arith.constant 0 : i32
    %316 = vector.broadcast %c0_i32_177 : i32 to vector<6x4x48xi32>
    %317 = arith.cmpi sgt, %315, %316 : vector<6x4x48xi32>
    %c1_i32_178 = arith.constant 1 : i32
    %318 = tpu.dynamic_rotate %314 by %c1_i32_178 dim 1 : vector<6x4x48xf32>, i32 -> vector<6x4x48xf32>
    %cst_179 = arith.constant 0.000000e+00 : f32
    %319 = vector.broadcast %cst_179 : f32 to vector<6x4x48xf32>
    %320 = arith.select %317, %318, %319 : vector<6x4x48xi1>, vector<6x4x48xf32>
    %c3_i32_180 = arith.constant 3 : i32
    %321 = vector.broadcast %c3_i32_180 : i32 to vector<6x4x48xi32>
    %322 = arith.cmpi slt, %315, %321 : vector<6x4x48xi32>
    %c3_i32_181 = arith.constant 3 : i32
    %323 = tpu.dynamic_rotate %314 by %c3_i32_181 dim 1 : vector<6x4x48xf32>, i32 -> vector<6x4x48xf32>
    %cst_182 = arith.constant 0.000000e+00 : f32
    %324 = vector.broadcast %cst_182 : f32 to vector<6x4x48xf32>
    %325 = arith.select %322, %323, %324 : vector<6x4x48xi1>, vector<6x4x48xf32>
    %326 = arith.truncf %320 : vector<6x4x48xf32> to vector<6x4x48xbf16>
    %327 = arith.truncf %314 : vector<6x4x48xf32> to vector<6x4x48xbf16>
    %328 = arith.truncf %325 : vector<6x4x48xf32> to vector<6x4x48xbf16>
    %cst_183 = arith.constant 0.000000e+00 : f32
    %329 = vector.broadcast %cst_183 : f32 to vector<16x64xf32>
    %330 = vector.extract_strided_slice %326 {offsets = [0, 0, 0], sizes = [4, 4, 48], strides = [1, 1, 1]} : vector<6x4x48xbf16> to vector<4x4x48xbf16>
    %331 = vector.shape_cast %330 : vector<4x4x48xbf16> to vector<16x48xbf16>
    %c0_184 = arith.constant 0 : index
    %c0_185 = arith.constant 0 : index
    %c0_186 = arith.constant 0 : index
    %c0_187 = arith.constant 0 : index
    %332 = vector.load %arg10[%c0_184, %c0_185, %c0_186, %c0_187] : memref<3x3x48x64xbf16, #tpu.memory_space<vmem>>, vector<1x1x48x64xbf16>
    %333 = vector.shape_cast %332 : vector<1x1x48x64xbf16> to vector<48x64xbf16>
    %cst_188 = arith.constant dense<0.000000e+00> : vector<16x64xf32>
    %334 = tpu.matmul %331, %333, %cst_188 {dimension_numbers = #tpu.dot_dimension_numbers<[1], [0], [0], [1], [0, 0, 1, 1], [], []>} : vector<16x48xbf16>, vector<48x64xbf16>, vector<16x64xf32> -> vector<16x64xf32>
    %335 = arith.addf %329, %334 : vector<16x64xf32>
    %336 = vector.extract_strided_slice %327 {offsets = [0, 0, 0], sizes = [4, 4, 48], strides = [1, 1, 1]} : vector<6x4x48xbf16> to vector<4x4x48xbf16>
    %337 = vector.shape_cast %336 : vector<4x4x48xbf16> to vector<16x48xbf16>
    %c0_189 = arith.constant 0 : index
    %c1_190 = arith.constant 1 : index
    %c0_191 = arith.constant 0 : index
    %c0_192 = arith.constant 0 : index
    %338 = vector.load %arg10[%c0_189, %c1_190, %c0_191, %c0_192] : memref<3x3x48x64xbf16, #tpu.memory_space<vmem>>, vector<1x1x48x64xbf16>
    %339 = vector.shape_cast %338 : vector<1x1x48x64xbf16> to vector<48x64xbf16>
    %cst_193 = arith.constant dense<0.000000e+00> : vector<16x64xf32>
    %340 = tpu.matmul %337, %339, %cst_193 {dimension_numbers = #tpu.dot_dimension_numbers<[1], [0], [0], [1], [0, 0, 1, 1], [], []>} : vector<16x48xbf16>, vector<48x64xbf16>, vector<16x64xf32> -> vector<16x64xf32>
    %341 = arith.addf %335, %340 : vector<16x64xf32>
    %342 = vector.extract_strided_slice %328 {offsets = [0, 0, 0], sizes = [4, 4, 48], strides = [1, 1, 1]} : vector<6x4x48xbf16> to vector<4x4x48xbf16>
    %343 = vector.shape_cast %342 : vector<4x4x48xbf16> to vector<16x48xbf16>
    %c0_194 = arith.constant 0 : index
    %c2_195 = arith.constant 2 : index
    %c0_196 = arith.constant 0 : index
    %c0_197 = arith.constant 0 : index
    %344 = vector.load %arg10[%c0_194, %c2_195, %c0_196, %c0_197] : memref<3x3x48x64xbf16, #tpu.memory_space<vmem>>, vector<1x1x48x64xbf16>
    %345 = vector.shape_cast %344 : vector<1x1x48x64xbf16> to vector<48x64xbf16>
    %cst_198 = arith.constant dense<0.000000e+00> : vector<16x64xf32>
    %346 = tpu.matmul %343, %345, %cst_198 {dimension_numbers = #tpu.dot_dimension_numbers<[1], [0], [0], [1], [0, 0, 1, 1], [], []>} : vector<16x48xbf16>, vector<48x64xbf16>, vector<16x64xf32> -> vector<16x64xf32>
    %347 = arith.addf %341, %346 : vector<16x64xf32>
    %348 = vector.extract_strided_slice %326 {offsets = [1, 0, 0], sizes = [4, 4, 48], strides = [1, 1, 1]} : vector<6x4x48xbf16> to vector<4x4x48xbf16>
    %349 = vector.shape_cast %348 : vector<4x4x48xbf16> to vector<16x48xbf16>
    %c1_199 = arith.constant 1 : index
    %c0_200 = arith.constant 0 : index
    %c0_201 = arith.constant 0 : index
    %c0_202 = arith.constant 0 : index
    %350 = vector.load %arg10[%c1_199, %c0_200, %c0_201, %c0_202] : memref<3x3x48x64xbf16, #tpu.memory_space<vmem>>, vector<1x1x48x64xbf16>
    %351 = vector.shape_cast %350 : vector<1x1x48x64xbf16> to vector<48x64xbf16>
    %cst_203 = arith.constant dense<0.000000e+00> : vector<16x64xf32>
    %352 = tpu.matmul %349, %351, %cst_203 {dimension_numbers = #tpu.dot_dimension_numbers<[1], [0], [0], [1], [0, 0, 1, 1], [], []>} : vector<16x48xbf16>, vector<48x64xbf16>, vector<16x64xf32> -> vector<16x64xf32>
    %353 = arith.addf %347, %352 : vector<16x64xf32>
    %354 = vector.extract_strided_slice %327 {offsets = [1, 0, 0], sizes = [4, 4, 48], strides = [1, 1, 1]} : vector<6x4x48xbf16> to vector<4x4x48xbf16>
    %355 = vector.shape_cast %354 : vector<4x4x48xbf16> to vector<16x48xbf16>
    %c1_204 = arith.constant 1 : index
    %c1_205 = arith.constant 1 : index
    %c0_206 = arith.constant 0 : index
    %c0_207 = arith.constant 0 : index
    %356 = vector.load %arg10[%c1_204, %c1_205, %c0_206, %c0_207] : memref<3x3x48x64xbf16, #tpu.memory_space<vmem>>, vector<1x1x48x64xbf16>
    %357 = vector.shape_cast %356 : vector<1x1x48x64xbf16> to vector<48x64xbf16>
    %cst_208 = arith.constant dense<0.000000e+00> : vector<16x64xf32>
    %358 = tpu.matmul %355, %357, %cst_208 {dimension_numbers = #tpu.dot_dimension_numbers<[1], [0], [0], [1], [0, 0, 1, 1], [], []>} : vector<16x48xbf16>, vector<48x64xbf16>, vector<16x64xf32> -> vector<16x64xf32>
    %359 = arith.addf %353, %358 : vector<16x64xf32>
    %360 = vector.extract_strided_slice %328 {offsets = [1, 0, 0], sizes = [4, 4, 48], strides = [1, 1, 1]} : vector<6x4x48xbf16> to vector<4x4x48xbf16>
    %361 = vector.shape_cast %360 : vector<4x4x48xbf16> to vector<16x48xbf16>
    %c1_209 = arith.constant 1 : index
    %c2_210 = arith.constant 2 : index
    %c0_211 = arith.constant 0 : index
    %c0_212 = arith.constant 0 : index
    %362 = vector.load %arg10[%c1_209, %c2_210, %c0_211, %c0_212] : memref<3x3x48x64xbf16, #tpu.memory_space<vmem>>, vector<1x1x48x64xbf16>
    %363 = vector.shape_cast %362 : vector<1x1x48x64xbf16> to vector<48x64xbf16>
    %cst_213 = arith.constant dense<0.000000e+00> : vector<16x64xf32>
    %364 = tpu.matmul %361, %363, %cst_213 {dimension_numbers = #tpu.dot_dimension_numbers<[1], [0], [0], [1], [0, 0, 1, 1], [], []>} : vector<16x48xbf16>, vector<48x64xbf16>, vector<16x64xf32> -> vector<16x64xf32>
    %365 = arith.addf %359, %364 : vector<16x64xf32>
    %366 = vector.extract_strided_slice %326 {offsets = [2, 0, 0], sizes = [4, 4, 48], strides = [1, 1, 1]} : vector<6x4x48xbf16> to vector<4x4x48xbf16>
    %367 = vector.shape_cast %366 : vector<4x4x48xbf16> to vector<16x48xbf16>
    %c2_214 = arith.constant 2 : index
    %c0_215 = arith.constant 0 : index
    %c0_216 = arith.constant 0 : index
    %c0_217 = arith.constant 0 : index
    %368 = vector.load %arg10[%c2_214, %c0_215, %c0_216, %c0_217] : memref<3x3x48x64xbf16, #tpu.memory_space<vmem>>, vector<1x1x48x64xbf16>
    %369 = vector.shape_cast %368 : vector<1x1x48x64xbf16> to vector<48x64xbf16>
    %cst_218 = arith.constant dense<0.000000e+00> : vector<16x64xf32>
    %370 = tpu.matmul %367, %369, %cst_218 {dimension_numbers = #tpu.dot_dimension_numbers<[1], [0], [0], [1], [0, 0, 1, 1], [], []>} : vector<16x48xbf16>, vector<48x64xbf16>, vector<16x64xf32> -> vector<16x64xf32>
    %371 = arith.addf %365, %370 : vector<16x64xf32>
    %372 = vector.extract_strided_slice %327 {offsets = [2, 0, 0], sizes = [4, 4, 48], strides = [1, 1, 1]} : vector<6x4x48xbf16> to vector<4x4x48xbf16>
    %373 = vector.shape_cast %372 : vector<4x4x48xbf16> to vector<16x48xbf16>
    %c2_219 = arith.constant 2 : index
    %c1_220 = arith.constant 1 : index
    %c0_221 = arith.constant 0 : index
    %c0_222 = arith.constant 0 : index
    %374 = vector.load %arg10[%c2_219, %c1_220, %c0_221, %c0_222] : memref<3x3x48x64xbf16, #tpu.memory_space<vmem>>, vector<1x1x48x64xbf16>
    %375 = vector.shape_cast %374 : vector<1x1x48x64xbf16> to vector<48x64xbf16>
    %cst_223 = arith.constant dense<0.000000e+00> : vector<16x64xf32>
    %376 = tpu.matmul %373, %375, %cst_223 {dimension_numbers = #tpu.dot_dimension_numbers<[1], [0], [0], [1], [0, 0, 1, 1], [], []>} : vector<16x48xbf16>, vector<48x64xbf16>, vector<16x64xf32> -> vector<16x64xf32>
    %377 = arith.addf %371, %376 : vector<16x64xf32>
    %378 = vector.extract_strided_slice %328 {offsets = [2, 0, 0], sizes = [4, 4, 48], strides = [1, 1, 1]} : vector<6x4x48xbf16> to vector<4x4x48xbf16>
    %379 = vector.shape_cast %378 : vector<4x4x48xbf16> to vector<16x48xbf16>
    %c2_224 = arith.constant 2 : index
    %c2_225 = arith.constant 2 : index
    %c0_226 = arith.constant 0 : index
    %c0_227 = arith.constant 0 : index
    %380 = vector.load %arg10[%c2_224, %c2_225, %c0_226, %c0_227] : memref<3x3x48x64xbf16, #tpu.memory_space<vmem>>, vector<1x1x48x64xbf16>
    %381 = vector.shape_cast %380 : vector<1x1x48x64xbf16> to vector<48x64xbf16>
    %cst_228 = arith.constant dense<0.000000e+00> : vector<16x64xf32>
    %382 = tpu.matmul %379, %381, %cst_228 {dimension_numbers = #tpu.dot_dimension_numbers<[1], [0], [0], [1], [0, 0, 1, 1], [], []>} : vector<16x48xbf16>, vector<48x64xbf16>, vector<16x64xf32> -> vector<16x64xf32>
    %383 = arith.addf %377, %382 : vector<16x64xf32>
    %c0_229 = arith.constant 0 : index
    %c0_230 = arith.constant 0 : index
    %384 = vector.load %arg11[%c0_229, %c0_230] : memref<1x64xf32, #tpu.memory_space<vmem>>, vector<1x64xf32>
    %385 = vector.broadcast %384 : vector<1x64xf32> to vector<16x64xf32>
    %386 = arith.addf %383, %385 : vector<16x64xf32>
    %cst_231 = arith.constant 0.000000e+00 : f32
    %387 = vector.broadcast %cst_231 : f32 to vector<16x64xf32>
    %388 = arith.maximumf %386, %387 : vector<16x64xf32>
    %389 = vector.shape_cast %388 : vector<16x64xf32> to vector<4x4x64xf32>
    %390 = vector.shape_cast %389 : vector<4x4x64xf32> to vector<16x64xf32>
    %cst_232 = arith.constant dense<0.000000e+00> : vector<64xf32>
    %391 = vector.multi_reduction <add>, %390, %cst_232 [0] : vector<16x64xf32> to vector<64xf32>
    %392 = vector.shape_cast %391 : vector<64xf32> to vector<1x64xf32>
    %cst_233 = arith.constant 6.250000e-02 : f32
    %393 = vector.broadcast %cst_233 : f32 to vector<1x64xf32>
    %394 = arith.mulf %392, %393 : vector<1x64xf32>
    %c0_234 = arith.constant 0 : index
    %c0_235 = arith.constant 0 : index
    %395 = vector.load %arg12[%c0_234, %c0_235] : memref<66x64xf32, #tpu.memory_space<vmem>>, vector<66x64xf32>
    %396 = vector.broadcast %394 : vector<1x64xf32> to vector<66x64xf32>
    %397 = arith.mulf %395, %396 : vector<66x64xf32>
    %cst_236 = arith.constant dense<0.000000e+00> : vector<66xf32>
    %398 = vector.multi_reduction <add>, %397, %cst_236 [1] : vector<66x64xf32> to vector<66xf32>
    %399 = vector.shape_cast %398 : vector<66xf32> to vector<66x1xf32>
    %c0_237 = arith.constant 0 : index
    %c0_238 = arith.constant 0 : index
    %400 = vector.load %arg13[%c0_237, %c0_238] : memref<66x1xf32, #tpu.memory_space<vmem>>, vector<66x1xf32>
    %401 = arith.addf %399, %400 : vector<66x1xf32>
    %c0_239 = arith.constant 0 : index
    %402 = memref.load %arg16[%c0_239] : memref<1xf32, #tpu.memory_space<smem>>
    %cst_240 = arith.constant 0.000000e+00 : f32
    %403 = vector.broadcast %cst_240 : f32 to vector<66x1xf32>
    %404 = arith.cmpf oge, %401, %403 : vector<66x1xf32>
    %405 = vector.broadcast %402 : f32 to vector<66x1xf32>
    %406 = arith.mulf %405, %401 : vector<66x1xf32>
    %407 = arith.select %404, %401, %406 : vector<66x1xi1>, vector<66x1xf32>
    %c0_241 = arith.constant 0 : index
    %c0_242 = arith.constant 0 : index
    %408 = vector.load %arg14[%c0_241, %c0_242] : memref<66x4xf32, #tpu.memory_space<vmem>>, vector<66x4xf32>
    %409 = vector.broadcast %407 : vector<66x1xf32> to vector<66x4xf32>
    %410 = arith.mulf %408, %409 : vector<66x4xf32>
    %cst_243 = arith.constant dense<0.000000e+00> : vector<4xf32>
    %411 = vector.multi_reduction <add>, %410, %cst_243 [0] : vector<66x4xf32> to vector<4xf32>
    %412 = vector.shape_cast %411 : vector<4xf32> to vector<1x4xf32>
    %c0_244 = arith.constant 0 : index
    %c0_245 = arith.constant 0 : index
    %413 = vector.load %arg15[%c0_244, %c0_245] : memref<1x4xf32, #tpu.memory_space<vmem>>, vector<1x4xf32>
    %414 = arith.addf %412, %413 : vector<1x4xf32>
    %c0_246 = arith.constant 0 : index
    %415 = memref.load %arg17[%c0_246] : memref<1xf32, #tpu.memory_space<smem>>
    %416 = vector.broadcast %415 : f32 to vector<1x4xf32>
    %417 = arith.divf %414, %416 : vector<1x4xf32>
    %c0_247 = arith.constant 0 : index
    %418 = memref.load %arg18[%c0_247] : memref<1xf32, #tpu.memory_space<smem>>
    %419 = vector.broadcast %418 : f32 to vector<1x4xf32>
    %420 = arith.cmpf oge, %417, %419 : vector<1x4xf32>
    %421 = arith.negf %417 : vector<1x4xf32>
    %422 = math.exp %421 : vector<1x4xf32>
    %cst_248 = arith.constant 1.000000e+00 : f32
    %423 = vector.broadcast %cst_248 : f32 to vector<1x4xf32>
    %424 = arith.addf %423, %422 : vector<1x4xf32>
    %425 = arith.divf %423, %424 : vector<1x4xf32>
    %cst_249 = arith.constant 0.000000e+00 : f32
    %426 = vector.broadcast %cst_249 : f32 to vector<1x4xf32>
    %427 = arith.select %420, %425, %426 : vector<1x4xi1>, vector<1x4xf32>
    %428 = vector.shape_cast %427 : vector<1x4xf32> to vector<1x1x4xf32>
    %c0_250 = arith.constant 0 : index
    %c0_251 = arith.constant 0 : index
    %c0_252 = arith.constant 0 : index
    %429 = vector.load %arg19[%c0_250, %c0_251, %c0_252] : memref<1x1x4xf32, #tpu.memory_space<vmem>>, vector<1x1x4xf32>
    tpu.vector_store %arg19[%c0_250, %c0_251, %c0_252], %428 {strides = array<i32>} : memref<1x1x4xf32, #tpu.memory_space<vmem>>, vector<1x1x4xf32>,
    return
  }
  func.func @transform_0(%arg0: i32) -> (i32, i32, i32, i32) {
    %c0_i32 = arith.constant 0 : i32
    %c0_i32_0 = arith.constant 0 : i32
    %c0_i32_1 = arith.constant 0 : i32
    %c0_i32_2 = arith.constant 0 : i32
    return %arg0, %c0_i32, %c0_i32_0, %c0_i32_1 : i32, i32, i32, i32
  }
  func.func @transform_1(%arg0: i32) -> (i32, i32) {
    %c0_i32 = arith.constant 0 : i32
    %c0_i32_0 = arith.constant 0 : i32
    %c0_i32_1 = arith.constant 0 : i32
    return %c0_i32, %c0_i32_0 : i32, i32
  }
  func.func @transform_2(%arg0: i32) -> (i32, i32) {
    %c0_i32 = arith.constant 0 : i32
    %c0_i32_0 = arith.constant 0 : i32
    %c0_i32_1 = arith.constant 0 : i32
    return %c0_i32, %c0_i32_0 : i32, i32
  }
  func.func @transform_3(%arg0: i32) -> (i32, i32, i32, i32) {
    %c0_i32 = arith.constant 0 : i32
    %c0_i32_0 = arith.constant 0 : i32
    %c0_i32_1 = arith.constant 0 : i32
    %c0_i32_2 = arith.constant 0 : i32
    %c0_i32_3 = arith.constant 0 : i32
    return %c0_i32, %c0_i32_0, %c0_i32_1, %c0_i32_2 : i32, i32, i32, i32
  }
  func.func @transform_4(%arg0: i32) -> (i32, i32) {
    %c0_i32 = arith.constant 0 : i32
    %c0_i32_0 = arith.constant 0 : i32
    %c0_i32_1 = arith.constant 0 : i32
    return %c0_i32, %c0_i32_0 : i32, i32
  }
  func.func @transform_5(%arg0: i32) -> (i32, i32, i32, i32) {
    %c0_i32 = arith.constant 0 : i32
    %c0_i32_0 = arith.constant 0 : i32
    %c0_i32_1 = arith.constant 0 : i32
    %c0_i32_2 = arith.constant 0 : i32
    %c0_i32_3 = arith.constant 0 : i32
    return %c0_i32, %c0_i32_0, %c0_i32_1, %c0_i32_2 : i32, i32, i32, i32
  }
  func.func @transform_6(%arg0: i32) -> (i32, i32) {
    %c0_i32 = arith.constant 0 : i32
    %c0_i32_0 = arith.constant 0 : i32
    %c0_i32_1 = arith.constant 0 : i32
    return %c0_i32, %c0_i32_0 : i32, i32
  }
  func.func @transform_7(%arg0: i32) -> (i32, i32, i32, i32) {
    %c0_i32 = arith.constant 0 : i32
    %c0_i32_0 = arith.constant 0 : i32
    %c0_i32_1 = arith.constant 0 : i32
    %c0_i32_2 = arith.constant 0 : i32
    %c0_i32_3 = arith.constant 0 : i32
    return %c0_i32, %c0_i32_0, %c0_i32_1, %c0_i32_2 : i32, i32, i32, i32
  }
  func.func @transform_8(%arg0: i32) -> (i32, i32) {
    %c0_i32 = arith.constant 0 : i32
    %c0_i32_0 = arith.constant 0 : i32
    %c0_i32_1 = arith.constant 0 : i32
    return %c0_i32, %c0_i32_0 : i32, i32
  }
  func.func @transform_9(%arg0: i32) -> (i32, i32, i32, i32) {
    %c0_i32 = arith.constant 0 : i32
    %c0_i32_0 = arith.constant 0 : i32
    %c0_i32_1 = arith.constant 0 : i32
    %c0_i32_2 = arith.constant 0 : i32
    %c0_i32_3 = arith.constant 0 : i32
    return %c0_i32, %c0_i32_0, %c0_i32_1, %c0_i32_2 : i32, i32, i32, i32
  }
  func.func @transform_10(%arg0: i32) -> (i32, i32) {
    %c0_i32 = arith.constant 0 : i32
    %c0_i32_0 = arith.constant 0 : i32
    %c0_i32_1 = arith.constant 0 : i32
    return %c0_i32, %c0_i32_0 : i32, i32
  }
  func.func @transform_11(%arg0: i32) -> (i32, i32) {
    %c0_i32 = arith.constant 0 : i32
    %c0_i32_0 = arith.constant 0 : i32
    %c0_i32_1 = arith.constant 0 : i32
    return %c0_i32, %c0_i32_0 : i32, i32
  }
  func.func @transform_12(%arg0: i32) -> (i32, i32) {
    %c0_i32 = arith.constant 0 : i32
    %c0_i32_0 = arith.constant 0 : i32
    %c0_i32_1 = arith.constant 0 : i32
    return %c0_i32, %c0_i32_0 : i32, i32
  }
  func.func @transform_13(%arg0: i32) -> (i32, i32) {
    %c0_i32 = arith.constant 0 : i32
    %c0_i32_0 = arith.constant 0 : i32
    %c0_i32_1 = arith.constant 0 : i32
    return %c0_i32, %c0_i32_0 : i32, i32
  }
  func.func @transform_14(%arg0: i32) -> (i32, i32) {
    %c0_i32 = arith.constant 0 : i32
    %c0_i32_0 = arith.constant 0 : i32
    %c0_i32_1 = arith.constant 0 : i32
    return %c0_i32, %c0_i32_0 : i32, i32
  }
  func.func @transform_15(%arg0: i32) -> i32 {
    %c0_i32 = arith.constant 0 : i32
    %c0_i32_0 = arith.constant 0 : i32
    return %c0_i32 : i32
  }
  func.func @transform_16(%arg0: i32) -> i32 {
    %c0_i32 = arith.constant 0 : i32
    %c0_i32_0 = arith.constant 0 : i32
    return %c0_i32 : i32
  }
  func.func @transform_17(%arg0: i32) -> i32 {
    %c0_i32 = arith.constant 0 : i32
    %c0_i32_0 = arith.constant 0 : i32
    return %c0_i32 : i32
  }
  func.func @transform_18(%arg0: i32) -> (i32, i32, i32) {
    %c0_i32 = arith.constant 0 : i32
    %c0_i32_0 = arith.constant 0 : i32
    %c0_i32_1 = arith.constant 0 : i32
    return %arg0, %c0_i32, %c0_i32_0 : i32, i32, i32
  }
}

</mosaic_0001>

<bundles_post_ra>
// kernel: band_attention_block.1
= control target key start
LH: loop header
LB: loop body
LE: loop exit
PB: predicated region body
PF: predicated region fallthrough
CT: control target
= control target key end

     0   :  { %s11321_s0 = inlined_call_operand.vmem [shape: f32[2,16,16,4], index: 0, kind: input, shape index: {}]   ;;  %s11322_s1 = inlined_call_operand.vmem [shape: bf16[36,128], index: 1, kind: input, shape index: {}]   ;;  %s11323_s2 = inlined_call_operand.vmem [shape: f32[1,128], index: 2, kind: input, shape index: {}]   ;;  %s11324_s3 = inlined_call_operand.vmem [shape: bf16[3,3,128,96], index: 3, kind: input, shape index: {}]   ;;  %s11325_s4 = inlined_call_operand.vmem [shape: f32[1,96], index: 4, kind: input, shape index: {}]   ;;  %s11326_s5 = inlined_call_operand.vmem [shape: bf16[3,3,96,64], index: 5, kind: input, shape index: {}]   ;;  %s11327_s6 = inlined_call_operand.vmem [shape: f32[1,64], index: 6, kind: input, shape index: {}]   ;;  %s11328_s7 = inlined_call_operand.vmem [shape: bf16[3,3,64,48], index: 7, kind: input, shape index: {}]   ;;  %s11329_s8 = inlined_call_operand.vmem [shape: f32[1,48], index: 8, kind: input, shape index: {}]   ;;  %s11330_s9 = inlined_call_operand.vmem [shape: bf16[3,3,48,64], index: 9, kind: input, shape index: {}]   ;;  %s11331_s10 = inlined_call_operand.vmem [shape: f32[1,64], index: 10, kind: input, shape index: {}]   ;;  %s11332_s11 = inlined_call_operand.vmem [shape: f32[66,64], index: 11, kind: input, shape index: {}]   ;;  %s11333_s12 = inlined_call_operand.vmem [shape: f32[66,1], index: 12, kind: input, shape index: {}]   ;;  %s11334_s13 = inlined_call_operand.vmem [shape: f32[66,4], index: 13, kind: input, shape index: {}]   ;;  %s11335_s14 = inlined_call_operand.vmem [shape: f32[1,4], index: 14, kind: input, shape index: {}]   ;;  %s11336_s15 = inlined_call_operand.<no memory space> [shape: f32[1], index: 15, kind: input, shape index: {}]   ;;  %s11337_s16 = inlined_call_operand.<no memory space> [shape: f32[1], index: 16, kind: input, shape index: {}]   ;;  %s11338_s17 = inlined_call_operand.<no memory space> [shape: f32[1], index: 17, kind: input, shape index: {}]   ;;  %s11339_s18 = inlined_call_operand.vmem [shape: f32[2,1,4], index: 18, kind: output, shape index: {}]  }
   0x1   :  { %11341 = sst [smem:[#allocation5_spill]] %s11321_s0 }
   0x2   :  { %11342 = sst [smem:[#allocation6_spill]] %s11322_s1  ;;  %s8746_s1 = smov 0  }
   0x3   :  { %11343 = sst [smem:[#allocation7_spill]] %s11323_s2 }
   0x4   :  { %23 = sst [smem:[#allocation2]] %s11336_s15 }
   0x5   :  { %24 = sst [smem:[#allocation3]] %s11337_s16 }
   0x6   :  { %25 = sst [smem:[#allocation4]] %s11338_s17 }
   0x7 LB: > { %s6553_s20 = sadd.s32 4294967295, %s8631_s1   ;;  %p6557_p0 = scmp.ge.s32.totalorder %s8631_s1, 1  ;;  %s8631_s1 = sphi %s8746_s1, %s31_s1  }
   0x8   : > { %p515_p1 = scmp.lt.s32.totalorder %s8631_s1, 3 }
   0xa   : > { %p516_p2 = pnand %p6557_p0, %p515_p1 }
   0xb   : > { %p567_p3 = scmp.lt.s32.totalorder (!%p516_p2), %s6553_s20, 1  ;;  %v608_v0 = vlaneseq (!%p516_p2)  ;;  %s11344_s21 = sld [smem:[#allocation5_spill]] (!%p516_p2)  ;;  %vm966_vm4 = vcmask (!%p516_p2), 31744   ;;  %vm1260_vm5 = vcmask (!%p516_p2), 1041408   ;;  %vm1018_vm6 = vcmask (!%p516_p2), 64512  }
   0xc   : > { %519 = sbr.rel (%p516_p2) target bundleno = 2406 (0x966), region = 92  ;;  %s8633_s2 = smov (!%p516_p2), 4   ;;  %vm1134_vm7 = vcmask (!%p516_p2), 97280   ;;  %vm1167_vm8 = vcmask (!%p516_p2), 195584   ;;  %vm1227_vm9 = vcmask (!%p516_p2), 293888   ;;  %vm1665_vm10 = vcmask (!%p516_p2), 1040384  }
   0xd   : > { %v8756_v1 = vshrl.u32 (!%p516_p2), %v608_v0, 7  ;;  %s8634_s23 = smov (!%p516_p2), 8   ;;  %s11377_s26 = sld [smem:[#allocation6_spill]] (!%p516_p2)  ;;  %vm1682_vm11 = vcmask (!%p516_p2), 1042432   ;;  %vm1691_vm12 = vcmask (!%p516_p2), 1043456   ;;  %vm1700_vm13 = vcmask (!%p516_p2), 1044480  }
   0xe   : > { %s8636_s0 = smov (!%p516_p2), 12   ;;  %s8637_s19 = smov (!%p516_p2), 24   ;;  %vm1709_vm14 = vcmask (!%p516_p2), 1045504   ;;  %vm1718_vm15 = vcmask (!%p516_p2), 1046528  }
   0xf   : > { %v8760_v2 = vadd.s32 (!%p516_p2), 8, %v8756_v1  ;;  %vm746_vm0 = vcmp.lt.s32.totalorder (!%p516_p2), %v8756_v1, 7  ;;  %vm645_vm2 = vcmp.lt.s32.totalorder (!%p516_p2), %v8756_v1, 1  ;;  %vm611_vm3 = vcmp.gt.s32.totalorder (!%p516_p2), %v8756_v1, 0  ;;  %s6372_s17 = sld [smem:[#allocation2]] (!%p516_p2) }
  0x10   : > { %s6490_s24 = sld [smem:[#allocation3]] (!%p516_p2) }
  0x11   : > { %vm713_vm1 = vcmp.lt.s32.totalorder (!%p516_p2), %v8760_v2, 15  ;;  %v8635_v2 = vmov (!%p516_p2), 0.0|0.0   ;;  %s6494_s30 = sld [smem:[#allocation4]] (!%p516_p2) }
  0x13   : > { %s11389_s20 = smov (!%p567_p3, %s6553_s20), 1 }
  0x14   : > { %s7246_s15 = sshll.u32 %s11389_s20, 8 }
  0x15   : > { %s8765_s22 = scalar_lea.vmem %s11344_s21, %s7246_s15  ;;  %s574_s15 = scalar_lea.vmem %s11339_s18, %s11389_s20 }
  0x16   : > { %v8768_v3 = vld [vmem:[%s8765_s22 + $0x20] sm:$0xff]  ;;  %v8771_v4 = vld [vmem:[%s8765_s22 + $0x28] sm:$0xff]  ;;  %v8783_v9 = vld [vmem:[%s8765_s22 + $0x10] sm:$0xff] }
  0x17   : > { %v8774_v5 = vld [vmem:[%s8765_s22] sm:$0xff]  ;;  %v732_v6 = vrot.slane %v8771_v4, 1  ;;  %v833_v7 = vpack.c.bf16 %v8771_v4, %v8768_v3  ;;  %v8780_v8 = vld [vmem:[%s8765_s22 + $0x8] sm:$0xff]  ;;  %v8786_v10 = vld [vmem:[%s8765_s22 + $0x18] sm:$0xff]  ;;  %v716_v11 = vrot.slane %v8768_v3, 1  ;;  %v631_v15 = vrot.slane %v8771_v4, 7 }
  0x18   : > { %v730_v12 = vrot.slane %v8780_v8, 1  ;;  %v831_v13 = vpack.c.bf16 %v8780_v8, %v8774_v5  ;;  %v714_v14 = vrot.slane %v8774_v5, 1  ;;  %v715_v16 = vrot.slane %v8783_v9, 1  ;;  %v8811_v23 = vld [vmem:[%s8765_s22 + $0x30] sm:$0xff]  ;;  %v8814_v24 = vld [vmem:[%s8765_s22 + $0x38] sm:$0xff]  ;;  %v8825_v29 = vld [vmem:[%s8765_s22 + $0x40] sm:$0xff] }
  0x19   : > { %887 = vrot.lane.b32.xlu1 %v833_v7, %s8633_s2  ;;  %v731_v17 = vrot.slane %v8786_v10, 1  ;;  %v832_v18 = vpack.c.bf16 %v8786_v10, %v8783_v9  ;;  %v749_v21 = vsel %vm746_vm0, %v716_v11, %v732_v6  ;;  %v765_v22 = vsel %vm746_vm0, %v732_v6, %v716_v11  ;;  %v8828_v30 = vld [vmem:[%s8765_s22 + $0x48] sm:$0xff]  ;;  %v8843_v43 = vld [vmem:[%s8765_s22 + $0x50] sm:$0xff]  ;;  %v8846_v44 = vld [vmem:[%s8765_s22 + $0x58] sm:$0xff] }
  0x1a   : > { %883 = vrot.lane.b32.xlu0 %v831_v13, %s8633_s2  ;;  %v747_v19 = vsel %vm746_vm0, %v714_v14, %v730_v12  ;;  %v763_v20 = vsel %vm746_vm0, %v730_v12, %v714_v14  ;;  %v786_v28 = vsel %vm713_vm1, %v765_v22, 0.0  ;;  %v615_v31 = vrot.slane %v8768_v3, 7  ;;  %v8853_v48 = vld [vmem:[%s8765_s22 + $0x60] sm:$0xff]  ;;  %v8856_v49 = vld [vmem:[%s8765_s22 + $0x68] sm:$0xff]  ;;  %v8862_v52 = vld [vmem:[%s8765_s22 + $0x70] sm:$0xff] }
  0x1b   : > { %v782_v25 = vsel %vm713_vm1, %v763_v20, 0.0  ;;  %v748_v26 = vsel %vm746_vm0, %v715_v16, %v731_v17  ;;  %v764_v27 = vsel %vm746_vm0, %v731_v17, %v715_v16  ;;  %v629_v32 = vrot.slane %v8780_v8, 7  ;;  %v8871_v57 = vld [vmem:[%s8765_s22 + $0x78] sm:$0xff]  ;;  %v8883_v62 = vld [vmem:[%s8765_s22 + $0x80] sm:$0xff]  ;;  %v8895_v14 = vld [vmem:[%s8765_s22 + $0x88] sm:$0xff] }
  0x1c   : > { %v848_v33 = vpack.c.bf16 %v782_v25, %v747_v19  ;;  %v784_v34 = vsel %vm713_vm1, %v764_v27, 0.0  ;;  %v613_v35 = vrot.slane %v8774_v5, 7  ;;  %v717_v37 = vrot.slane %v8811_v23, 1  ;;  %v8901_v19 = vld [vmem:[%s8765_s22 + $0x90] sm:$0xff] }
  0x1d   : > { %v849_v36 = vpack.c.bf16 %v784_v34, %v748_v26  ;;  %v733_v38 = vrot.slane %v8814_v24, 1  ;;  %v614_v39 = vrot.slane %v8783_v9, 7  ;;  %v850_v40 = vpack.c.bf16 %v786_v28, %v749_v21  ;;  %v8910_v26 = vld [vmem:[%s8765_s22 + $0x98] sm:$0xff]  ;;  %v9002_v22 = vld [vmem:[%s8765_s22 + $0xd0] sm:$0xff] }
  0x1e   : > { %885 = vrot.lane.b32.xlu0 %v832_v18, %s8633_s2  ;;  %934 = vrot.lane.b32.xlu1 %v848_v33, %s8634_s23  ;;  %v718_v41 = vrot.slane %v8825_v29, 1  ;;  %v734_v42 = vrot.slane %v8828_v30, 1  ;;  %v630_v45 = vrot.slane %v8786_v10, 7  ;;  %v616_v46 = vrot.slane %v8811_v23, 7 }
  0x1f   : > { %v766_v47 = vsel %vm746_vm0, %v733_v38, %v717_v37  ;;  %v632_v50 = vrot.slane %v8814_v24, 7  ;;  %v834_v53 = vpack.c.bf16 %v8814_v24, %v8811_v23  ;;  %v617_v54 = vrot.slane %v8825_v29, 7 }
  0x20   : > { %v767_v51 = vsel %vm746_vm0, %v734_v42, %v718_v41  ;;  %v719_v55 = vrot.slane %v8843_v43, 1  ;;  %v735_v56 = vrot.slane %v8846_v44, 1  ;;  %v835_v58 = vpack.c.bf16 %v8828_v30, %v8825_v29 }
  0x21   : > { %v750_v59 = vsel %vm746_vm0, %v717_v37, %v733_v38  ;;  %v788_v60 = vsel %vm713_vm1, %v766_v47, 0.0  ;;  %v790_v61 = vsel %vm713_vm1, %v767_v51, 0.0  ;;  %v751_v63 = vsel %vm746_vm0, %v718_v41, %v734_v42  ;;  %v8922_v37 = vld [vmem:[%s8765_s22 + $0xa8] sm:$0xff]  ;;  %v8931_v47 = vld [vmem:[%s8765_s22 + $0xb0] sm:$0xff] }
  0x22   : > { %936 = vrot.lane.b32.xlu0 %v849_v36, %s8634_s23  ;;  %938 = vrot.lane.b32.xlu1 %v850_v40, %s8634_s23  ;;  %v720_v0 = vrot.slane %v8853_v48, 1  ;;  %v736_v6 = vrot.slane %v8856_v49, 1  ;;  %v633_v7 = vrot.slane %v8828_v30, 7  ;;  %v618_v11 = vrot.slane %v8843_v43, 7  ;;  %v8919_v36 = vld [vmem:[%s8765_s22 + $0xa0] sm:$0xff] }
  0x23   : > { %v768_v12 = vsel %vm746_vm0, %v735_v56, %v719_v55  ;;  %v721_v13 = vrot.slane %v8862_v52, 1  ;;  %v851_v16 = vpack.c.bf16 %v788_v60, %v750_v59  ;;  %v634_v17 = vrot.slane %v8846_v44, 7 }
  0x24   : > { %v737_v18 = vrot.slane %v8871_v57, 1  ;;  %v852_v20 = vpack.c.bf16 %v790_v61, %v751_v63  ;;  %v836_v21 = vpack.c.bf16 %v8846_v44, %v8843_v43  ;;  %v769_v25 = vsel %vm746_vm0, %v736_v6, %v720_v0  ;;  %v8946_v63 = vld [vmem:[%s8765_s22 + $0xb8] sm:$0xff] }
  0x25   : > { %v752_v27 = vsel %vm746_vm0, %v719_v55, %v735_v56  ;;  %v792_v28 = vsel %vm713_vm1, %v768_v12, 0.0  ;;  %v722_v33 = vrot.slane %v8883_v62, 1  ;;  %v738_v34 = vrot.slane %v8895_v14, 1 }
  0x26   : > { %889 = vrot.lane.b32.xlu0 %v834_v53, %s8633_s2  ;;  %891 = vrot.lane.b32.xlu1 %v835_v58, %s8633_s2  ;;  %v837_v40 = vpack.c.bf16 %v8856_v49, %v8853_v48  ;;  %v770_v42 = vsel %vm746_vm0, %v737_v18, %v721_v13  ;;  %v753_v51 = vsel %vm746_vm0, %v720_v0, %v736_v6  ;;  %v794_v53 = vsel %vm713_vm1, %v769_v25, 0.0 }
  0x27   : > { %v771_v56 = vsel %vm746_vm0, %v738_v34, %v722_v33  ;;  %v853_v58 = vpack.c.bf16 %v792_v28, %v752_v27  ;;  %v723_v60 = vrot.slane %v8901_v19, 1  ;;  %v739_v61 = vrot.slane %v8910_v26, 1 }
  0x28   : > { %v838_v0 = vpack.c.bf16 %v8871_v57, %v8862_v52  ;;  %v8953_v6 = vsel %vm746_vm0, %v721_v13, %v737_v18  ;;  %v8957_v12 = vsel %vm713_vm1, %v770_v42, 0.0  ;;  %v854_v25 = vpack.c.bf16 %v794_v53, %v753_v51  ;;  %v8979_v51 = vld [vmem:[%s8765_s22 + $0xc8] sm:$0xff] }
  0x29   : > { %v8968_v27 = vsel %vm746_vm0, %v722_v33, %v738_v34  ;;  %v724_v28 = vrot.slane %v8919_v36, 1  ;;  %v740_v13 = vrot.slane %v8922_v37, 1  ;;  %v839_v42 = vpack.c.bf16 %v8895_v14, %v8883_v62  ;;  %v9053_v18 = vld [vmem:[%s8765_s22 + $0xe8] sm:$0xff] }
  0x2a   : > { %940 = vrot.lane.b32.xlu0 %v851_v16, %s8634_s23  ;;  %942 = vrot.lane.b32.xlu1 %v852_v20, %s8634_s23  ;;  %v8961_v16 = vsel %vm713_vm1, %v771_v56, 0.0  ;;  %v8964_v20 = vld [vmem:[%s8765_s22 + $0xc0] sm:$0xff]  ;;  %v725_v59 = vrot.slane %v8931_v47, 1  ;;  %v772_v34 = vsel %vm746_vm0, %v739_v61, %v723_v60  ;;  %v741_v53 = vrot.slane %v8946_v63, 1 }
  0x2b   : > { %v856_v56 = vpack.c.bf16 %v8961_v16, %v8968_v27  ;;  %v726_v33 = vrot.slane %v8964_v20, 1  ;;  %v742_v55 = vrot.slane %v8979_v51, 1  ;;  %v9005_v16 = vld [vmem:[%s8765_s22 + $0xd8] sm:$0xff]  ;;  %v9010_v27 = vsel %vm746_vm0, %v723_v60, %v739_v61 }
  0x2c   : > { %v9014_v41 = vsel %vm713_vm1, %v772_v34, 0.0  ;;  %v9022_v38 = vsel %vm746_vm0, %v724_v28, %v740_v13  ;;  %v9045_v60 = vsel %vm746_vm0, %v725_v59, %v741_v53  ;;  %v9120_v5 = vsel %vm645_vm2, %v614_v39, %v630_v45 }
  0x2d   : > { %v775_v61 = vsel %vm746_vm0, %v742_v55, %v726_v33  ;;  %v663_v8 = vsel %vm645_vm2, %v630_v45, %v614_v39  ;;  %v9141_v9 = vsel %vm645_vm2, %v616_v46, %v632_v50  ;;  %v665_v10 = vsel %vm645_vm2, %v632_v50, %v616_v46 }
  0x2e   : > { %893 = vrot.lane.b32.xlu0 %v836_v21, %s8633_s2  ;;  %895 = vrot.lane.b32.xlu1 %v837_v40, %s8633_s2  ;;  %v855_v21 = vpack.c.bf16 %v8957_v12, %v8953_v6  ;;  %v773_v40 = vsel %vm746_vm0, %v740_v13, %v724_v28  ;;  %v774_v12 = vsel %vm746_vm0, %v741_v53, %v725_v59  ;;  %v626_v28 = vrot.slane %v9002_v22, 7  ;;  %v9039_v13 = vld [vmem:[%s8765_s22 + $0xe0] sm:$0xff] }
  0x2f   : > { %v9049_v34 = vsel %vm713_vm1, %v775_v61, 0.0  ;;  %v642_v6 = vrot.slane %v9005_v16, 7  ;;  %v843_v53 = vpack.c.bf16 %v8979_v51, %v8964_v20  ;;  %v9091_v61 = vsel %vm746_vm0, %v726_v33, %v742_v55 }
  0x30   : > { %v627_v3 = vrot.slane %v9039_v13, 7  ;;  %v662_v55 = vsel %vm645_vm2, %v629_v32, %v613_v35  ;;  %v744_v33 = vrot.slane %v9053_v18, 1  ;;  %v9153_v45 = vsel %vm611_vm3, %v665_v10, 0.0 }
  0x31   : > { %v666_v23 = vsel %vm645_vm2, %v633_v7, %v617_v54  ;;  %v817_v24 = vpack.c.bf16 %v9141_v9, %v9153_v45  ;;  %v9181_v50 = vsel %vm645_vm2, %v618_v11, %v634_v17  ;;  %v667_v29 = vsel %vm645_vm2, %v634_v17, %v618_v11 }
  0x32   : > { %944 = vrot.lane.b32.xlu0 %v853_v58, %s8634_s23  ;;  %946 = vrot.lane.b32.xlu1 %v854_v25, %s8634_s23  ;;  %v9026_v58 = vsel %vm713_vm1, %v773_v40, 0.0  ;;  %v9035_v25 = vsel %vm713_vm1, %v774_v12, 0.0  ;;  %v857_v40 = vpack.c.bf16 %v9014_v41, %v9010_v27  ;;  %v842_v41 = vpack.c.bf16 %v8946_v63, %v8931_v47 }
  0x33   : > { %v858_v12 = vpack.c.bf16 %v9026_v58, %v9022_v38  ;;  %v727_v27 = vrot.slane %v9002_v22, 1  ;;  %v664_v38 = vsel %vm645_vm2, %v631_v15, %v615_v31  ;;  %v859_v58 = vpack.c.bf16 %v9035_v25, %v9045_v60 }
  0x34   : > { %v9096_v4 = vsel %vm611_vm3, %v664_v38, 0.0  ;;  %v9112_v38 = vsel %vm611_vm3, %v662_v55, 0.0  ;;  %v9173_v46 = vsel %vm611_vm3, %v666_v23, 0.0  ;;  %v11345_v30 = vpack.c.bf16 %v8910_v26, %v8901_v19 }
  0x35   : > { %v11347_v43 = vrot.slane %v8853_v48, 7  ;;  %v11352_v48 = vrot.slane %v8862_v52, 7 }
  0x36   : > { %897 = vrot.lane.b32.xlu0 %v838_v0, %s8633_s2  ;;  %899 = vrot.lane.b32.xlu1 %v839_v42, %s8633_s2  ;;  %v9071_v0 = vsel %vm645_vm2, %v615_v31, %v631_v15  ;;  %v9085_v42 = vsel %vm645_vm2, %v613_v35, %v629_v32  ;;  %v643_v15 = vrot.slane %v9053_v18, 7  ;;  %v728_v31 = vrot.slane %v9039_v13, 1 }
  0x37   : > { %v816_v59 = vpack.c.bf16 %v9071_v0, %v9096_v4  ;;  %v814_v32 = vpack.c.bf16 %v9085_v42, %v9112_v38  ;;  %v9133_v35 = vsel %vm611_vm3, %v663_v8, 0.0  ;;  %v11348_v11 = vmov %v11347_v43 }
  0x38   : > { %v815_v39 = vpack.c.bf16 %v9120_v5, %v9133_v35  ;;  %v11350_v8 = vpack.c.bf16 %v8922_v37, %v8919_v36 }
  0x3a   : > { %948 = vrot.lane.b32.xlu0 %v855_v21, %s8634_s23  ;;  %950 = vrot.lane.b32.xlu1 %v856_v56, %s8634_s23  ;;  %v9161_v56 = vsel %vm645_vm2, %v617_v54, %v633_v7  ;;  %v9197_v7 = vsel %vm611_vm3, %v667_v29, 0.0  ;;  %v11346_v21 = vrot.slane %v8856_v49, 7  ;;  %v11351_v29 = vrot.slane %v8871_v57, 7 }
  0x3b   : > { %v818_v54 = vpack.c.bf16 %v9161_v56, %v9173_v46  ;;  %v819_v10 = vpack.c.bf16 %v9181_v50, %v9197_v7 }
  0x3c   : > { %v9205_v44 = vsel %vm645_vm2, %v11347_v43, %v11346_v21  ;;  %v11349_v17 = vmov %v11346_v21  ;;  %v9229_v49 = vsel %vm645_vm2, %v11352_v48, %v11351_v29  ;;  %v11354_v21 = vmov %v11351_v29 }
  0x3d   : > { %v668_v55 = vsel %vm645_vm2, %v11349_v17, %v11348_v11  ;;  %v11360_v11 = vrot.slane %v8901_v19, 7 }
  0x3e   : > { %901 = vrot.lane.b32.xlu0 %v11345_v30, %s8633_s2  ;;  %903 = vrot.lane.b32.xlu1 %v11350_v8, %s8633_s2  ;;  %v9221_v23 = vsel %vm611_vm3, %v668_v55, 0.0  ;;  %v11353_v30 = vmov %v11352_v48  ;;  %v11355_v55 = vrot.slane %v8895_v14, 7  ;;  %v11356_v8 = vrot.slane %v8883_v62, 7 }
  0x3f   : > { %v669_v43 = vsel %vm645_vm2, %v11354_v21, %v11353_v30  ;;  %v11361_v62 = vmov %v11360_v11 }
  0x40   : > { %v9241_v17 = vsel %vm611_vm3, %v669_v43, 0.0  ;;  %v9249_v29 = vsel %vm645_vm2, %v11356_v8, %v11355_v55  ;;  %v11357_v52 = vmov %v11356_v8  ;;  %v11358_v57 = vmov %v11355_v55 }
  0x41   : > { %v670_v48 = vsel %vm645_vm2, %v11358_v57, %v11357_v52  ;;  %v821_v30 = vpack.c.bf16 %v9229_v49, %v9241_v17  ;;  %v11359_v43 = vrot.slane %v8910_v26, 7 }
  0x42   : > { %v9261_v21 = vsel %vm611_vm3, %v670_v48, 0.0  ;;  %952 = vrot.lane.b32.xlu0 %v857_v40, %s8634_s23  ;;  %v11363_v48 = vrot.slane %v8922_v37, 7  ;;  %954 = vrot.lane.b32.xlu1 %v858_v12, %s8634_s23 }
  0x43   : > { %v9269_v55 = vsel %vm645_vm2, %v11360_v11, %v11359_v43  ;;  %v11362_v14 = vmov %v11359_v43  ;;  %v11364_v11 = vrot.slane %v8919_v36, 7 }
  0x44   : > { %v671_v8 = vsel %vm645_vm2, %v11362_v14, %v11361_v62  ;;  %v11366_v43 = vmov %v11363_v48  ;;  %v11372_v62 = vrot.slane %v8964_v20, 7  ;;  %v11376_v20 = vrot.slane %v9005_v16, 1 }
  0x45   : > { %v9282_v57 = vsel %vm611_vm3, %v671_v8, 0.0  ;;  %v9290_v19 = vsel %vm645_vm2, %v11364_v11, %v11363_v48  ;;  %v11365_v26 = vmov %v11364_v11  ;;  %v11367_v8 = vrot.slane %v8946_v63, 7 }
  0x46   : > { %v672_v40 = vsel %vm645_vm2, %v11366_v43, %v11365_v26  ;;  %v11368_v48 = vrot.slane %v8931_v47, 7  ;;  %905 = vrot.lane.b32.xlu0 %v842_v41, %s8633_s2  ;;  %v676_v47 = vsel %vm645_vm2, %v643_v15, %v627_v3  ;;  %907 = vrot.lane.b32.xlu1 %v843_v53, %s8633_s2  ;;  %v860_v63 = vpack.c.bf16 %v9049_v34, %v9091_v61  ;;  %v9407_v34 = vld [vmem:[%s8765_s22 + $0xf8] sm:$0xff] }
  0x47   : > { %v9303_v14 = vsel %vm611_vm3, %v672_v40, 0.0  ;;  %v11370_v11 = vmov %v11367_v8  ;;  %v11371_v40 = vrot.slane %v8979_v51, 7  ;;  %v9404_v51 = vld [vmem:[%s8765_s22 + $0xf0] sm:$0xff]  ;;  %v777_v53 = vsel %vm746_vm0, %v744_v33, %v728_v31 }
  0x48   : > { %v9311_v36 = vsel %vm645_vm2, %v11368_v48, %v11367_v8  ;;  %v11369_v37 = vmov %v11368_v48  ;;  %v824_v26 = vpack.c.bf16 %v9290_v19, %v9303_v14  ;;  %v11373_v48 = vmov %v11372_v62 }
  0x49   : > { %v673_v12 = vsel %vm645_vm2, %v11370_v11, %v11369_v37  ;;  %v9331_v8 = vsel %vm645_vm2, %v11372_v62, %v11371_v40  ;;  %v11374_v52 = vmov %v11371_v40  ;;  %v9351_v62 = vsel %vm645_vm2, %v626_v28, %v642_v6 }
  0x4a   : > { %v9323_v43 = vsel %vm611_vm3, %v673_v12, 0.0  ;;  %v674_v37 = vsel %vm645_vm2, %v11374_v52, %v11373_v48  ;;  %v675_v52 = vsel %vm645_vm2, %v642_v6, %v626_v28  ;;  %v11375_v6 = vrot.slane %v9005_v16, 1  ;;  %956 = vrot.lane.b32.xlu0 %v859_v58, %s8634_s23  ;;  %958 = vrot.lane.b32.xlu1 %v860_v63, %s8634_s23 }
  0x4b   : > { %v825_v11 = vpack.c.bf16 %v9311_v36, %v9323_v43  ;;  %v9343_v12 = vsel %vm611_vm3, %v674_v37, 0.0  ;;  %v9367_v48 = vsel %vm611_vm3, %v675_v52, 0.0  ;;  %v9375_v37 = vsel %vm645_vm2, %v627_v3, %v643_v15 }
  0x4c   : > { %v826_v40 = vpack.c.bf16 %v9331_v8, %v9343_v12  ;;  %v776_v28 = vsel %vm746_vm0, %v11375_v6, %v727_v27  ;;  %v9399_v3 = vsel %vm611_vm3, %v676_v47, 0.0  ;;  %v729_v61 = vrot.slane %v9404_v51, 1 }
  0x4d   : > { %v745_v15 = vrot.slane %v9407_v34, 1  ;;  %v844_v52 = vpack.c.bf16 %v9005_v16, %v9002_v22  ;;  %v808_v47 = vsel %vm713_vm1, %v776_v28, 0.0  ;;  %v845_v6 = vpack.c.bf16 %v9053_v18, %v9039_v13  ;;  %v8427_v13 = vld [vmem:[%s11377_s26] sm:$0xff]  }
  0x4e   : > { %v760_v41 = vsel %vm746_vm0, %v727_v27, %v11376_v20  ;;  %v761_v58 = vsel %vm746_vm0, %v728_v31, %v744_v33  ;;  %v810_v22 = vsel %vm713_vm1, %v777_v53, 0.0  ;;  %7647 = vmatprep.subr.bf16.mxu0 %v8427_v13  ;;  %v8428_v31 = vld [vmem:[%s11377_s26 + $0x8] sm:$0xff]   ;;  %v8429_v33 = vld [vmem:[%s11377_s26 + $0x10] ss:$0 sps:$4 sm:$0x33]   ;;  %v11381_v8 = vpack.c.bf16 %v9351_v62, %v9367_v48 }
  0x4f   : > { %v9436_v60 = vsel %vm746_vm0, %v729_v61, %v745_v15  ;;  %v778_v25 = vsel %vm746_vm0, %v745_v15, %v729_v61  ;;  %909 = vrot.lane.b32.xlu0 %v844_v52, %s8633_s2  ;;  %v861_v63 = vpack.c.bf16 %v808_v47, %v760_v41  ;;  %911 = vrot.lane.b32.xlu1 %v845_v6, %s8633_s2  ;;  %v1262_v41 = vsel %vm1260_vm5, %v8429_v33, 0 }
  0x50   : > { %v9450_v16 = vsel %vm713_vm1, %v778_v25, 0.0  ;;  %v862_v18 = vpack.c.bf16 %v810_v22, %v761_v58  ;;  %7648 = vmatpush3.bf16.msra.mxu0 %v8427_v13  ;;  %v846_v62 = vpack.c.bf16 %v9407_v34, %v9404_v51  ;;  %vm9986_vm1 = vmpackc.low %vm611_vm3, %vm611_vm3 }
  0x51   : > { %v863_v27 = vpack.c.bf16 %v9450_v16, %v9436_v60  ;;  %7649 = vmatprep.subr.bf16.mxu0 %v8428_v31 }
  0x53   : > { %960 = vrot.lane.b32.xlu0 %v861_v63, %s8634_s23  ;;  %962 = vrot.lane.b32.xlu1 %v862_v18, %s8634_s23  ;;  %v11378_v63 = vpack.c.bf16 %v9205_v44, %v9221_v23 }
  0x54   : > { %7650 = vmatpush3.bf16.msra.mxu0 %v8428_v31 }
  0x55   : > { %8407 = vmatprep.subr.msk.bf16.mxu0 %vm1260_vm5, %v8429_v33  ;;  %v11379_v33 = vpack.c.bf16 %v9249_v29, %v9261_v21  ;;  %v11380_v29 = vpack.c.bf16 %v9269_v55, %v9282_v57 }
  0x57   : > { %881 = vrot.lane.b32.xlu0 %v8635_v2, %s8633_s2  ;;  %932 = vrot.lane.b32.xlu1 %v8635_v2, %s8634_s23 }
  0x58   : > { %7652 = vmatpush3.bf16.msra.mxu0 %v1262_v41 }
  0x8b   : > { %v888_v28 = vpop.permute.xlu1 %887 }
  0x8c   : > { %v884_v20 = vpop.permute.xlu0 %883  ;;  %v978_v42 = vsel %vm966_vm4, %v816_v59, %v888_v28 }
  0x8d   : > { %v972_v61 = vsel %vm966_vm4, %v814_v32, %v884_v20 }
  0x90   : > { %v886_v53 = vpop.permute.xlu0 %885  ;;  %v935_v15 = vpop.permute.xlu1 %934 }
  0x91   : > { %v9478_v52 = vsel %vm1018_vm6, %v972_v61, %v935_v15  ;;  %v975_v47 = vsel %vm966_vm4, %v815_v39, %v886_v53 }
  0x92   : > { %1069 = vrot.lane.b32.xlu0 %v9478_v52, %s8636_s0 }
  0x94   : > { %v937_v6 = vpop.permute.xlu0 %936  ;;  %v939_v25 = vpop.permute.xlu1 %938 }
  0x95   : > { %v9487_v58 = vsel %vm1018_vm6, %v975_v47, %v937_v6  ;;  %v9498_v32 = vsel %vm1018_vm6, %v978_v42, %v939_v25  ;;  %v628_v47 = vrot.slane %v9404_v51, 7  ;;  %v644_v6 = vrot.slane %v9407_v34, 7 }
  0x96   : > { %1071 = vrot.lane.b32.xlu1 %v9487_v58, %s8636_s0  ;;  %1102 = vrot.lane.b32.xlu0 %v9487_v58, %s8637_s19 }
  0x97   : > { %v9603_v42 = vsel %vm645_vm2, %v628_v47, %v644_v6 }
  0x98   : > { %v890_v38 = vpop.permute.xlu0 %889  ;;  %v892_v5 = vpop.permute.xlu1 %891 }
  0x99   : > { %v981_v35 = vsel %vm966_vm4, %v817_v24, %v890_v38  ;;  %v984_v4 = vsel %vm966_vm4, %v818_v54, %v892_v5  ;;  %v677_v38 = vsel %vm645_vm2, %v644_v6, %v628_v47  ;;  %vm10036_vm2 = vmpackc.low %vm746_vm0, %vm746_vm0 }
  0x9a   : > { %1104 = vrot.lane.b32.xlu1 %v9498_v32, %s8637_s19  ;;  %1073 = vrot.lane.b32.xlu0 %v9498_v32, %s8636_s0  ;;  %v9615_v36 = vsel %vm611_vm3, %v677_v38, 0.0 }
  0x9b   : > { %v829_v43 = vpack.c.bf16 %v9603_v42, %v9615_v36  ;;  %v8431_v42 = vld [vmem:[%s11324_s3 + $0x48] sm:$0xff]   ;;  %v8432_v36 = vld [vmem:[%s11324_s3 + $0x50] sm:$0xff]  }
  0x9c   : > { %v941_v39 = vpop.permute.xlu0 %940  ;;  %v943_v0 = vpop.permute.xlu1 %942 }
  0x9d   : > { %v9509_v59 = vsel %vm1018_vm6, %v981_v35, %v941_v39  ;;  %v9520_v45 = vsel %vm1018_vm6, %v984_v4, %v943_v0  ;;  %v11382_v4 = vpack.c.bf16 %v9375_v37, %v9399_v3 }
  0x9e   : > { %1075 = vrot.lane.b32.xlu1 %v9509_v59, %s8636_s0  ;;  %1106 = vrot.lane.b32.xlu0 %v9509_v59, %s8637_s19 }
  0xa0   : > { %v894_v22 = vpop.permute.xlu0 %893  ;;  %v896_v9 = vpop.permute.xlu1 %895 }
  0xa1   : > { %v987_v56 = vsel %vm966_vm4, %v819_v10, %v894_v22  ;;  %v990_v18 = vsel %vm966_vm4, %v11378_v63, %v896_v9 }
  0xa2   : > { %1108 = vrot.lane.b32.xlu1 %v9520_v45, %s8637_s19  ;;  %1077 = vrot.lane.b32.xlu0 %v9520_v45, %s8636_s0 }
  0xa4   : > { %v945_v24 = vpop.permute.xlu0 %944  ;;  %v947_v46 = vpop.permute.xlu1 %946 }
  0xa5   : > { %v9531_v54 = vsel %vm1018_vm6, %v987_v56, %v945_v24  ;;  %v9542_v7 = vsel %vm1018_vm6, %v990_v18, %v947_v46 }
  0xa6   : > { %1079 = vrot.lane.b32.xlu1 %v9531_v54, %s8636_s0  ;;  %1110 = vrot.lane.b32.xlu0 %v9531_v54, %s8637_s19 }
  0xa8   : > { %v898_v13 = vpop.permute.xlu0 %897  ;;  %v900_v50 = vpop.permute.xlu1 %899 }
  0xa9   : > { %v993_v44 = vsel %vm966_vm4, %v821_v30, %v898_v13  ;;  %v996_v28 = vsel %vm966_vm4, %v11379_v33, %v900_v50 }
  0xaa   : > { %1112 = vrot.lane.b32.xlu1 %v9542_v7, %s8637_s19  ;;  %1081 = vrot.lane.b32.xlu0 %v9542_v7, %s8636_s0 }
  0xac   : > { %v949_v10 = vpop.permute.xlu0 %948  ;;  %v951_v23 = vpop.permute.xlu1 %950 }
  0xad   : > { %v9553_v31 = vsel %vm1018_vm6, %v993_v44, %v949_v10  ;;  %v9564_v17 = vsel %vm1018_vm6, %v996_v28, %v951_v23 }
  0xae   : > { %1083 = vrot.lane.b32.xlu1 %v9553_v31, %s8636_s0  ;;  %1114 = vrot.lane.b32.xlu0 %v9553_v31, %s8637_s19 }
  0xb0   : > { %v902_v41 = vpop.permute.xlu0 %901  ;;  %v904_v49 = vpop.permute.xlu1 %903 }
  0xb1   : > { %v999_v30 = vsel %vm966_vm4, %v11380_v29, %v902_v41  ;;  %v1002_v61 = vsel %vm966_vm4, %v824_v26, %v904_v49 }
  0xb2   : > { %1116 = vrot.lane.b32.xlu1 %v9564_v17, %s8637_s19  ;;  %1085 = vrot.lane.b32.xlu0 %v9564_v17, %s8636_s0 }
  0xb4   : > { %v953_v21 = vpop.permute.xlu0 %952  ;;  %v955_v20 = vpop.permute.xlu1 %954 }
  0xb5   : > { %v9575_v53 = vsel %vm1018_vm6, %v999_v30, %v953_v21  ;;  %v9586_v57 = vsel %vm1018_vm6, %v1002_v61, %v955_v20 }
  0xb6   : > { %1087 = vrot.lane.b32.xlu1 %v9575_v53, %s8636_s0  ;;  %1118 = vrot.lane.b32.xlu0 %v9575_v53, %s8637_s19 }
  0xb8   : > { %v906_v15 = vpop.permute.xlu0 %905  ;;  %v908_v55 = vpop.permute.xlu1 %907 }
  0xb9   : > { %v1005_v19 = vsel %vm966_vm4, %v825_v11, %v906_v15  ;;  %v1008_v5 = vsel %vm966_vm4, %v826_v40, %v908_v55 }
  0xba   : > { %1120 = vrot.lane.b32.xlu1 %v9586_v57, %s8637_s19  ;;  %1089 = vrot.lane.b32.xlu0 %v9586_v57, %s8636_s0 }
  0xbc   : > { %v957_v14 = vpop.permute.xlu0 %956  ;;  %v959_v26 = vpop.permute.xlu1 %958 }
  0xbd   : > { %v9599_v25 = vsel %vm1018_vm6, %v1005_v19, %v957_v14  ;;  %v9622_v39 = vsel %vm1018_vm6, %v1008_v5, %v959_v26 }
  0xbe   : > { %1091 = vrot.lane.b32.xlu1 %v9599_v25, %s8636_s0  ;;  %1122 = vrot.lane.b32.xlu0 %v9599_v25, %s8637_s19 }
  0xc1   : > { %v910_v11 = vpop.permute.xlu0 %909  ;;  %v912_v35 = vpop.permute.xlu1 %911 }
  0xc2   : > { %1124 = vrot.lane.b32.xlu1 %v9622_v39, %s8637_s19  ;;  %1093 = vrot.lane.b32.xlu0 %v9622_v39, %s8636_s0  ;;  %v1011_v12 = vsel %vm966_vm4, %v11381_v8, %v910_v11  ;;  %v1014_v22 = vsel %vm966_vm4, %v11382_v4, %v912_v35 }
  0xc5   : > { %v961_v40 = vpop.permute.xlu0 %960  ;;  %v963_v9 = vpop.permute.xlu1 %962 }
  0xc6   : > { %v9633_v0 = vsel %vm1018_vm6, %v1011_v12, %v961_v40  ;;  %v9646_v48 = vsel %vm1018_vm6, %v1014_v22, %v963_v9 }
  0xc7   : > { %1095 = vrot.lane.b32.xlu1 %v9633_v0, %s8636_s0  ;;  %1126 = vrot.lane.b32.xlu0 %v9633_v0, %s8637_s19 }
  0xc9   : > { %v882_v37 = vpop.permute.xlu0 %881  ;;  %v933_v3 = vpop.permute.xlu1 %932 }
  0xca   : > { %v969_v51 = vsel %vm966_vm4, 0.0|0.0, %v882_v37 }
  0xcb   : > { %1128 = vrot.lane.b32.xlu1 %v9646_v48, %s8637_s19  ;;  %913 = vrot.lane.b32.xlu0 %v846_v62, %s8633_s2  ;;  %v9659_v56 = vsel %vm1018_vm6, %v969_v51, %v933_v3  ;;  %s11383_s2 = sld [smem:[#allocation7_spill]] }
  0xcf   : > { %964 = vrot.lane.b32.xlu1 %v863_v27, %s8634_s23  ;;  %1097 = vrot.lane.b32.xlu0 %v9646_v48, %s8636_s0 }
 0x104   : > { %v1070_v34 = vpop.permute.xlu0 %1069 }
 0x105   : > { %v1136_v46 = vsel %vm1134_vm7, %v9659_v56, %v1070_v34 }
 0x108   : > { %v1072_v24 = vpop.permute.xlu1 %1071  ;;  %v1103_v60 = vpop.permute.xlu0 %1102 }
 0x109   : > { %v1169_v16 = vsel %vm1167_vm8, %v1136_v46, %v1103_v60  ;;  %v1138_v27 = vsel %vm1134_vm7, %v9478_v52, %v1072_v24 }
 0x10a   : > { %7653 = vmatprep.mubr.msk.bf16.mxu0 %vm1227_vm9, %v1169_v16 }
 0x10c   : > { %v1105_v63 = vpop.permute.xlu1 %1104  ;;  %v1074_v13 = vpop.permute.xlu0 %1073 }
 0x10d   : > { %v1171_v18 = vsel %vm1167_vm8, %v1138_v27, %v1105_v63  ;;  %v1140_v44 = vsel %vm1134_vm7, %v9487_v58, %v1074_v13  ;;  %v8435_v27 = vld [vmem:[%s11324_s3 + $0x68] sm:$0xff]   ;;  %v8436_v63 = vld [vmem:[%s11324_s3 + $0x70] sm:$0xff]   ;;  %v9753_v13 = vld [vmem:[%s11324_s3] sm:$0xff]  }
 0x10e   : > { %7654 = vmatmul.mubr.msk.bf16.vlgmr.msra.gmra.mrb[0].mxu0 %vm1227_vm9, %v1171_v18  ;;  %v8437_v18 = vld [vmem:[%s11324_s3 + $0x78] sm:$0xff]  }
 0x110   : > { %v1076_v50 = vpop.permute.xlu1 %1075  ;;  %v1107_v10 = vpop.permute.xlu0 %1106 }
 0x111   : > { %v1173_v23 = vsel %vm1167_vm8, %v1140_v44, %v1107_v10  ;;  %v1142_v33 = vsel %vm1134_vm7, %v9498_v32, %v1076_v50 }
 0x112   : > { %7657 = vmatprep.mubr.msk.bf16.mxu0 %vm1227_vm9, %v1173_v23 }
 0x114   : > { %v1109_v28 = vpop.permute.xlu1 %1108  ;;  %v1078_v41 = vpop.permute.xlu0 %1077 }
 0x115   : > { %v1175_v52 = vsel %vm1167_vm8, %v1142_v33, %v1109_v28  ;;  %v1144_v29 = vsel %vm1134_vm7, %v9509_v59, %v1078_v41 }
 0x116   : > { %7658 = vmatmul.mubr.msk.bf16.gmra.mrb[4].mxu0 %vm1227_vm9, %v1175_v52 }
 0x118   : > { %v1080_v49 = vpop.permute.xlu1 %1079  ;;  %v1111_v30 = vpop.permute.xlu0 %1110 }
 0x119   : > { %v1177_v58 = vsel %vm1167_vm8, %v1144_v29, %v1111_v30  ;;  %v1146_v21 = vsel %vm1134_vm7, %v9520_v45, %v1080_v49  ;;  %v9767_v49 = vld [vmem:[%s11383_s2] ss:$0 sm:$0xff] }
 0x11a   : > { %7661 = vmatprep.mubr.msk.bf16.mxu0 %vm1227_vm9, %v1177_v58 }
 0x11c   : > { %v1113_v20 = vpop.permute.xlu1 %1112  ;;  %v1082_v61 = vpop.permute.xlu0 %1081 }
 0x11d   : > { %v1179_v32 = vsel %vm1167_vm8, %v1146_v21, %v1113_v20  ;;  %v1148_v55 = vsel %vm1134_vm7, %v9531_v54, %v1082_v61 }
 0x11e   : > { %7662 = vmatmul.mubr.msk.bf16.gmra.mrb[8].mxu0 %vm1227_vm9, %v1179_v32 }
 0x120   : > { %v1084_v15 = vpop.permute.xlu1 %1083  ;;  %v1115_v47 = vpop.permute.xlu0 %1114 }
 0x121   : > { %v1181_v59 = vsel %vm1167_vm8, %v1148_v55, %v1115_v47  ;;  %v1150_v6 = vsel %vm1134_vm7, %v9542_v7, %v1084_v15 }
 0x122   : > { %7665 = vmatprep.mubr.msk.bf16.mxu0 %vm1227_vm9, %v1181_v59 }
 0x124   : > { %v1117_v19 = vpop.permute.xlu1 %1116  ;;  %v1086_v14 = vpop.permute.xlu0 %1085 }
 0x125   : > { %v1183_v45 = vsel %vm1167_vm8, %v1150_v6, %v1117_v19  ;;  %v1152_v38 = vsel %vm1134_vm7, %v9553_v31, %v1086_v14 }
 0x126   : > { %7666 = vmatmul.mubr.msk.bf16.gmra.mrb[12].mxu0 %vm1227_vm9, %v1183_v45 }
 0x128   : > { %v1088_v26 = vpop.permute.xlu1 %1087  ;;  %v1119_v5 = vpop.permute.xlu0 %1118 }
 0x129   : > { %v1185_v54 = vsel %vm1167_vm8, %v1152_v38, %v1119_v5  ;;  %v1154_v11 = vsel %vm1134_vm7, %v9564_v17, %v1088_v26 }
 0x12a   : > { %7669 = vmatprep.mubr.msk.bf16.mxu0 %vm1227_vm9, %v1185_v54 }
 0x12c   : > { %v1121_v35 = vpop.permute.xlu1 %1120  ;;  %v1090_v8 = vpop.permute.xlu0 %1089 }
 0x12d   : > { %v1187_v7 = vsel %vm1167_vm8, %v1154_v11, %v1121_v35  ;;  %v1156_v40 = vsel %vm1134_vm7, %v9575_v53, %v1090_v8 }
 0x12e   : > { %7670 = vmatmul.mubr.msk.bf16.gmra.mrb[16].mxu0 %vm1227_vm9, %v1187_v7 }
 0x130   : > { %v1092_v12 = vpop.permute.xlu1 %1091  ;;  %v1123_v4 = vpop.permute.xlu0 %1122 }
 0x131   : > { %v1189_v31 = vsel %vm1167_vm8, %v1156_v40, %v1123_v4  ;;  %v1158_v22 = vsel %vm1134_vm7, %v9586_v57, %v1092_v12 }
 0x132   : > { %7673 = vmatprep.mubr.msk.bf16.mxu0 %vm1227_vm9, %v1189_v31 }
 0x134   : > { %v1125_v9 = vpop.permute.xlu1 %1124  ;;  %v1094_v62 = vpop.permute.xlu0 %1093 }
 0x135   : > { %v1191_v17 = vsel %vm1167_vm8, %v1158_v22, %v1125_v9  ;;  %v1160_v3 = vsel %vm1134_vm7, %v9599_v25, %v1094_v62 }
 0x136   : > { %7674 = vmatmul.mubr.msk.bf16.gmra.mrb[20].mxu0 %vm1227_vm9, %v1191_v17 }
 0x139   : > { %v1096_v37 = vpop.permute.xlu1 %1095  ;;  %v1127_v51 = vpop.permute.xlu0 %1126 }
 0x13a   : > { %v1193_v53 = vsel %vm1167_vm8, %v1160_v3, %v1127_v51  ;;  %v1162_v34 = vsel %vm1134_vm7, %v9622_v39, %v1096_v37  ;;  %v8430_v39 = vld [vmem:[%s11324_s3 + $0x40] sm:$0xff]  }
 0x13b   : > { %7677 = vmatprep.mubr.msk.bf16.mxu0 %vm1227_vm9, %v1193_v53  ;;  %7685 = vmatprep.subr.bf16.mxu1 %v8430_v39 }
 0x13c   : > { %7686 = vmatpush3.bf16.msra.mxu1 %v8430_v39 }
 0x13d   : > { %v1129_v24 = vpop.permute.xlu1 %1128  ;;  %v914_v46 = vpop.permute.xlu0 %913  ;;  %7687 = vmatprep.subr.bf16.mxu1 %v8431_v42 }
 0x13e   : > { %v1195_v57 = vsel %vm1167_vm8, %v1162_v34, %v1129_v24  ;;  %v1017_v60 = vsel %vm966_vm4, %v829_v43, %v914_v46  ;;  %v8433_v43 = vld [vmem:[%s11324_s3 + $0x58] sm:$0xff]  }
 0x13f   : > { %7678 = vmatmul.mubr.msk.bf16.gmra.mrb[24].mxu0 %vm1227_vm9, %v1195_v57 }
 0x140   : > { %7688 = vmatpush3.bf16.msra.mxu1 %v8431_v42 }
 0x141   : > { %v965_v25 = vpop.permute.xlu1 %964  ;;  %7689 = vmatprep.subr.bf16.mxu1 %v8432_v36  ;;  %v1098_v50 = vpop.permute.xlu0 %1097 }
 0x142   : > { %v1052_v16 = vsel %vm1018_vm6, %v1017_v60, %v965_v25  ;;  %v1164_v44 = vsel %vm1134_vm7, %v9633_v0, %v1098_v50  ;;  %vm3276_vm6 = vcmask 785408  }
 0x143   : > { %1130 = vrot.lane.b32.xlu0 %v1052_v16, %s8637_s19  ;;  %1099 = vrot.lane.b32.xlu1 %v1052_v16, %s8636_s0 }
 0x144   : > { %7690 = vmatpush3.bf16.msra.mxu1 %v8432_v36 }
 0x145   : > { %7691 = vmatprep.subr.bf16.mxu1 %v8433_v43 }
 0x147   : > { %1132 = vrot.lane.b32.xlu1 %v9659_v56, %s8637_s19  ;;  %v8434_v56 = vld [vmem:[%s11324_s3 + $0x60] sm:$0xff]  }
 0x148   : > { %7692 = vmatpush3.bf16.msra.mxu1 %v8433_v43 }
 0x149   : > { %7693 = vmatprep.subr.bf16.mxu1 %v8434_v56 }
 0x14c   : > { %7694 = vmatpush3.bf16.msra.mxu1 %v8434_v56 }
 0x14d   : > { %7695 = vmatprep.subr.bf16.mxu1 %v8435_v27 }
 0x150   : > { %7696 = vmatpush3.bf16.msra.mxu1 %v8435_v27 }
 0x151   : > { %7697 = vmatprep.subr.bf16.mxu1 %v8436_v63 }
 0x154   : > { %7698 = vmatpush3.bf16.msra.mxu1 %v8436_v63 }
 0x155   : > { %7699 = vmatprep.subr.bf16.mxu1 %v8437_v18 }
 0x158   : > { %7700 = vmatpush3.bf16.msra.mxu1 %v8437_v18 }
 0x159   : > { %7709 = vmatprep.subr.bf16.mxu1 %v9753_v13 }
 0x1b5   : > { %v1100_v10 = vpop.permute.xlu1 %1099  ;;  %v1131_v23 = vpop.permute.xlu0 %1130 }
 0x1b6   : > { %v1197_v33 = vsel %vm1167_vm8, %v1164_v44, %v1131_v23  ;;  %v1166_v28 = vsel %vm1134_vm7, %v9646_v48, %v1100_v10  ;;  %vm4518_vm7 = vcmask 1047556  }
 0x1b7   : > { %7681 = vmatprep.mubr.msk.bf16.mxu0 %vm1227_vm9, %v1197_v33 }
 0x1b9   : > { %v1133_v52 = vpop.permute.xlu1 %1132 }
 0x1ba   : > { %v1199_v41 = vsel %vm1167_vm8, %v1166_v28, %v1133_v52  ;;  %vm4558_vm8 = vcmp.lt.s32.totalorder %v8756_v1, 3 }
 0x1bb   : > { %7682 = vmatmul.mubr.msk.bf16.gmra.mrb[28].mxu0 %vm1227_vm9, %v1199_v41  ;;  %vm4649_vm9 = vcmask 523264  }
 0x1e1   : > { %v7655_v0 = vpop.f32.mrb[0].mxu0 }
 0x1e2   : > { %v1307_v29 = vadd.f32 %v7655_v0, %v9767_v49  ;;  %v1298_v30 = vpop.f32.mrb[1].mxu0 }
 0x1e3   : > { %v1299_v58 = vadd.f32 %v9767_v49, %v1298_v30  ;;  %v7656_v21 = vpop.f32.mrb[2].mxu0 }
 0x1e4   : > { %v1427_v20 = vmax.f32 %v1307_v29, 0.0  ;;  %v1310_v48 = vadd.f32 %v7656_v21, %v9767_v49  ;;  %v1301_v32 = vpop.f32.mrb[3].mxu0 }
 0x1e5   : > { %v1425_v61 = vmax.f32 %v1299_v58, 0.0  ;;  %v1302_v15 = vadd.f32 %v9767_v49, %v1301_v32 }
 0x1e6   : > { %v1428_v55 = vmax.f32 %v1310_v48, 0.0 }
 0x1e7   : > { %v1457_v47 = vmax.f32 %v1425_v61, %v1427_v20  ;;  %v1426_v59 = vmax.f32 %v1302_v15, 0.0 }
 0x1e9   : > { %v1481_v6 = vrot.slane %v1457_v47, 1  ;;  %v1458_v19 = vmax.f32 %v1426_v59, %v1428_v55  ;;  %v7659_v45 = vpop.f32.mrb[4].mxu0 }
 0x1ea   : > { %v1323_v14 = vadd.f32 %v7659_v45, %v9767_v49  ;;  %v1314_v26 = vpop.f32.mrb[5].mxu0 }
 0x1eb   : > { %v1497_v38 = vmax.f32 %v1457_v47, %v1481_v6  ;;  %v1513_v5 = vrot.slane %v1458_v19, 1  ;;  %v1315_v54 = vadd.f32 %v9767_v49, %v1314_v26  ;;  %v7660_v11 = vpop.f32.mrb[6].mxu0 }
 0x1ec   : > { %v1431_v35 = vmax.f32 %v1323_v14, 0.0  ;;  %v1326_v7 = vadd.f32 %v7660_v11, %v9767_v49  ;;  %v1317_v8 = vpop.f32.mrb[7].mxu0 }
 0x1ed   : > { %v1545_v12 = vrot.slane %v1497_v38, 1  ;;  %v1561_v40 = vrot.slane %v1497_v38, 2  ;;  %v1529_v4 = vmax.f32 %v1458_v19, %v1513_v5  ;;  %v1429_v31 = vmax.f32 %v1315_v54, 0.0 }
 0x1ee   : > { %v1432_v22 = vmax.f32 %v1326_v7, 0.0  ;;  %v1318_v9 = vadd.f32 %v9767_v49, %v1317_v8  ;;  %v1577_v17 = vrot.slane %v1497_v38, 3 }
 0x1ef   : > { %v1666_v62 = vsel %vm1665_vm10, %v1497_v38, %v1545_v12  ;;  %v1601_v37 = vrot.slane %v1529_v4, 4  ;;  %v1459_v51 = vmax.f32 %v1429_v31, %v1431_v35  ;;  %v1617_v34 = vrot.slane %v1529_v4, 5 }
 0x1f0   : > { %v1674_v3 = vsel %vm1260_vm5, %v1666_v62, %v1561_v40  ;;  %v1430_v53 = vmax.f32 %v1318_v9, 0.0  ;;  %v1633_v43 = vrot.slane %v1529_v4, 6  ;;  %v1649_v33 = vrot.slane %v1529_v4, 7 }
 0x1f1   : > { %v7663_v24 = vpop.f32.mrb[8].mxu0  ;;  %v1683_v57 = vsel %vm1682_vm11, %v1674_v3, %v1577_v17  ;;  %v1482_v46 = vrot.slane %v1459_v51, 1 }
 0x1f2   : > { %v1460_v60 = vmax.f32 %v1430_v53, %v1432_v22  ;;  %v1339_v25 = vadd.f32 %v7663_v24, %v9767_v49  ;;  %v1330_v16 = vpop.f32.mrb[9].mxu0  ;;  %v1692_v39 = vsel %vm1691_vm12, %v1683_v57, %v1601_v37 }
 0x1f3   : > { %v1331_v42 = vadd.f32 %v9767_v49, %v1330_v16  ;;  %v7664_v36 = vpop.f32.mrb[10].mxu0  ;;  %v1701_v56 = vsel %vm1700_vm13, %v1692_v39, %v1617_v34  ;;  %v1498_v27 = vmax.f32 %v1459_v51, %v1482_v46 }
 0x1f4   : > { %v1514_v63 = vrot.slane %v1460_v60, 1  ;;  %v1435_v18 = vmax.f32 %v1339_v25, 0.0  ;;  %v1342_v50 = vadd.f32 %v7664_v36, %v9767_v49  ;;  %v1333_v44 = vpop.f32.mrb[11].mxu0  ;;  %v1710_v28 = vsel %vm1709_vm14, %v1701_v56, %v1633_v43 }
 0x1f5   : > { %v1433_v10 = vmax.f32 %v1331_v42, 0.0  ;;  %v1334_v23 = vadd.f32 %v9767_v49, %v1333_v44  ;;  %v1546_v52 = vrot.slane %v1498_v27, 1  ;;  %v1562_v41 = vrot.slane %v1498_v27, 2 }
 0x1f6   : > { %v1530_v0 = vmax.f32 %v1460_v60, %v1514_v63  ;;  %v1436_v30 = vmax.f32 %v1342_v50, 0.0  ;;  %v9788_v21 = vsel %vm1718_vm15, %v1710_v28, %v1649_v33  ;;  %v1578_v20 = vrot.slane %v1498_v27, 3 }
 0x1f7   : > { %v1461_v29 = vmax.f32 %v1433_v10, %v1435_v18  ;;  %v1434_v58 = vmax.f32 %v1334_v23, 0.0  ;;  %v1667_v48 = vsel %vm1665_vm10, %v1498_v27, %v1546_v52  ;;  %v1769_v59 = vpack.c.bf16 %v9788_v21, %v9788_v21 }
 0x1f8   : > { %v1602_v32 = vrot.slane %v1530_v0, 4  ;;  %v1675_v61 = vsel %vm1260_vm5, %v1667_v48, %v1562_v41  ;;  %v1618_v11 = vrot.slane %v1530_v0, 5  ;;  %v1727_v22 = vrot.slane %v9788_v21, 7 }
 0x1f9   : > { %v1483_v15 = vrot.slane %v1461_v29, 1  ;;  %v1462_v55 = vmax.f32 %v1434_v58, %v1436_v30  ;;  %v7667_v47 = vpop.f32.mrb[12].mxu0  ;;  %v1684_v45 = vsel %vm1682_vm11, %v1675_v61, %v1578_v20  ;;  %v6596_v5 = vcombine.low %v8635_v2, %v1769_v59 }
 0x1fa   : > { %v1355_v6 = vadd.f32 %v7667_v47, %v9767_v49  ;;  %v1346_v19 = vpop.f32.mrb[13].mxu0  ;;  %v1693_v12 = vsel %vm1691_vm12, %v1684_v45, %v1602_v32  ;;  %v1634_v3 = vrot.slane %v1530_v0, 6  ;;  %v1650_v60 = vrot.slane %v1530_v0, 7 }
 0x1fb   : > { %v1499_v14 = vmax.f32 %v1461_v29, %v1483_v15  ;;  %v1515_v26 = vrot.slane %v1462_v55, 1  ;;  %v1347_v38 = vadd.f32 %v9767_v49, %v1346_v19  ;;  %v7668_v54 = vpop.f32.mrb[14].mxu0  ;;  %7701 = vmatprep.mubr.bf16.mxu1 %v6596_v5  ;;  %v1702_v37 = vsel %vm1700_vm13, %v1693_v12, %v1618_v11 }
 0x1fc   : > { %v1439_v35 = vmax.f32 %v1355_v6, 0.0  ;;  %v1358_v7 = vadd.f32 %v7668_v54, %v9767_v49  ;;  %v1349_v8 = vpop.f32.mrb[15].mxu0  ;;  %v1711_v42 = vsel %vm1709_vm14, %v1702_v37, %v1634_v3  ;;  %v9811_v36 = vsel %vm611_vm3, %v1727_v22, 0.0 }
 0x1fd   : > { %v1547_v40 = vrot.slane %v1499_v14, 1  ;;  %v1563_v4 = vrot.slane %v1499_v14, 2  ;;  %v1531_v31 = vmax.f32 %v1462_v55, %v1515_v26  ;;  %v1437_v9 = vmax.f32 %v1347_v38, 0.0 }
 0x1fe   : > { %v1440_v17 = vmax.f32 %v1358_v7, 0.0  ;;  %v1350_v62 = vadd.f32 %v9767_v49, %v1349_v8  ;;  %v1579_v51 = vrot.slane %v1499_v14, 3  ;;  %v9818_v33 = vsel %vm1718_vm15, %v1711_v42, %v1650_v60 }
 0x1ff   : > { %v1668_v53 = vsel %vm1665_vm10, %v1499_v14, %v1547_v40  ;;  %v1603_v34 = vrot.slane %v1531_v31, 4  ;;  %v1463_v57 = vmax.f32 %v1437_v9, %v1439_v35  ;;  %v1619_v25 = vrot.slane %v1531_v31, 5 }
 0x200   : > { %v1676_v24 = vsel %vm1260_vm5, %v1668_v53, %v1563_v4  ;;  %v1438_v46 = vmax.f32 %v1350_v62, 0.0  ;;  %v1635_v50 = vrot.slane %v1531_v31, 6  ;;  %v1651_v20 = vrot.slane %v1531_v31, 7  ;;  %v8439_v31 = vld [vmem:[%s11324_s3 + $0x8] sm:$0xff]  }
 0x201   : > { %v7671_v16 = vpop.f32.mrb[16].mxu0  ;;  %v1685_v39 = vsel %vm1682_vm11, %v1676_v24, %v1579_v51  ;;  %v1484_v43 = vrot.slane %v1463_v57, 1  ;;  %v1761_v15 = vpack.c.bf16 %v9811_v36, %v9811_v36  ;;  %v1728_v26 = vrot.slane %v9818_v33, 7 }
 0x202   : > { %v1464_v56 = vmax.f32 %v1438_v46, %v1440_v17  ;;  %v1371_v27 = vadd.f32 %v7671_v16, %v9767_v49  ;;  %v1362_v63 = vpop.f32.mrb[17].mxu0  ;;  %v1694_v18 = vsel %vm1691_vm12, %v1685_v39, %v1603_v34  ;;  %v1744_v7 = vrot.slane %v9818_v33, 1 }
 0x203   : > { %v1363_v44 = vadd.f32 %v9767_v49, %v1362_v63  ;;  %v7672_v10 = vpop.f32.mrb[18].mxu0  ;;  %v1703_v23 = vsel %vm1700_vm13, %v1694_v18, %v1619_v25  ;;  %v1500_v28 = vmax.f32 %v1463_v57, %v1484_v43 }
 0x204   : > { %v1516_v52 = vrot.slane %v1464_v56, 1  ;;  %v1443_v41 = vmax.f32 %v1371_v27, 0.0  ;;  %v1374_v0 = vadd.f32 %v7672_v10, %v9767_v49  ;;  %v1365_v29 = vpop.f32.mrb[19].mxu0  ;;  %v1712_v48 = vsel %vm1709_vm14, %v1703_v23, %v1635_v50 }
 0x205   : > { %v1441_v30 = vmax.f32 %v1363_v44, 0.0  ;;  %v1366_v58 = vadd.f32 %v9767_v49, %v1365_v29  ;;  %v1548_v32 = vrot.slane %v1500_v28, 1  ;;  %v1564_v61 = vrot.slane %v1500_v28, 2 }
 0x206   : > { %v1444_v47 = vmax.f32 %v1374_v0, 0.0  ;;  %v9826_v6 = vsel %vm1718_vm15, %v1712_v48, %v1651_v20  ;;  %v1580_v19 = vrot.slane %v1500_v28, 3  ;;  %v9829_v14 = vmax.f32 %v1464_v56, %v1516_v52  ;;  %v8440_v56 = vld [vmem:[%s11324_s3 + $0x10] sm:$0xff]  }
 0x207   : > { %v1465_v55 = vmax.f32 %v1441_v30, %v1443_v41  ;;  %v1442_v59 = vmax.f32 %v1366_v58, 0.0  ;;  %v1669_v45 = vsel %vm1665_vm10, %v1500_v28, %v1548_v32  ;;  %v1729_v11 = vrot.slane %v9826_v6, 7 }
 0x208   : > { %v1677_v38 = vsel %vm1260_vm5, %v1669_v45, %v1564_v61  ;;  %v1745_v8 = vrot.slane %v9826_v6, 1  ;;  %v9838_v12 = vpack.c.bf16 %v9826_v6, %v9818_v33  ;;  %v1604_v51 = vrot.slane %v9829_v14, 4 }
 0x209   : > { %v1485_v5 = vrot.slane %v1465_v55, 1  ;;  %v1466_v54 = vmax.f32 %v1442_v59, %v1444_v47  ;;  %v7675_v35 = vpop.f32.mrb[20].mxu0  ;;  %v9846_v62 = vpack.c.bf16 %v1729_v11, %v1728_v26  ;;  %v1620_v46 = vrot.slane %v9829_v14, 5 }
 0x20a   : > { %v1387_v40 = vadd.f32 %v7675_v35, %v9767_v49  ;;  %v1378_v4 = vpop.f32.mrb[21].mxu0  ;;  %7702 = vmatmul.mubr.bf16.vlgmr.msra.gmra.mrb[0].mxu1 %v9838_v12  ;;  %v9855_v53 = vpack.c.bf16 %v1745_v8, %v1744_v7  ;;  %v1686_v27 = vsel %vm1682_vm11, %v1677_v38, %v1580_v19  ;;  %v1636_v63 = vrot.slane %v9829_v14, 6 }
 0x20b   : > { %v1501_v9 = vmax.f32 %v1465_v55, %v1485_v5  ;;  %v1517_v17 = vrot.slane %v1466_v54, 1  ;;  %v1379_v37 = vadd.f32 %v9767_v49, %v1378_v4  ;;  %v7676_v3 = vpop.f32.mrb[22].mxu0  ;;  %7710 = vmatpush3.bf16.msra.mxu1 %v9753_v13  ;;  %v1652_v28 = vrot.slane %v9829_v14, 7  ;;  %v8441_v55 = vld [vmem:[%s11324_s3 + $0x18] sm:$0xff]  }
 0x20c   : > { %v1447_v34 = vmax.f32 %v1387_v40, 0.0  ;;  %v1390_v24 = vadd.f32 %v7676_v3, %v9767_v49  ;;  %v1381_v57 = vpop.f32.mrb[23].mxu0  ;;  %7711 = vmatprep.subr.bf16.mxu1 %v8439_v31  ;;  %v1695_v29 = vsel %vm1691_vm12, %v1686_v27, %v1604_v51  ;;  %v9877_v30 = vpack.c.bf16 %v1728_v26, %v1727_v22  ;;  %v8442_v51 = vld [vmem:[%s11324_s3 + $0x20] sm:$0xff]  }
 0x20d   : > { %v1549_v60 = vrot.slane %v1501_v9, 1  ;;  %v1565_v25 = vrot.slane %v1501_v9, 2  ;;  %v9859_v16 = vmax.f32 %v1466_v54, %v1517_v17  ;;  %v1445_v39 = vmax.f32 %v1379_v37, 0.0 }
 0x20e   : > { %v1448_v42 = vmax.f32 %v1390_v24, 0.0  ;;  %v1382_v43 = vadd.f32 %v9767_v49, %v1381_v57  ;;  %v1581_v18 = vrot.slane %v1501_v9, 3  ;;  %v1704_v22 = vsel %vm1700_vm13, %v1695_v29, %v1620_v46 }
 0x20f   : > { %v1670_v50 = vsel %vm1665_vm10, %v1501_v9, %v1549_v60  ;;  %v1605_v44 = vrot.slane %v9859_v16, 4  ;;  %v1467_v10 = vmax.f32 %v1445_v39, %v1447_v34  ;;  %v1621_v52 = vrot.slane %v9859_v16, 5  ;;  %7712 = vmatpush3.bf16.msra.mxu1 %v8439_v31 }
 0x210   : > { %v1678_v13 = vsel %vm1260_vm5, %v1670_v50, %v1565_v25  ;;  %v1446_v23 = vmax.f32 %v1382_v43, 0.0  ;;  %7713 = vmatprep.subr.bf16.mxu1 %v8440_v56  ;;  %v1637_v47 = vrot.slane %v9859_v16, 6  ;;  %v1713_v4 = vsel %vm1709_vm14, %v1704_v22, %v1636_v63  ;;  %v8443_v50 = vld [vmem:[%s11324_s3 + $0x28] sm:$0xff]  }
 0x211   : > { %v1687_v0 = vsel %vm1682_vm11, %v1678_v13, %v1581_v18  ;;  %v1486_v58 = vrot.slane %v1467_v10, 1  ;;  %v1653_v3 = vrot.slane %v9859_v16, 7  ;;  %v9897_v46 = vsel %vm1718_vm15, %v1713_v4, %v1652_v28 }
 0x212   : > { %v7679_v41 = vpop.f32.mrb[24].mxu0  ;;  %v1468_v20 = vmax.f32 %v1446_v23, %v1448_v42  ;;  %v1696_v61 = vsel %vm1691_vm12, %v1687_v0, %v1605_v44  ;;  %v1743_v42 = vrot.slane %v9788_v21, 1  ;;  %v1730_v13 = vrot.slane %v9897_v46, 7 }
 0x213   : > { %v1403_v48 = vadd.f32 %v7679_v41, %v9767_v49  ;;  %v1394_v32 = vpop.f32.mrb[25].mxu0  ;;  %v1705_v45 = vsel %vm1700_vm13, %v1696_v61, %v1621_v52  ;;  %v1502_v14 = vmax.f32 %v1467_v10, %v1486_v58  ;;  %7714 = vmatpush3.bf16.msra.mxu1 %v8440_v56  ;;  %v1746_v58 = vrot.slane %v9897_v46, 1 }
 0x214   : > { %v1395_v59 = vadd.f32 %v9767_v49, %v1394_v32  ;;  %v7680_v19 = vpop.f32.mrb[26].mxu0  ;;  %v1518_v26 = vrot.slane %v1468_v20, 1  ;;  %v1714_v31 = vsel %vm1709_vm14, %v1705_v45, %v1637_v47  ;;  %7715 = vmatprep.subr.bf16.mxu1 %v8441_v55  ;;  %v9920_v29 = vpack.c.bf16 %v1730_v13, %v1729_v11 }
 0x215   : > { %v1451_v38 = vmax.f32 %v1403_v48, 0.0  ;;  %v1406_v5 = vadd.f32 %v7680_v19, %v9767_v49  ;;  %v1397_v54 = vpop.f32.mrb[27].mxu0  ;;  %v1550_v9 = vrot.slane %v1502_v14, 1  ;;  %v1566_v17 = vrot.slane %v1502_v14, 2 }
 0x216   : > { %v1449_v35 = vmax.f32 %v1395_v59, 0.0  ;;  %v1398_v40 = vadd.f32 %v9767_v49, %v1397_v54  ;;  %v1534_v37 = vmax.f32 %v1468_v20, %v1518_v26  ;;  %v1582_v60 = vrot.slane %v1502_v14, 3 }
 0x217   : > { %v1452_v24 = vmax.f32 %v1406_v5, 0.0  ;;  %v1671_v25 = vsel %vm1665_vm10, %v1502_v14, %v1550_v9  ;;  %v9903_v27 = vsel %vm1718_vm15, %v1714_v31, %v1653_v3  ;;  %7716 = vmatpush3.bf16.msra.mxu1 %v8441_v55  ;;  %v8444_v55 = vld [vmem:[%s11324_s3 + $0x30] sm:$0xff]   ;;  %v9932_v11 = vpack.c.bf16 %v1746_v58, %v1745_v8 }
 0x218   : > { %v1469_v34 = vmax.f32 %v1449_v35, %v1451_v38  ;;  %v1450_v57 = vmax.f32 %v1398_v40, 0.0  ;;  %v1606_v39 = vrot.slane %v1534_v37, 4  ;;  %v1679_v43 = vsel %vm1260_vm5, %v1671_v25, %v1566_v17  ;;  %7717 = vmatprep.subr.bf16.mxu1 %v8442_v51  ;;  %v8445_v17 = vld [vmem:[%s11324_s3 + $0x38] sm:$0xff]  }
 0x219   : > { %v1622_v63 = vrot.slane %v1534_v37, 5  ;;  %v9907_v18 = vpack.c.bf16 %v9903_v27, %v9897_v46  ;;  %v1688_v44 = vsel %vm1682_vm11, %v1679_v43, %v1582_v60  ;;  %v1731_v52 = vrot.slane %v9903_v27, 7 }
 0x21a   : > { %v1487_v16 = vrot.slane %v1469_v34, 1  ;;  %v1470_v56 = vmax.f32 %v1450_v57, %v1452_v24  ;;  %v1697_v28 = vsel %vm1691_vm12, %v1688_v44, %v1606_v39  ;;  %v1638_v41 = vrot.slane %v1534_v37, 6 }
 0x21b   : > { %7705 = vmatprep.mubr.bf16.mxu1 %v9907_v18  ;;  %v1706_v0 = vsel %vm1700_vm13, %v1697_v28, %v1622_v63  ;;  %7718 = vmatpush3.bf16.msra.mxu1 %v8442_v51  ;;  %v1654_v61 = vrot.slane %v1534_v37, 7  ;;  %v9927_v59 = vpack.c.bf16 %v1731_v52, %v1730_v13  ;;  %v1747_v19 = vrot.slane %v9903_v27, 1  ;;  %v8447_v63 = vld [vmem:[%s11324_s3 + $0x88] sm:$0xff]  }
 0x21c   : > { %v1503_v10 = vmax.f32 %v1469_v34, %v1487_v16  ;;  %v1519_v23 = vrot.slane %v1470_v56, 1  ;;  %7719 = vmatprep.subr.bf16.mxu1 %v8443_v50  ;;  %v1715_v47 = vsel %vm1709_vm14, %v1706_v0, %v1638_v41  ;;  %v7290_v31 = vpack.c.bf16 %v9818_v33, %v9788_v21  ;;  %v8451_v28 = vld [vmem:[%s11324_s3 + $0xa8] sm:$0xff]   ;;  %v8453_v41 = vld [vmem:[%s11324_s3 + $0xb8] sm:$0xff]   ;;  %v8454_v0 = vld [vmem:[%s11324_s3 + $0xc0] sm:$0xff]  }
 0x21d   : > { %v9937_v54 = vsel %vm1718_vm15, %v1715_v47, %v1654_v61  ;;  %v9939_v35 = vpack.c.bf16 %v1747_v19, %v1746_v58  ;;  %v7291_v37 = vpack.c.bf16 %v9897_v46, %v9826_v6  ;;  %v9958_v51 = vpack.c.bf16 %v1744_v7, %v1743_v42  ;;  %v8446_v7 = vld [vmem:[%s11324_s3 + $0x80] sm:$0xff]   ;;  %v8473_v33 = vld [vmem:[%s11324_s3 + $0x158] sm:$0xff]   ;;  %v8502_v6 = vld [vmem:[%s11326_s5 + $0x30] sm:$0xff]  }
 0x21e   : > { %v1551_v20 = vrot.slane %v1503_v10, 1  ;;  %v1567_v48 = vrot.slane %v1503_v10, 2  ;;  %v1535_v32 = vmax.f32 %v1470_v56, %v1519_v23  ;;  %v1583_v22 = vrot.slane %v1503_v10, 3  ;;  %v8450_v23 = vld [vmem:[%s11324_s3 + $0xa0] sm:$0xff]   ;;  %v8503_v46 = vld [vmem:[%s11326_s5 + $0x38] sm:$0xff]   ;;  %7901 = vmatprep.subr.bf16.mxu0 %v8502_v6  ;;  %v8491_v56 = vld [vmem:[%s11324_s3 + $0x1e8] sm:$0xff]  }
 0x21f   : > { %7720 = vmatpush3.bf16.msra.mxu1 %v8443_v50  ;;  %v1732_v4 = vrot.slane %v9937_v54, 7  ;;  %v1748_v8 = vrot.slane %v9937_v54, 1  ;;  %v7292_v3 = vpack.c.bf16 %v9937_v54, %v9903_v27  ;;  %v6608_v16 = vcombine.low %v8635_v2, %v1761_v15  ;;  %v8448_v15 = vld [vmem:[%s11324_s3 + $0x90] sm:$0xff]   ;;  %v8458_v47 = vld [vmem:[%s11324_s3 + $0xe0] sm:$0xff]   ;;  %7902 = vmatpush3.bf16.msra.mxu0 %v8502_v6 }
 0x220   : > { %v1672_v45 = vsel %vm1665_vm10, %v1503_v10, %v1551_v20  ;;  %v1607_v14 = vrot.slane %v1535_v32, 4  ;;  %v1623_v26 = vrot.slane %v1535_v32, 5  ;;  %v1639_v5 = vrot.slane %v1535_v32, 6  ;;  %7721 = vmatprep.subr.bf16.mxu1 %v8444_v55  ;;  %v8455_v20 = vld [vmem:[%s11324_s3 + $0xc8] sm:$0xff]   ;;  %v8474_v27 = vld [vmem:[%s11324_s3 + $0x160] sm:$0xff]   ;;  %7903 = vmatprep.subr.bf16.mxu0 %v8503_v46 }
 0x221   : > { %v1680_v38 = vsel %vm1260_vm5, %v1672_v45, %v1567_v48  ;;  %v1655_v34 = vrot.slane %v1535_v32, 7  ;;  %v9961_v57 = vpack.c.bf16 %v1732_v4, %v1731_v52  ;;  %v9965_v60 = vpack.c.bf16 %v1748_v8, %v1747_v19  ;;  %v8452_v52 = vld [vmem:[%s11324_s3 + $0xb0] sm:$0xff]   ;;  %v8459_v19 = vld [vmem:[%s11324_s3 + $0xe8] sm:$0xff]   ;;  %v8462_v45 = vld [vmem:[%s11324_s3 + $0x100] sm:$0xff]  }
 0x222   : > { %v1689_v40 = vsel %vm1682_vm11, %v1680_v38, %v1583_v22  ;;  %v1752_v36 = vsel %vm746_vm0, %v1743_v42, 0.0  ;;  %v8449_v42 = vld [vmem:[%s11324_s3 + $0x98] sm:$0xff]   ;;  %v8456_v32 = vld [vmem:[%s11324_s3 + $0xd0] sm:$0xff]  }
 0x223   : > { %v1698_v9 = vsel %vm1691_vm12, %v1689_v40, %v1607_v14  ;;  %7722 = vmatpush3.bf16.msra.mxu1 %v8444_v55  ;;  %v1778_v44 = vpack.c.bf16 %v1752_v36, %v1752_v36  ;;  %v8457_v55 = vld [vmem:[%s11324_s3 + $0xd8] sm:$0xff]   ;;  %v8460_v22 = vld [vmem:[%s11324_s3 + $0xf0] sm:$0xff]   ;;  %v8463_v14 = vld [vmem:[%s11324_s3 + $0x108] sm:$0xff]   ;;  %7904 = vmatpush3.bf16.msra.mxu0 %v8503_v46 }
 0x224   : > { %v1707_v24 = vsel %vm1700_vm13, %v1698_v9, %v1623_v26  ;;  %7723 = vmatprep.subr.bf16.mxu1 %v8445_v17  ;;  %v8464_v26 = vld [vmem:[%s11324_s3 + $0x110] sm:$0xff]   ;;  %v8465_v38 = vld [vmem:[%s11324_s3 + $0x118] sm:$0xff]  }
 0x225   : > { %v1716_v25 = vsel %vm1709_vm14, %v1707_v24, %v1639_v5  ;;  %v6636_v10 = vcombine.low %v8635_v2, %v1778_v44  ;;  %v8467_v5 = vld [vmem:[%s11324_s3 + $0x128] sm:$0xff]   ;;  %v8468_v40 = vld [vmem:[%s11324_s3 + $0x130] sm:$0xff]  }
 0x226   : > { %v9969_v39 = vsel %vm1718_vm15, %v1716_v25, %v1655_v34 }
 0x227   : > { %v9973_v43 = vpack.c.bf16 %v9969_v39, %v9937_v54  ;;  %7724 = vmatpush3.bf16.msra.mxu1 %v8445_v17  ;;  %v1733_v50 = vrot.slane %v9969_v39, 7  ;;  %v1749_v48 = vrot.slane %v9969_v39, 1  ;;  %v8504_v54 = vld [vmem:[%s11326_s5 + $0x40] sm:$0xff]  }
 0x228   : > { %7733 = vmatprep.subr.bf16.mxu1 %v8446_v7  ;;  %7905 = vmatprep.subr.bf16.mxu0 %v8504_v54 }
 0x229   : > { %7706 = vmatmul.mubr.bf16.gmra.mrb[4].mxu1 %v9973_v43  ;;  %v10009_v13 = vpack.c.bf16 %v1733_v50, %v1732_v4  ;;  %v10057_v61 = vpack.c.bf16 %v1749_v48, %v1748_v8  ;;  %v8469_v4 = vld [vmem:[%s11324_s3 + $0x138] sm:$0xff]   ;;  %v8470_v8 = vld [vmem:[%s11324_s3 + $0x140] sm:$0xff]   ;;  %7906 = vmatpush3.bf16.msra.mxu0 %v8504_v54 }
 0x22a   : > { %7725 = vmatprep.mubr.bf16.mxu1 %v6608_v16 }
 0x231   : > { %7726 = vmatmul.mubr.msk.bf16.vlgmr.msra.gmra.mrb[0].mxu1 %vm9986_vm1, %v9846_v62 }
 0x232   : > { %7734 = vmatpush3.bf16.msra.mxu1 %v8446_v7  ;;  %7729 = vmatprep.mubr.msk.bf16.mxu1 %vm9986_vm1, %v9927_v59 }
 0x233   : > { %7735 = vmatprep.subr.bf16.mxu1 %v8447_v63 }
 0x236   : > { %7736 = vmatpush3.bf16.msra.mxu1 %v8447_v63 }
 0x237   : > { %7737 = vmatprep.subr.bf16.mxu1 %v8448_v15 }
 0x239   : > { %7730 = vmatmul.mubr.msk.bf16.gmra.mrb[4].mxu1 %vm9986_vm1, %v10009_v13 }
 0x23a   : > { %7738 = vmatpush3.bf16.msra.mxu1 %v8448_v15  ;;  %7749 = vmatprep.mubr.bf16.mxu1 %v6636_v10 }
 0x23b   : > { %7739 = vmatprep.subr.bf16.mxu1 %v8449_v42 }
 0x23e   : > { %7740 = vmatpush3.bf16.msra.mxu1 %v8449_v42 }
 0x23f   : > { %7741 = vmatprep.subr.bf16.mxu1 %v8450_v23 }
 0x242   : > { %7742 = vmatpush3.bf16.msra.mxu1 %v8450_v23 }
 0x243   : > { %7743 = vmatprep.subr.bf16.mxu1 %v8451_v28 }
 0x246   : > { %7744 = vmatpush3.bf16.msra.mxu1 %v8451_v28 }
 0x247   : > { %7745 = vmatprep.subr.bf16.mxu1 %v8452_v52 }
 0x24a   : > { %7746 = vmatpush3.bf16.msra.mxu1 %v8452_v52 }
 0x24b   : > { %7747 = vmatprep.subr.bf16.mxu1 %v8453_v41 }
 0x24e   : > { %7748 = vmatpush3.bf16.msra.mxu1 %v8453_v41 }
 0x24f   : > { %7757 = vmatprep.subr.bf16.mxu1 %v8454_v0 }
 0x251   : > { %7750 = vmatmul.mubr.msk.bf16.vlgmr.msra.gmra.mrb[0].mxu1 %vm10036_vm2, %v9855_v53 }
 0x252   : > { %7753 = vmatprep.mubr.msk.bf16.mxu1 %vm10036_vm2, %v9939_v35  ;;  %7758 = vmatpush3.bf16.msra.mxu1 %v8454_v0 }
 0x253   : > { %7759 = vmatprep.subr.bf16.mxu1 %v8455_v20 }
 0x256   : > { %7760 = vmatpush3.bf16.msra.mxu1 %v8455_v20 }
 0x257   : > { %7761 = vmatprep.subr.bf16.mxu1 %v8456_v32 }
 0x259   : > { %7754 = vmatmul.mubr.msk.bf16.gmra.mrb[4].mxu1 %vm10036_vm2, %v10057_v61 }
 0x25a   : > { %7762 = vmatpush3.bf16.msra.mxu1 %v8456_v32  ;;  %7773 = vmatprep.mubr.msk.bf16.mxu1 %vm9986_vm1, %v9877_v30  ;;  %v8461_v30 = vld [vmem:[%s11324_s3 + $0xf8] sm:$0xff]  }
 0x25b   : > { %7763 = vmatprep.subr.bf16.mxu1 %v8457_v55 }
 0x25e   : > { %7764 = vmatpush3.bf16.msra.mxu1 %v8457_v55 }
 0x25f   : > { %7765 = vmatprep.subr.bf16.mxu1 %v8458_v47 }
 0x262   : > { %7766 = vmatpush3.bf16.msra.mxu1 %v8458_v47 }
 0x263   : > { %7767 = vmatprep.subr.bf16.mxu1 %v8459_v19 }
 0x266   : > { %7768 = vmatpush3.bf16.msra.mxu1 %v8459_v19 }
 0x267   : > { %7769 = vmatprep.subr.bf16.mxu1 %v8460_v22 }
 0x26a   : > { %7770 = vmatpush3.bf16.msra.mxu1 %v8460_v22 }
 0x26b   : > { %7771 = vmatprep.subr.bf16.mxu1 %v8461_v30 }
 0x26e   : > { %7772 = vmatpush3.bf16.msra.mxu1 %v8461_v30 }
 0x26f   : > { %7781 = vmatprep.subr.bf16.mxu1 %v8462_v45 }
 0x271   : > { %7774 = vmatmul.mubr.msk.bf16.vlgmr.msra.gmra.mrb[0].mxu1 %vm9986_vm1, %v9920_v29  ;;  %v8466_v29 = vld [vmem:[%s11324_s3 + $0x120] sm:$0xff]  }
 0x272   : > { %7777 = vmatprep.mubr.msk.bf16.mxu1 %vm9986_vm1, %v9961_v57  ;;  %7782 = vmatpush3.bf16.msra.mxu1 %v8462_v45 }
 0x273   : > { %7783 = vmatprep.subr.bf16.mxu1 %v8463_v14 }
 0x276   : > { %7784 = vmatpush3.bf16.msra.mxu1 %v8463_v14 }
 0x277   : > { %7785 = vmatprep.subr.bf16.mxu1 %v8464_v26 }
 0x27a   : > { %7786 = vmatpush3.bf16.msra.mxu1 %v8464_v26 }
 0x27b   : > { %7787 = vmatprep.subr.bf16.mxu1 %v8465_v38 }
 0x27e   : > { %7788 = vmatpush3.bf16.msra.mxu1 %v8465_v38 }
 0x27f   : > { %7789 = vmatprep.subr.bf16.mxu1 %v8466_v29 }
 0x282   : > { %7790 = vmatpush3.bf16.msra.mxu1 %v8466_v29 }
 0x283   : > { %7791 = vmatprep.subr.bf16.mxu1 %v8467_v5 }
 0x286   : > { %7792 = vmatpush3.bf16.msra.mxu1 %v8467_v5 }
 0x287   : > { %7793 = vmatprep.subr.bf16.mxu1 %v8468_v40 }
 0x28a   : > { %7794 = vmatpush3.bf16.msra.mxu1 %v8468_v40 }
 0x28b   : > { %7795 = vmatprep.subr.bf16.mxu1 %v8469_v4 }
 0x28e   : > { %v7683_v9 = vpop.f32.mrb[28].mxu0  ;;  %7796 = vmatpush3.bf16.msra.mxu1 %v8469_v4  ;;  %v8471_v4 = vld [vmem:[%s11324_s3 + $0x148] sm:$0xff]  }
 0x28f   : > { %v1419_v17 = vadd.f32 %v7683_v9, %v9767_v49  ;;  %v1410_v34 = vpop.f32.mrb[29].mxu0  ;;  %7805 = vmatprep.subr.bf16.mxu1 %v8470_v8  ;;  %v8478_v9 = vld [vmem:[%s11324_s3 + $0x180] sm:$0xff]  }
 0x290   : > { %v1411_v24 = vadd.f32 %v9767_v49, %v1410_v34  ;;  %v7684_v57 = vpop.f32.mrb[30].mxu0 }
 0x291   : > { %v1455_v25 = vmax.f32 %v1419_v17, 0.0  ;;  %v1422_v7 = vadd.f32 %v7684_v57, %v9767_v49  ;;  %v1413_v16 = vpop.f32.mrb[31].mxu0  ;;  %v8479_v17 = vld [vmem:[%s11324_s3 + $0x188] sm:$0xff]  }
 0x292   : > { %v1453_v63 = vmax.f32 %v1411_v24, 0.0  ;;  %v1414_v36 = vadd.f32 %v9767_v49, %v1413_v16  ;;  %v8480_v24 = vld [vmem:[%s11324_s3 + $0x190] sm:$0xff]  }
 0x293   : > { %v1456_v15 = vmax.f32 %v1422_v7, 0.0  ;;  %v8487_v7 = vld [vmem:[%s11324_s3 + $0x1c8] sm:$0xff]  }
 0x294   : > { %v1471_v44 = vmax.f32 %v1453_v63, %v1455_v25  ;;  %v1454_v42 = vmax.f32 %v1414_v36, 0.0  ;;  %v8486_v25 = vld [vmem:[%s11324_s3 + $0x1c0] sm:$0xff]   ;;  %v8488_v36 = vld [vmem:[%s11324_s3 + $0x1d0] sm:$0xff]  }
 0x296   : > { %v1488_v10 = vrot.slane %v1471_v44, 1  ;;  %v1472_v23 = vmax.f32 %v1454_v42, %v1456_v15  ;;  %v8494_v42 = vld [vmem:[%s11324_s3 + $0x200] sm:$0xff]  }
 0x298   : > { %v1504_v28 = vmax.f32 %v1471_v44, %v1488_v10  ;;  %v1520_v52 = vrot.slane %v1472_v23, 1  ;;  %v8489_v44 = vld [vmem:[%s11324_s3 + $0x1d8] sm:$0xff]   ;;  %v8495_v10 = vld [vmem:[%s11324_s3 + $0x208] sm:$0xff]  }
 0x29a   : > { %v1552_v41 = vrot.slane %v1504_v28, 1  ;;  %v1568_v0 = vrot.slane %v1504_v28, 2  ;;  %v1536_v20 = vmax.f32 %v1472_v23, %v1520_v52  ;;  %v1584_v32 = vrot.slane %v1504_v28, 3 }
 0x29c   : > { %v1673_v55 = vsel %vm1665_vm10, %v1504_v28, %v1552_v41  ;;  %v1608_v47 = vrot.slane %v1536_v20, 4  ;;  %v1624_v30 = vrot.slane %v1536_v20, 5  ;;  %v1640_v49 = vrot.slane %v1536_v20, 6  ;;  %v8496_v28 = vld [vmem:[%s11324_s3 + $0x210] sm:$0xff]   ;;  %v8497_v41 = vld [vmem:[%s11324_s3 + $0x218] sm:$0xff]  }
 0x29d   : > { %v1681_v19 = vsel %vm1260_vm5, %v1673_v55, %v1568_v0  ;;  %v1656_v14 = vrot.slane %v1536_v20, 7  ;;  %v8500_v0 = vld [vmem:[%s11324_s3 + $0x230] sm:$0xff]  }
 0x29e   : > { %v1690_v22 = vsel %vm1682_vm11, %v1681_v19, %v1584_v32  ;;  %v8508_v19 = vld [vmem:[%s11326_s5] sm:$0xff]  }
 0x29f   : > { %v1699_v45 = vsel %vm1691_vm12, %v1690_v22, %v1608_v47  ;;  %v8507_v47 = vld [vmem:[%s11326_s5 + $0x58] sm:$0xff]  }
 0x2a0   : > { %v1708_v26 = vsel %vm1700_vm13, %v1699_v45, %v1624_v30 }
 0x2a1   : > { %v1717_v38 = vsel %vm1709_vm14, %v1708_v26, %v1640_v49 }
 0x2a2   : > { %v10124_v29 = vsel %vm1718_vm15, %v1717_v38, %v1656_v14 }
 0x2a3   : > { %v1734_v5 = vrot.slane %v10124_v29, 7  ;;  %v7293_v21 = vpack.c.bf16 %v10124_v29, %v9969_v39  ;;  %v1750_v34 = vrot.slane %v10124_v29, 1  ;;  %v8483_v39 = vld [vmem:[%s11324_s3 + $0x1a8] sm:$0xff]   ;;  %v1776_v23 = vpack.c.bf16 %v10124_v29, %v10124_v29 }
 0x2a5   : > { %v7288_v40 = vpack.c.bf16 %v1734_v5, %v1733_v50  ;;  %v8472_v50 = vld [vmem:[%s11324_s3 + $0x150] sm:$0xff]   ;;  %v7308_v57 = vpack.c.bf16 %v1750_v34, %v1749_v48  ;;  %v1742_v16 = vsel %vm611_vm3, %v1734_v5, 0.0  ;;  %v6773_v52 = vcombine.low %v1776_v23, %v8635_v2 }
 0x2a6   : > { %v8484_v48 = vld [vmem:[%s11324_s3 + $0x1b0] sm:$0xff]   ;;  %v1768_v63 = vpack.c.bf16 %v1742_v16, %v1742_v16  ;;  %v1759_v20 = vsel %vm746_vm0, %v1750_v34, 0.0 }
 0x2a7   : > { %7778 = vmatmul.mubr.msk.bf16.gmra.mrb[4].mxu1 %vm9986_vm1, %v7288_v40  ;;  %v1785_v32 = vpack.c.bf16 %v1759_v20, %v1759_v20 }
 0x2a8   : > { %7797 = vmatprep.mubr.bf16.mxu1 %v7290_v31  ;;  %v8475_v31 = vld [vmem:[%s11324_s3 + $0x168] sm:$0xff]   ;;  %v6748_v15 = vcombine.low %v1768_v63, %v8635_v2 }
 0x2a9   : > { %v6798_v55 = vcombine.low %v1785_v32, %v8635_v2 }
 0x2af   : > { %7798 = vmatmul.mubr.bf16.vlgmr.msra.gmra.mrb[0].mxu1 %v7291_v37  ;;  %v8505_v37 = vld [vmem:[%s11326_s5 + $0x48] sm:$0xff]  }
 0x2b0   : > { %7806 = vmatpush3.bf16.msra.mxu1 %v8470_v8  ;;  %7801 = vmatprep.mubr.bf16.mxu1 %v7292_v3  ;;  %v8476_v3 = vld [vmem:[%s11324_s3 + $0x170] sm:$0xff]   ;;  %v8477_v8 = vld [vmem:[%s11324_s3 + $0x178] sm:$0xff]  }
 0x2b1   : > { %7807 = vmatprep.subr.bf16.mxu1 %v8471_v4  ;;  %7907 = vmatprep.subr.bf16.mxu0 %v8505_v37 }
 0x2b2   : > { %7908 = vmatpush3.bf16.msra.mxu0 %v8505_v37 }
 0x2b4   : > { %7808 = vmatpush3.bf16.msra.mxu1 %v8471_v4 }
 0x2b5   : > { %7809 = vmatprep.subr.bf16.mxu1 %v8472_v50 }
 0x2b7   : > { %7802 = vmatmul.mubr.bf16.gmra.mrb[4].mxu1 %v7293_v21 }
 0x2b8   : > { %7810 = vmatpush3.bf16.msra.mxu1 %v8472_v50  ;;  %7821 = vmatprep.mubr.msk.bf16.mxu1 %vm10036_vm2, %v9958_v51  ;;  %v8506_v51 = vld [vmem:[%s11326_s5 + $0x50] sm:$0xff]  }
 0x2b9   : > { %7811 = vmatprep.subr.bf16.mxu1 %v8473_v33  ;;  %7909 = vmatprep.subr.bf16.mxu0 %v8506_v51 }
 0x2ba   : > { %7910 = vmatpush3.bf16.msra.mxu0 %v8506_v51 }
 0x2bb   : > { %7911 = vmatprep.subr.bf16.mxu0 %v8507_v47 }
 0x2bc   : > { %7812 = vmatpush3.bf16.msra.mxu1 %v8473_v33 }
 0x2bd   : > { %7813 = vmatprep.subr.bf16.mxu1 %v8474_v27 }
 0x2be   : > { %7912 = vmatpush3.bf16.msra.mxu0 %v8507_v47 }
 0x2bf   : > { %7921 = vmatprep.subr.bf16.mxu0 %v8508_v19 }
 0x2c0   : > { %7814 = vmatpush3.bf16.msra.mxu1 %v8474_v27 }
 0x2c1   : > { %7815 = vmatprep.subr.bf16.mxu1 %v8475_v31 }
 0x2c4   : > { %7816 = vmatpush3.bf16.msra.mxu1 %v8475_v31 }
 0x2c5   : > { %7817 = vmatprep.subr.bf16.mxu1 %v8476_v3 }
 0x2c8   : > { %7818 = vmatpush3.bf16.msra.mxu1 %v8476_v3 }
 0x2c9   : > { %7819 = vmatprep.subr.bf16.mxu1 %v8477_v8 }
 0x2cc   : > { %7820 = vmatpush3.bf16.msra.mxu1 %v8477_v8 }
 0x2cd   : > { %7829 = vmatprep.subr.bf16.mxu1 %v8478_v9 }
 0x2cf   : > { %7822 = vmatmul.mubr.msk.bf16.vlgmr.msra.gmra.mrb[0].mxu1 %vm10036_vm2, %v9932_v11  ;;  %v8481_v11 = vld [vmem:[%s11324_s3 + $0x198] sm:$0xff]  }
 0x2d0   : > { %7825 = vmatprep.mubr.msk.bf16.mxu1 %vm10036_vm2, %v9965_v60  ;;  %7830 = vmatpush3.bf16.msra.mxu1 %v8478_v9  ;;  %v8482_v60 = vld [vmem:[%s11324_s3 + $0x1a0] sm:$0xff]  }
 0x2d1   : > { %7831 = vmatprep.subr.bf16.mxu1 %v8479_v17 }
 0x2d4   : > { %7832 = vmatpush3.bf16.msra.mxu1 %v8479_v17 }
 0x2d5   : > { %7833 = vmatprep.subr.bf16.mxu1 %v8480_v24 }
 0x2d7   : > { %7826 = vmatmul.mubr.msk.bf16.gmra.mrb[4].mxu1 %vm10036_vm2, %v7308_v57 }
 0x2d8   : > { %7834 = vmatpush3.bf16.msra.mxu1 %v8480_v24  ;;  %7845 = vmatprep.mubr.msk.bf16.mxu1 %vm9986_vm1, %v9846_v62  ;;  %v8485_v62 = vld [vmem:[%s11324_s3 + $0x1b8] sm:$0xff]  }
 0x2d9   : > { %7835 = vmatprep.subr.bf16.mxu1 %v8481_v11 }
 0x2dc   : > { %7836 = vmatpush3.bf16.msra.mxu1 %v8481_v11 }
 0x2dd   : > { %7837 = vmatprep.subr.bf16.mxu1 %v8482_v60 }
 0x2e0   : > { %7838 = vmatpush3.bf16.msra.mxu1 %v8482_v60 }
 0x2e1   : > { %7839 = vmatprep.subr.bf16.mxu1 %v8483_v39 }
 0x2e4   : > { %7840 = vmatpush3.bf16.msra.mxu1 %v8483_v39 }
 0x2e5   : > { %7841 = vmatprep.subr.bf16.mxu1 %v8484_v48 }
 0x2e8   : > { %7842 = vmatpush3.bf16.msra.mxu1 %v8484_v48  ;;  %v8509_v48 = vld [vmem:[%s11326_s5 + $0x8] sm:$0xff]  }
 0x2e9   : > { %7843 = vmatprep.subr.bf16.mxu1 %v8485_v62 }
 0x2ec   : > { %7844 = vmatpush3.bf16.msra.mxu1 %v8485_v62 }
 0x2ed   : > { %7853 = vmatprep.subr.bf16.mxu1 %v8486_v25 }
 0x2ef   : > { %7846 = vmatmul.mubr.msk.bf16.vlgmr.msra.gmra.mrb[0].mxu1 %vm9986_vm1, %v9927_v59  ;;  %v8490_v59 = vld [vmem:[%s11324_s3 + $0x1e0] sm:$0xff]  }
 0x2f0   : > { %7849 = vmatprep.mubr.msk.bf16.mxu1 %vm9986_vm1, %v10009_v13  ;;  %7854 = vmatpush3.bf16.msra.mxu1 %v8486_v25  ;;  %v8492_v13 = vld [vmem:[%s11324_s3 + $0x1f0] sm:$0xff]  }
 0x2f1   : > { %7855 = vmatprep.subr.bf16.mxu1 %v8487_v7 }
 0x2f4   : > { %7856 = vmatpush3.bf16.msra.mxu1 %v8487_v7 }
 0x2f5   : > { %7857 = vmatprep.subr.bf16.mxu1 %v8488_v36 }
 0x2f7   : > { %7850 = vmatmul.mubr.bf16.gmra.mrb[4].mxu1 %v6748_v15 }
 0x2f8   : > { %7858 = vmatpush3.bf16.msra.mxu1 %v8488_v36  ;;  %7869 = vmatprep.mubr.bf16.mxu1 %v9838_v12  ;;  %v8493_v12 = vld [vmem:[%s11324_s3 + $0x1f8] sm:$0xff]  }
 0x2f9   : > { %7859 = vmatprep.subr.bf16.mxu1 %v8489_v44 }
 0x2fc   : > { %7860 = vmatpush3.bf16.msra.mxu1 %v8489_v44 }
 0x2fd   : > { %7861 = vmatprep.subr.bf16.mxu1 %v8490_v59 }
 0x300   : > { %7862 = vmatpush3.bf16.msra.mxu1 %v8490_v59 }
 0x301   : > { %7863 = vmatprep.subr.bf16.mxu1 %v8491_v56 }
 0x304   : > { %7864 = vmatpush3.bf16.msra.mxu1 %v8491_v56 }
 0x305   : > { %7865 = vmatprep.subr.bf16.mxu1 %v8492_v13 }
 0x308   : > { %7866 = vmatpush3.bf16.msra.mxu1 %v8492_v13 }
 0x309   : > { %7867 = vmatprep.subr.bf16.mxu1 %v8493_v12 }
 0x30c   : > { %7868 = vmatpush3.bf16.msra.mxu1 %v8493_v12 }
 0x30d   : > { %7877 = vmatprep.subr.bf16.mxu1 %v8494_v42 }
 0x30f   : > { %7870 = vmatmul.mubr.bf16.vlgmr.msra.gmra.mrb[0].mxu1 %v9907_v18  ;;  %v8498_v18 = vld [vmem:[%s11324_s3 + $0x220] sm:$0xff]  }
 0x310   : > { %7873 = vmatprep.mubr.bf16.mxu1 %v9973_v43  ;;  %7878 = vmatpush3.bf16.msra.mxu1 %v8494_v42  ;;  %v8499_v43 = vld [vmem:[%s11324_s3 + $0x228] sm:$0xff]  }
 0x311   : > { %7879 = vmatprep.subr.bf16.mxu1 %v8495_v10 }
 0x314   : > { %7880 = vmatpush3.bf16.msra.mxu1 %v8495_v10 }
 0x315   : > { %7881 = vmatprep.subr.bf16.mxu1 %v8496_v28 }
 0x317   : > { %7874 = vmatmul.mubr.bf16.gmra.mrb[4].mxu1 %v6773_v52 }
 0x318   : > { %7882 = vmatpush3.bf16.msra.mxu1 %v8496_v28  ;;  %7893 = vmatprep.mubr.msk.bf16.mxu1 %vm10036_vm2, %v9855_v53  ;;  %v8501_v53 = vld [vmem:[%s11324_s3 + $0x238] sm:$0xff]  }
 0x319   : > { %7883 = vmatprep.subr.bf16.mxu1 %v8497_v41 }
 0x31c   : > { %7884 = vmatpush3.bf16.msra.mxu1 %v8497_v41  ;;  %v8510_v41 = vld [vmem:[%s11326_s5 + $0x10] sm:$0xff]  }
 0x31d   : > { %7885 = vmatprep.subr.bf16.mxu1 %v8498_v18 }
 0x320   : > { %7886 = vmatpush3.bf16.msra.mxu1 %v8498_v18 }
 0x321   : > { %7887 = vmatprep.subr.bf16.mxu1 %v8499_v43 }
 0x324   : > { %7888 = vmatpush3.bf16.msra.mxu1 %v8499_v43 }
 0x325   : > { %7889 = vmatprep.subr.bf16.mxu1 %v8500_v0 }
 0x328   : > { %7890 = vmatpush3.bf16.msra.mxu1 %v8500_v0 }
 0x329   : > { %7891 = vmatprep.subr.bf16.mxu1 %v8501_v53 }
 0x32c   : > { %7892 = vmatpush3.bf16.msra.mxu1 %v8501_v53 }
 0x32f   : > { %7894 = vmatmul.mubr.msk.bf16.vlgmr.msra.gmra.mrb[0].mxu1 %vm10036_vm2, %v9939_v35  ;;  %v6807_v35 = vld [vmem:[%s11325_s4] ss:$0 sm:$0xff] }
 0x330   : > { %7897 = vmatprep.mubr.msk.bf16.mxu1 %vm10036_vm2, %v10057_v61 }
 0x337   : > { %7898 = vmatmul.mubr.bf16.gmra.mrb[4].mxu1 %v6798_v55 }
 0x402   : > { %v7895_v58 = vpop.f32.mrb[0].mxu1 }
 0x403   : > { %v3127_v61 = vadd.f32 %v7895_v58, %v6807_v35  ;;  %v3079_v22 = vpop.f32.mrb[1].mxu1 }
 0x404   : > { %v3125_v30 = vadd.f32 %v6807_v35, %v3079_v22  ;;  %v7896_v49 = vpop.f32.mrb[2].mxu1  ;;  %v8511_v22 = vld [vmem:[%s11326_s5 + $0x18] sm:$0xff]  }
 0x405   : > { %v10311_v45 = vmax.f32 %v3127_v61, 0.0  ;;  %v3128_v14 = vadd.f32 %v7896_v49, %v6807_v35  ;;  %v3082_v26 = vpop.f32.mrb[3].mxu1 }
 0x406   : > { %v10313_v38 = vmax.f32 %v3125_v30, 0.0  ;;  %v3126_v29 = vadd.f32 %v6807_v35, %v3082_v26 }
 0x407   : > { %v3143_v5 = vrot.slane %v10311_v45, 7  ;;  %v3159_v40 = vrot.slane %v10311_v45, 1  ;;  %v10317_v4 = vmax.f32 %v3128_v14, 0.0 }
 0x408   : > { %v3141_v50 = vrot.slane %v10313_v38, 7  ;;  %v3181_v21 = vpack.c.bf16 %v10313_v38, %v10313_v38  ;;  %v10322_v33 = vmax.f32 %v3126_v29, 0.0  ;;  %v3157_v56 = vrot.slane %v10313_v38, 1 }
 0x409   : > { %v10326_v6 = vsel %vm611_vm3, %v3143_v5, 0.0  ;;  %v10330_v46 = vsel %vm746_vm0, %v3159_v40, 0.0  ;;  %v3144_v27 = vrot.slane %v10317_v4, 7  ;;  %v7342_v54 = vpack.c.bf16 %v10317_v4, %v10311_v45 }
 0x40a   : > { %v3142_v31 = vrot.slane %v10322_v33, 7  ;;  %v3158_v37 = vrot.slane %v10322_v33, 1  ;;  %v10339_v3 = vpack.c.bf16 %v10311_v45, %v10322_v33  ;;  %v7899_v51 = vpop.f32.mrb[4].mxu1  ;;  %v6820_v17 = vcombine.low %v8635_v2, %v3181_v21  ;;  %v8536_v45 = vld [vmem:[%s11326_s5 + $0x110] sm:$0xff]  }
 0x40b   : > { %v3131_v8 = vadd.f32 %v7899_v51, %v6807_v35  ;;  %v3095_v9 = vpop.f32.mrb[5].mxu1  ;;  %v10344_v34 = vsel %vm611_vm3, %v3141_v50, 0.0  ;;  %v10348_v24 = vsel %vm611_vm3, %v3144_v27, 0.0  ;;  %v3160_v13 = vrot.slane %v10317_v4, 1 }
 0x40c   : > { %v10352_v57 = vsel %vm611_vm3, %v3142_v31, 0.0  ;;  %v10356_v11 = vsel %vm746_vm0, %v3158_v37, 0.0  ;;  %v3129_v60 = vadd.f32 %v6807_v35, %v3095_v9  ;;  %v7900_v39 = vpop.f32.mrb[6].mxu1  ;;  %v3173_v62 = vpack.c.bf16 %v10344_v34, %v10344_v34  ;;  %7913 = vmatprep.mubr.msk.bf16.mxu0 %vm3276_vm6, %v6820_v17 }
 0x40d   : > { %v10365_v25 = vpack.c.bf16 %v10326_v6, %v10352_v57  ;;  %v10369_v7 = vpack.c.bf16 %v10330_v46, %v10356_v11  ;;  %v10371_v16 = vmax.f32 %v3131_v8, 0.0  ;;  %v3132_v63 = vadd.f32 %v7900_v39, %v6807_v35  ;;  %v3098_v36 = vpop.f32.mrb[7].mxu1  ;;  %7914 = vmatmul.mubr.msk.bf16.vlgmr.msra.gmra.mrb[32].mxu0 %vm3276_vm6, %v10339_v3 }
 0x40e   : > { %v10374_v15 = vmax.f32 %v3129_v60, 0.0  ;;  %v3130_v44 = vadd.f32 %v6807_v35, %v3098_v36  ;;  %v7338_v59 = vpack.c.bf16 %v10348_v24, %v10326_v6  ;;  %7922 = vmatpush3.bf16.msra.mxu0 %v8508_v19  ;;  %v6834_v53 = vcombine.low %v8635_v2, %v3173_v62  ;;  %v8514_v62 = vld [vmem:[%s11326_s5 + $0x60] sm:$0xff]   ;;  %v8516_v36 = vld [vmem:[%s11326_s5 + $0x70] sm:$0xff]  }
 0x40f   : > { %v3147_v12 = vrot.slane %v10371_v16, 7  ;;  %v10383_v42 = vmax.f32 %v3132_v63, 0.0  ;;  %7923 = vmatprep.subr.bf16.mxu0 %v8509_v48  ;;  %v3163_v18 = vrot.slane %v10371_v16, 1  ;;  %v10422_v58 = vsel %vm746_vm0, %v3160_v13, 0.0  ;;  %v8515_v63 = vld [vmem:[%s11326_s5 + $0x68] sm:$0xff]   ;;  %v8530_v6 = vld [vmem:[%s11326_s5 + $0xe0] sm:$0xff]  }
 0x410   : > { %v3145_v10 = vrot.slane %v10374_v15, 7  ;;  %v3161_v23 = vrot.slane %v10374_v15, 1  ;;  %v10387_v28 = vmax.f32 %v3130_v44, 0.0  ;;  %v10391_v52 = vpack.c.bf16 %v10374_v15, %v10317_v4  ;;  %v8537_v4 = vld [vmem:[%s11326_s5 + $0x118] sm:$0xff]  }
 0x411   : > { %v3148_v43 = vrot.slane %v10383_v42, 7  ;;  %v3164_v0 = vrot.slane %v10383_v42, 1  ;;  %v10418_v35 = vsel %vm611_vm3, %v3147_v12, 0.0  ;;  %v7346_v14 = vpack.c.bf16 %v10422_v58, %v10330_v46  ;;  %v8518_v12 = vld [vmem:[%s11326_s5 + $0x80] sm:$0xff]  }
 0x412   : > { %v3146_v20 = vrot.slane %v10387_v28, 7  ;;  %v3162_v32 = vrot.slane %v10387_v28, 1  ;;  %7917 = vmatprep.mubr.msk.bf16.mxu0 %vm3276_vm6, %v10391_v52  ;;  %v10406_v55 = vpack.c.bf16 %v10371_v16, %v10387_v28  ;;  %v10410_v47 = vsel %vm611_vm3, %v3145_v10, 0.0  ;;  %7924 = vmatpush3.bf16.msra.mxu0 %v8509_v48  ;;  %v8513_v48 = vld [vmem:[%s11326_s5 + $0x28] sm:$0xff]   ;;  %v8542_v46 = vld [vmem:[%s11326_s5 + $0x140] sm:$0xff]  }
 0x413   : > { %v10414_v19 = vpack.c.bf16 %v10410_v47, %v10348_v24  ;;  %v10426_v61 = vsel %vm746_vm0, %v3161_v23, 0.0  ;;  %7925 = vmatprep.subr.bf16.mxu0 %v8510_v41  ;;  %v10451_v5 = vsel %vm746_vm0, %v3157_v56, 0.0  ;;  %v10455_v40 = vsel %vm746_vm0, %v3163_v18, 0.0  ;;  %v8517_v56 = vld [vmem:[%s11326_s5 + $0x78] sm:$0xff]   ;;  %v8519_v10 = vld [vmem:[%s11326_s5 + $0x88] sm:$0xff]   ;;  %v8520_v23 = vld [vmem:[%s11326_s5 + $0x90] sm:$0xff]  }
 0x414   : > { %v10433_v30 = vsel %vm611_vm3, %v3146_v20, 0.0  ;;  %v10437_v49 = vpack.c.bf16 %v10426_v61, %v10422_v58  ;;  %v10443_v26 = vsel %vm746_vm0, %v3162_v32, 0.0  ;;  %v7337_v50 = vpack.c.bf16 %v10352_v57, %v10344_v34  ;;  %v8512_v34 = vld [vmem:[%s11326_s5 + $0x20] sm:$0xff]   ;;  %v8527_v32 = vld [vmem:[%s11326_s5 + $0xc8] sm:$0xff]  }
 0x415   : > { %v10447_v29 = vpack.c.bf16 %v10418_v35, %v10433_v30  ;;  %7918 = vmatmul.mubr.msk.bf16.gmra.mrb[36].mxu0 %vm3276_vm6, %v10406_v55  ;;  %v10463_v21 = vpack.c.bf16 %v10455_v40, %v10443_v26  ;;  %v7339_v27 = vpack.c.bf16 %v10433_v30, %v10410_v47  ;;  %v10469_v31 = vsel %vm611_vm3, %v3148_v43, 0.0  ;;  %v8522_v18 = vld [vmem:[%s11326_s5 + $0xa0] sm:$0xff]   ;;  %v8523_v43 = vld [vmem:[%s11326_s5 + $0xa8] sm:$0xff]  }
 0x416   : > { %v7341_v37 = vpack.c.bf16 %v10322_v33, %v10313_v38  ;;  %7926 = vmatpush3.bf16.msra.mxu0 %v8510_v41  ;;  %7933 = vmatprep.mubr.msk.bf16.mxu0 %vm3276_vm6, %v6834_v53  ;;  %v7340_v51 = vpack.c.bf16 %v10469_v31, %v10418_v35  ;;  %v7343_v8 = vpack.c.bf16 %v10387_v28, %v10374_v15  ;;  %v10482_v17 = vsel %vm746_vm0, %v3164_v0, 0.0  ;;  %v8521_v41 = vld [vmem:[%s11326_s5 + $0x98] sm:$0xff]   ;;  %v8524_v0 = vld [vmem:[%s11326_s5 + $0xb0] sm:$0xff]   ;;  %v8526_v20 = vld [vmem:[%s11326_s5 + $0xc0] sm:$0xff]  }
 0x417   : > { %v7344_v9 = vpack.c.bf16 %v10383_v42, %v10371_v16  ;;  %7927 = vmatprep.subr.bf16.mxu0 %v8511_v22  ;;  %v7345_v57 = vpack.c.bf16 %v10356_v11, %v10451_v5  ;;  %v7347_v60 = vpack.c.bf16 %v10443_v26, %v10426_v61  ;;  %v7348_v39 = vpack.c.bf16 %v10482_v17, %v10455_v40  ;;  %v8525_v53 = vld [vmem:[%s11326_s5 + $0xb8] sm:$0xff]   ;;  %v8531_v24 = vld [vmem:[%s11326_s5 + $0xe8] sm:$0xff]   ;;  %v8534_v33 = vld [vmem:[%s11326_s5 + $0x100] sm:$0xff]  }
 0x418   : > { %v3189_v44 = vpack.c.bf16 %v10451_v5, %v10451_v5  ;;  %v8533_v38 = vld [vmem:[%s11326_s5 + $0xf8] sm:$0xff]   ;;  %v8535_v47 = vld [vmem:[%s11326_s5 + $0x108] sm:$0xff]   ;;  %v8540_v16 = vld [vmem:[%s11326_s5 + $0x130] sm:$0xff]   ;;  %v3180_v58 = vpack.c.bf16 %v10469_v31, %v10469_v31  ;;  %v3188_v5 = vpack.c.bf16 %v10383_v42, %v10383_v42  ;;  %vm8639_vm0 = vmmov 0  }
 0x419   : > { %v8539_v11 = vld [vmem:[%s11326_s5 + $0x128] sm:$0xff]   ;;  %v8541_v15 = vld [vmem:[%s11326_s5 + $0x138] sm:$0xff]   ;;  %v8544_v35 = vld [vmem:[%s11326_s5 + $0x150] sm:$0xff]  }
 0x41a   : > { %7928 = vmatpush3.bf16.msra.mxu0 %v8511_v22  ;;  %v6860_v13 = vcombine.low %v8635_v2, %v3189_v44  ;;  %v8528_v22 = vld [vmem:[%s11326_s5 + $0xd0] sm:$0xff]   ;;  %v8543_v28 = vld [vmem:[%s11326_s5 + $0x148] sm:$0xff]   ;;  %v8546_v61 = vld [vmem:[%s11326_s5 + $0x160] sm:$0xff]   ;;  %v6964_v30 = vcombine.low %v3180_v58, %v8635_v2 }
 0x41b   : > { %7929 = vmatprep.subr.bf16.mxu0 %v8512_v34  ;;  %v8549_v26 = vld [vmem:[%s11326_s5 + $0x178] sm:$0xff]   ;;  %v8552_v40 = vld [vmem:[%s11326_s5 + $0x190] sm:$0xff]   ;;  %v8554_v42 = vld [vmem:[%s11326_s5 + $0x1a0] sm:$0xff]  }
 0x41e   : > { %7930 = vmatpush3.bf16.msra.mxu0 %v8512_v34  ;;  %v8560_v34 = vld [vmem:[%s11328_s7 + $0x38] sm:$0xff]  }
 0x41f   : > { %7931 = vmatprep.subr.bf16.mxu0 %v8513_v48 }
 0x422   : > { %7932 = vmatpush3.bf16.msra.mxu0 %v8513_v48 }
 0x423   : > { %7941 = vmatprep.subr.bf16.mxu0 %v8514_v62 }
 0x425   : > { %7934 = vmatmul.mubr.msk.bf16.vlgmr.msra.gmra.mrb[32].mxu0 %vm3276_vm6, %v10365_v25 }
 0x426   : > { %7937 = vmatprep.mubr.msk.bf16.mxu0 %vm3276_vm6, %v10414_v19  ;;  %7942 = vmatpush3.bf16.msra.mxu0 %v8514_v62 }
 0x427   : > { %7943 = vmatprep.subr.bf16.mxu0 %v8515_v63 }
 0x42a   : > { %7944 = vmatpush3.bf16.msra.mxu0 %v8515_v63 }
 0x42b   : > { %7945 = vmatprep.subr.bf16.mxu0 %v8516_v36 }
 0x42d   : > { %7938 = vmatmul.mubr.msk.bf16.gmra.mrb[36].mxu0 %vm3276_vm6, %v10447_v29 }
 0x42e   : > { %7946 = vmatpush3.bf16.msra.mxu0 %v8516_v36  ;;  %7953 = vmatprep.mubr.msk.bf16.mxu0 %vm3276_vm6, %v6860_v13 }
 0x42f   : > { %7947 = vmatprep.subr.bf16.mxu0 %v8517_v56 }
 0x432   : > { %7948 = vmatpush3.bf16.msra.mxu0 %v8517_v56 }
 0x433   : > { %7949 = vmatprep.subr.bf16.mxu0 %v8518_v12 }
 0x436   : > { %7950 = vmatpush3.bf16.msra.mxu0 %v8518_v12 }
 0x437   : > { %7951 = vmatprep.subr.bf16.mxu0 %v8519_v10 }
 0x43a   : > { %7952 = vmatpush3.bf16.msra.mxu0 %v8519_v10 }
 0x43b   : > { %7961 = vmatprep.subr.bf16.mxu0 %v8520_v23 }
 0x43d   : > { %7954 = vmatmul.mubr.msk.bf16.vlgmr.msra.gmra.mrb[32].mxu0 %vm3276_vm6, %v10369_v7 }
 0x43e   : > { %7957 = vmatprep.mubr.msk.bf16.mxu0 %vm3276_vm6, %v10437_v49  ;;  %7962 = vmatpush3.bf16.msra.mxu0 %v8520_v23 }
 0x43f   : > { %7963 = vmatprep.subr.bf16.mxu0 %v8521_v41 }
 0x442   : > { %7964 = vmatpush3.bf16.msra.mxu0 %v8521_v41 }
 0x443   : > { %7965 = vmatprep.subr.bf16.mxu0 %v8522_v18 }
 0x445   : > { %7958 = vmatmul.mubr.msk.bf16.gmra.mrb[36].mxu0 %vm3276_vm6, %v10463_v21 }
 0x446   : > { %7966 = vmatpush3.bf16.msra.mxu0 %v8522_v18  ;;  %7973 = vmatprep.mubr.msk.bf16.mxu0 %vm3276_vm6, %v7337_v50  ;;  %v8529_v50 = vld [vmem:[%s11326_s5 + $0xd8] sm:$0xff]  }
 0x447   : > { %7967 = vmatprep.subr.bf16.mxu0 %v8523_v43 }
 0x44a   : > { %7968 = vmatpush3.bf16.msra.mxu0 %v8523_v43  ;;  %v8640_v43 = vmov 1983009808  }
 0x44b   : > { %7969 = vmatprep.subr.bf16.mxu0 %v8524_v0 }
 0x44e   : > { %7970 = vmatpush3.bf16.msra.mxu0 %v8524_v0  ;;  %v4611_v0 = vunpack.c.l.s4 %v8640_v43 }
 0x44f   : > { %7971 = vmatprep.subr.bf16.mxu0 %v8525_v53 }
 0x452   : > { %7972 = vmatpush3.bf16.msra.mxu0 %v8525_v53 }
 0x453   : > { %7981 = vmatprep.subr.bf16.mxu0 %v8526_v20 }
 0x455   : > { %7974 = vmatmul.mubr.msk.bf16.vlgmr.msra.gmra.mrb[32].mxu0 %vm3276_vm6, %v7338_v59  ;;  %v8532_v59 = vld [vmem:[%s11326_s5 + $0xf0] sm:$0xff]  }
 0x456   : > { %7977 = vmatprep.mubr.msk.bf16.mxu0 %vm3276_vm6, %v7339_v27  ;;  %7982 = vmatpush3.bf16.msra.mxu0 %v8526_v20  ;;  %v6987_v27 = vcombine.low %v3188_v5, %v8635_v2 }
 0x457   : > { %7983 = vmatprep.subr.bf16.mxu0 %v8527_v32 }
 0x45a   : > { %7984 = vmatpush3.bf16.msra.mxu0 %v8527_v32 }
 0x45b   : > { %7985 = vmatprep.subr.bf16.mxu0 %v8528_v22 }
 0x45d   : > { %7978 = vmatmul.mubr.msk.bf16.gmra.mrb[36].mxu0 %vm3276_vm6, %v7340_v51  ;;  %v8638_v51 = vmov 0.0  }
 0x45e   : > { %7986 = vmatpush3.bf16.msra.mxu0 %v8528_v22  ;;  %7993 = vmatprep.mubr.msk.bf16.mxu0 %vm3276_vm6, %v7341_v37  ;;  %v8556_v37 = vld [vmem:[%s11328_s7 + $0x20] sm:$0xff]   ;;  %v4528_v32 = vrot.slane %v8638_v51, 4 }
 0x45f   : > { %7987 = vmatprep.subr.bf16.mxu0 %v8529_v50  ;;  %8105 = vmatprep.subr.bf16.mxu1 %v8638_v51 }
 0x460   : > { %8113 = vmatprep.mubr.msk.bf16.mxu1 %vm8639_vm0, %v8638_v51 }
 0x462   : > { %7988 = vmatpush3.bf16.msra.mxu0 %v8529_v50 }
 0x463   : > { %7989 = vmatprep.subr.bf16.mxu0 %v8530_v6 }
 0x466   : > { %7990 = vmatpush3.bf16.msra.mxu0 %v8530_v6 }
 0x467   : > { %7991 = vmatprep.subr.bf16.mxu0 %v8531_v24 }
 0x46a   : > { %7992 = vmatpush3.bf16.msra.mxu0 %v8531_v24 }
 0x46b   : > { %8001 = vmatprep.subr.bf16.mxu0 %v8532_v59 }
 0x46d   : > { %7994 = vmatmul.mubr.msk.bf16.vlgmr.msra.gmra.mrb[32].mxu0 %vm3276_vm6, %v7342_v54  ;;  %v8538_v54 = vld [vmem:[%s11326_s5 + $0x120] sm:$0xff]  }
 0x46e   : > { %7997 = vmatprep.mubr.msk.bf16.mxu0 %vm3276_vm6, %v7343_v8  ;;  %8002 = vmatpush3.bf16.msra.mxu0 %v8532_v59  ;;  %v8561_v8 = vld [vmem:[%s11328_s7 + $0x48] sm:$0xff]  }
 0x46f   : > { %8003 = vmatprep.subr.bf16.mxu0 %v8533_v38 }
 0x472   : > { %8004 = vmatpush3.bf16.msra.mxu0 %v8533_v38 }
 0x473   : > { %8005 = vmatprep.subr.bf16.mxu0 %v8534_v33 }
 0x475   : > { %7998 = vmatmul.mubr.msk.bf16.gmra.mrb[36].mxu0 %vm3276_vm6, %v7344_v9  ;;  %v8558_v9 = vld [vmem:[%s11328_s7 + $0x30] sm:$0xff]  }
 0x476   : > { %8006 = vmatpush3.bf16.msra.mxu0 %v8534_v33  ;;  %8013 = vmatprep.mubr.msk.bf16.mxu0 %vm3276_vm6, %v7345_v57  ;;  %v8565_v57 = vld [vmem:[%s11328_s7 + $0x58] sm:$0xff]  }
 0x477   : > { %8007 = vmatprep.subr.bf16.mxu0 %v8535_v47 }
 0x47a   : > { %8008 = vmatpush3.bf16.msra.mxu0 %v8535_v47 }
 0x47b   : > { %8009 = vmatprep.subr.bf16.mxu0 %v8536_v45 }
 0x47e   : > { %8010 = vmatpush3.bf16.msra.mxu0 %v8536_v45 }
 0x47f   : > { %8011 = vmatprep.subr.bf16.mxu0 %v8537_v4 }
 0x482   : > { %8012 = vmatpush3.bf16.msra.mxu0 %v8537_v4  ;;  %v4612_v4 = vunpack.c.0.s8 %v4611_v0 }
 0x483   : > { %8021 = vmatprep.subr.bf16.mxu0 %v8538_v54 }
 0x485   : > { %8014 = vmatmul.mubr.msk.bf16.vlgmr.msra.gmra.mrb[32].mxu0 %vm3276_vm6, %v7346_v14  ;;  %v8548_v14 = vld [vmem:[%s11326_s5 + $0x170] sm:$0xff]  }
 0x486   : > { %8017 = vmatprep.mubr.msk.bf16.mxu0 %vm3276_vm6, %v7347_v60  ;;  %8022 = vmatpush3.bf16.msra.mxu0 %v8538_v54  ;;  %v7021_v60 = vld [vmem:[%s11327_s6] ss:$0 sm:$0xff] }
 0x487   : > { %8023 = vmatprep.subr.bf16.mxu0 %v8539_v11 }
 0x48a   : > { %8024 = vmatpush3.bf16.msra.mxu0 %v8539_v11 }
 0x48b   : > { %8025 = vmatprep.subr.bf16.mxu0 %v8540_v16 }
 0x48d   : > { %8018 = vmatmul.mubr.msk.bf16.gmra.mrb[36].mxu0 %vm3276_vm6, %v7348_v39 }
 0x48e   : > { %8026 = vmatpush3.bf16.msra.mxu0 %v8540_v16  ;;  %8033 = vmatprep.mubr.msk.bf16.mxu0 %vm3276_vm6, %v10365_v25  ;;  %v8545_v25 = vld [vmem:[%s11326_s5 + $0x158] sm:$0xff]   ;;  %v4533_v16 = vsel %vm4518_vm7, %v4528_v32, 0.0 }
 0x48f   : > { %8027 = vmatprep.subr.bf16.mxu0 %v8541_v15 }
 0x492   : > { %8028 = vmatpush3.bf16.msra.mxu0 %v8541_v15 }
 0x493   : > { %8029 = vmatprep.subr.bf16.mxu0 %v8542_v46 }
 0x496   : > { %8030 = vmatpush3.bf16.msra.mxu0 %v8542_v46 }
 0x497   : > { %8031 = vmatprep.subr.bf16.mxu0 %v8543_v28 }
 0x49a   : > { %8032 = vmatpush3.bf16.msra.mxu0 %v8543_v28 }
 0x49b   : > { %8041 = vmatprep.subr.bf16.mxu0 %v8544_v35 }
 0x49d   : > { %8034 = vmatmul.mubr.msk.bf16.vlgmr.msra.gmra.mrb[32].mxu0 %vm3276_vm6, %v10414_v19  ;;  %v8547_v19 = vld [vmem:[%s11326_s5 + $0x168] sm:$0xff]  }
 0x49e   : > { %8037 = vmatprep.mubr.msk.bf16.mxu0 %vm3276_vm6, %v10447_v29  ;;  %8042 = vmatpush3.bf16.msra.mxu0 %v8544_v35  ;;  %v8550_v29 = vld [vmem:[%s11326_s5 + $0x180] sm:$0xff]  }
 0x49f   : > { %8043 = vmatprep.subr.bf16.mxu0 %v8545_v25 }
 0x4a2   : > { %8044 = vmatpush3.bf16.msra.mxu0 %v8545_v25 }
 0x4a3   : > { %8045 = vmatprep.subr.bf16.mxu0 %v8546_v61 }
 0x4a5   : > { %8038 = vmatmul.mubr.msk.bf16.gmra.mrb[36].mxu0 %vm3276_vm6, %v6964_v30 }
 0x4a6   : > { %8046 = vmatpush3.bf16.msra.mxu0 %v8546_v61  ;;  %8053 = vmatprep.mubr.msk.bf16.mxu0 %vm3276_vm6, %v10339_v3  ;;  %v8551_v3 = vld [vmem:[%s11326_s5 + $0x188] sm:$0xff]  }
 0x4a7   : > { %8047 = vmatprep.subr.bf16.mxu0 %v8547_v19 }
 0x4aa   : > { %8048 = vmatpush3.bf16.msra.mxu0 %v8547_v19 }
 0x4ab   : > { %8049 = vmatprep.subr.bf16.mxu0 %v8548_v14 }
 0x4ae   : > { %8050 = vmatpush3.bf16.msra.mxu0 %v8548_v14 }
 0x4af   : > { %8051 = vmatprep.subr.bf16.mxu0 %v8549_v26 }
 0x4b2   : > { %8052 = vmatpush3.bf16.msra.mxu0 %v8549_v26 }
 0x4b3   : > { %8061 = vmatprep.subr.bf16.mxu0 %v8550_v29 }
 0x4b5   : > { %8054 = vmatmul.mubr.msk.bf16.vlgmr.msra.gmra.mrb[32].mxu0 %vm3276_vm6, %v10391_v52  ;;  %v8553_v52 = vld [vmem:[%s11326_s5 + $0x198] sm:$0xff]  }
 0x4b6   : > { %8057 = vmatprep.mubr.msk.bf16.mxu0 %vm3276_vm6, %v10406_v55  ;;  %8062 = vmatpush3.bf16.msra.mxu0 %v8550_v29  ;;  %v8555_v55 = vld [vmem:[%s11326_s5 + $0x1a8] sm:$0xff]   ;;  %v4559_v29 = vrot.slane %v4533_v16, 1 }
 0x4b7   : > { %8063 = vmatprep.subr.bf16.mxu0 %v8551_v3 }
 0x4ba   : > { %8064 = vmatpush3.bf16.msra.mxu0 %v8551_v3 }
 0x4bb   : > { %8065 = vmatprep.subr.bf16.mxu0 %v8552_v40 }
 0x4bd   : > { %8058 = vmatmul.mubr.msk.bf16.gmra.mrb[36].mxu0 %vm3276_vm6, %v6987_v27 }
 0x4be   : > { %8066 = vmatpush3.bf16.msra.mxu0 %v8552_v40  ;;  %8073 = vmatprep.mubr.msk.bf16.mxu0 %vm3276_vm6, %v10369_v7  ;;  %v3196_v7 = vpack.c.bf16 %v10482_v17, %v10482_v17  ;;  %v8563_v17 = vld [vmem:[%s11328_s7 + $0x50] sm:$0xff]  }
 0x4bf   : > { %8067 = vmatprep.subr.bf16.mxu0 %v8553_v52 }
 0x4c0   : > { %v7010_v31 = vcombine.low %v3196_v7, %v8635_v2 }
 0x4c2   : > { %8068 = vmatpush3.bf16.msra.mxu0 %v8553_v52 }
 0x4c3   : > { %8069 = vmatprep.subr.bf16.mxu0 %v8554_v42 }
 0x4c6   : > { %8070 = vmatpush3.bf16.msra.mxu0 %v8554_v42 }
 0x4c7   : > { %8071 = vmatprep.subr.bf16.mxu0 %v8555_v55 }
 0x4ca   : > { %8072 = vmatpush3.bf16.msra.mxu0 %v8555_v55 }
 0x4cb   : > { %8081 = vmatprep.subr.bf16.mxu0 %v8638_v51 }
 0x4cd   : > { %8074 = vmatmul.mubr.msk.bf16.vlgmr.msra.gmra.mrb[32].mxu0 %vm3276_vm6, %v10437_v49  ;;  %v8559_v49 = vld [vmem:[%s11328_s7 + $0x40] sm:$0xff]  }
 0x4ce   : > { %8077 = vmatprep.mubr.msk.bf16.mxu0 %vm3276_vm6, %v10463_v21  ;;  %8082 = vmatpush3.bf16.msra.mxu0 %v8556_v37  ;;  %v8557_v21 = vld [vmem:[%s11328_s7 + $0x28] sm:$0xff]  }
 0x4cf   : > { %8083 = vmatprep.subr.bf16.mxu0 %v8638_v51  ;;  %8106 = vmatpush3.bf16.msra.mxu1 %v8559_v49  ;;  %v4543_v49 = vrot.slane %v4533_v16, 3 }
 0x4d0   : > { %8107 = vmatprep.subr.bf16.mxu1 %v8638_v51 }
 0x4d2   : > { %8084 = vmatpush3.bf16.msra.mxu0 %v8557_v21 }
 0x4d3   : > { %8085 = vmatprep.subr.bf16.mxu0 %v8638_v51  ;;  %8108 = vmatpush3.bf16.msra.mxu1 %v8561_v8 }
 0x4d4   : > { %8109 = vmatprep.subr.bf16.mxu1 %v8638_v51 }
 0x4d5   : > { %8078 = vmatmul.mubr.msk.bf16.gmra.mrb[36].mxu0 %vm3276_vm6, %v7010_v31 }
 0x4d6   : > { %8089 = vmatprep.mubr.msk.bf16.mxu0 %vm8639_vm0, %v8638_v51  ;;  %8086 = vmatpush3.bf16.msra.mxu0 %v8558_v9 }
 0x4d7   : > { %8087 = vmatprep.subr.bf16.mxu0 %v8638_v51  ;;  %8110 = vmatpush3.bf16.msra.mxu1 %v8563_v17 }
 0x4d8   : > { %8111 = vmatprep.subr.bf16.mxu1 %v8638_v51 }
 0x4da   : > { %8088 = vmatpush3.bf16.msra.mxu0 %v8560_v34  ;;  %v10764_v34 = vsub.s32 %v4612_v4, %v8756_v1 }
 0x4db   : > { %8093 = vmatprep.subr.bf16.mxu0 %v8638_v51  ;;  %8112 = vmatpush3.bf16.msra.mxu1 %v8565_v57 }
 0x4dc   : > { %8129 = vmatprep.subr.bf16.mxu1 %v8638_v51 }
 0x5a0   : > { %v8075_v39 = vpop.f32.mrb[32].mxu0 }
 0x5a1   : > { %v4444_v48 = vadd.f32 %v8075_v39, %v7021_v60  ;;  %v4396_v62 = vpop.f32.mrb[33].mxu0  ;;  %v10769_v39 = vsel %vm4558_vm8, %v4559_v29, 0.0 }
 0x5a2   : > { %v4442_v63 = vadd.f32 %v7021_v60, %v4396_v62  ;;  %v8076_v36 = vpop.f32.mrb[34].mxu0 }
 0x5a3   : > { %v4445_v44 = vadd.f32 %v8076_v36, %v7021_v60  ;;  %v4399_v56 = vpop.f32.mrb[35].mxu0  ;;  %v4452_v12 = vmax.f32 %v4444_v48, 0.0 }
 0x5a4   : > { %v4443_v13 = vadd.f32 %v7021_v60, %v4399_v56  ;;  %v4450_v23 = vmax.f32 %v4442_v63, 0.0 }
 0x5a5   : > { %v4453_v10 = vmax.f32 %v4445_v44, 0.0 }
 0x5a6   : > { %v4451_v41 = vmax.f32 %v4443_v13, 0.0 }
 0x5a7   : > { %v4459_v18 = vmax.f32 %v4452_v12, %v4453_v10  ;;  %v10774_v12 = vsel %vm611_vm3, %v4543_v49, 0.0 }
 0x5a8   : > { %v4458_v53 = vmax.f32 %v4450_v23, %v4451_v41  ;;  %v8079_v20 = vpop.f32.mrb[36].mxu0 }
 0x5a9   : > { %v4467_v22 = vrot.slane %v4459_v18, 1  ;;  %v4448_v50 = vadd.f32 %v8079_v20, %v7021_v60  ;;  %v4412_v6 = vpop.f32.mrb[37].mxu0 }
 0x5aa   : > { %v4466_v24 = vrot.slane %v4458_v53, 1  ;;  %v4446_v59 = vadd.f32 %v7021_v60, %v4412_v6  ;;  %v8080_v38 = vpop.f32.mrb[38].mxu0 }
 0x5ab   : > { %v4475_v33 = vmax.f32 %v4459_v18, %v4467_v22  ;;  %v4449_v47 = vadd.f32 %v8080_v38, %v7021_v60  ;;  %v4415_v45 = vpop.f32.mrb[39].mxu0  ;;  %v4456_v28 = vmax.f32 %v4448_v50, 0.0 }
 0x5ac   : > { %v4474_v54 = vmax.f32 %v4458_v53, %v4466_v24  ;;  %v4447_v11 = vadd.f32 %v7021_v60, %v4415_v45  ;;  %v4454_v61 = vmax.f32 %v4446_v59, 0.0 }
 0x5ad   : > { %v4483_v15 = vrot.slane %v4475_v33, 1  ;;  %v4491_v46 = vrot.slane %v4475_v33, 2  ;;  %v4457_v35 = vmax.f32 %v4449_v47, 0.0  ;;  %v4499_v19 = vrot.slane %v4475_v33, 3 }
 0x5ae   : > { %v4482_v25 = vrot.slane %v4474_v54, 1  ;;  %v4490_v58 = vrot.slane %v4474_v54, 2  ;;  %v4455_v30 = vmax.f32 %v4447_v11, 0.0  ;;  %v4498_v5 = vrot.slane %v4474_v54, 3 }
 0x5af   : > { %v4507_v14 = vsel %vm1665_vm10, %v4475_v33, %v4483_v15  ;;  %v4461_v26 = vmax.f32 %v4456_v28, %v4457_v35 }
 0x5b0   : > { %v4511_v3 = vsel %vm1260_vm5, %v4507_v14, %v4491_v46  ;;  %v4506_v40 = vsel %vm1665_vm10, %v4474_v54, %v4482_v25  ;;  %v4460_v27 = vmax.f32 %v4454_v61, %v4455_v30  ;;  %v8562_v30 = vld [vmem:[%s11328_s7] sm:$0xff]  }
 0x5b1   : > { %v4515_v52 = vsel %vm1682_vm11, %v4511_v3, %v4499_v19  ;;  %v4510_v42 = vsel %vm1260_vm5, %v4506_v40, %v4490_v58  ;;  %v4469_v55 = vrot.slane %v4461_v26, 1 }
 0x5b2   : > { %v4522_v7 = vrot.slane %v4515_v52, 4  ;;  %v4514_v31 = vsel %vm1682_vm11, %v4510_v42, %v4498_v5  ;;  %v4468_v37 = vrot.slane %v4460_v27, 1 }
 0x5b3   : > { %v4520_v21 = vrot.slane %v4514_v31, 4  ;;  %v4477_v8 = vmax.f32 %v4461_v26, %v4469_v55  ;;  %v4579_v9 = vpack.c.bf16 %v4514_v31, %v4514_v31  ;;  %v7081_v17 = vpack.c.bf16 %v4515_v52, %v4514_v31 }
 0x5b4   : > { %v4523_v57 = vsel %vm4518_vm7, %v4522_v7, %v4515_v52  ;;  %v4476_v60 = vmax.f32 %v4460_v27, %v4468_v37 }
 0x5b5   : > { %v4530_v48 = vrot.slane %v4523_v57, 4  ;;  %v4521_v62 = vsel %vm4518_vm7, %v4520_v21, %v4514_v31  ;;  %v4485_v63 = vrot.slane %v4477_v8, 1  ;;  %v4493_v36 = vrot.slane %v4477_v8, 2  ;;  %v8564_v21 = vld [vmem:[%s11328_s7 + $0x8] sm:$0xff]  }
 0x5b6   : > { %v4529_v44 = vrot.slane %v4521_v62, 4  ;;  %v4484_v56 = vrot.slane %v4476_v60, 1  ;;  %v4492_v13 = vrot.slane %v4476_v60, 2  ;;  %v4501_v23 = vrot.slane %v4477_v8, 3 }
 0x5b7   : > { %v4535_v10 = vsel %vm4518_vm7, %v4530_v48, %v4515_v52  ;;  %v4509_v41 = vsel %vm1665_vm10, %v4477_v8, %v4485_v63  ;;  %v4608_v18 = vcombine.low %v8635_v2, %v4579_v9  ;;  %v4500_v53 = vrot.slane %v4476_v60, 3 }
 0x5b8   : > { %v4534_v43 = vsel %vm4518_vm7, %v4529_v44, %v4514_v31  ;;  %v4513_v0 = vsel %vm1260_vm5, %v4509_v41, %v4493_v36  ;;  %v4508_v20 = vsel %vm1665_vm10, %v4476_v60, %v4484_v56  ;;  %v4561_v6 = vrot.slane %v4535_v10, 1 }
 0x5b9   : > { %v4517_v32 = vsel %vm1682_vm11, %v4513_v0, %v4501_v23  ;;  %v4512_v22 = vsel %vm1260_vm5, %v4508_v20, %v4492_v13  ;;  %v4560_v50 = vrot.slane %v4534_v43, 1  ;;  %v4616_v38 = vrot.slane %v4608_v18, %v10764_v34 }
 0x5ba   : > { %v4526_v24 = vrot.slane %v4517_v32, 4  ;;  %v4516_v59 = vsel %vm1682_vm11, %v4512_v22, %v4500_v53  ;;  %v4544_v33 = vrot.slane %v4534_v43, 3  ;;  %v4545_v54 = vrot.slane %v4535_v10, 3  ;;  %v8566_v43 = vld [vmem:[%s11328_s7 + $0x10] sm:$0xff]   ;;  %v8567_v22 = vld [vmem:[%s11328_s7 + $0x80] sm:$0xff]  }
 0x5bb   : > { %v4524_v47 = vrot.slane %v4516_v59, 4  ;;  %v7030_v45 = vpack.c.bf16 %v4516_v59, %v4515_v52  ;;  %v4570_v4 = vsel %vm4558_vm8, %v4560_v50, 0.0  ;;  %v7082_v46 = vpack.c.bf16 %v4517_v32, %v4516_v59 }
 0x5bc   : > { %v4527_v11 = vsel %vm4518_vm7, %v4526_v24, %v4517_v32  ;;  %v7051_v16 = vpack.c.bf16 %v4570_v4, %v10769_v39  ;;  %v4554_v15 = vsel %vm611_vm3, %v4544_v33, 0.0  ;;  %v4555_v58 = vsel %vm611_vm3, %v4545_v54, 0.0  ;;  %v8568_v54 = vld [vmem:[%s11328_s7 + $0x18] sm:$0xff]  }
 0x5bd   : > { %v4532_v28 = vrot.slane %v4527_v11, 4  ;;  %v4525_v35 = vsel %vm4518_vm7, %v4524_v47, %v4516_v59  ;;  %v4623_v25 = vrot.slane %v7030_v45, %v10764_v34  ;;  %v4571_v19 = vsel %vm4558_vm8, %v4561_v6, 0.0  ;;  %v8569_v11 = vld [vmem:[%s11328_s7 + $0x88] sm:$0xff]  }
 0x5be   : > { %v4531_v61 = vrot.slane %v4525_v35, 4  ;;  %v7036_v14 = vpack.c.bf16 %v4554_v15, %v10774_v12  ;;  %v10803_v26 = vrot.slane %v7081_v17, %v10764_v34  ;;  %v10806_v3 = vrot.slane %v7082_v46, %v10764_v34  ;;  %v8572_v46 = vld [vmem:[%s11328_s7 + $0x68] sm:$0xff]   ;;  %v8574_v35 = vld [vmem:[%s11328_s7 + $0x70] sm:$0xff]  }
 0x5bf   : > { %v4624_v29 = vcombine.low %v4616_v38, %v4623_v25  ;;  %v4537_v5 = vsel %vm4518_vm7, %v4532_v28, %v4517_v32  ;;  %v7066_v40 = vpack.c.bf16 %v4555_v58, %v4554_v15  ;;  %v4804_v52 = vrot.slane %v7051_v16, %v10764_v34  ;;  %v8570_v16 = vld [vmem:[%s11328_s7 + $0x60] sm:$0xff]   ;;  %v8571_v15 = vld [vmem:[%s11328_s7 + $0x90] sm:$0xff]   ;;  %v8573_v28 = vld [vmem:[%s11328_s7 + $0x98] sm:$0xff]  }
 0x5c0   : > { %v4536_v27 = vsel %vm4518_vm7, %v4531_v61, %v4516_v59  ;;  %v4547_v42 = vrot.slane %v4537_v5, 3  ;;  %v4563_v55 = vrot.slane %v4537_v5, 1  ;;  %v4706_v37 = vrot.slane %v7036_v14, %v10764_v34  ;;  %v8577_v61 = vld [vmem:[%s11328_s7 + $0xc8] sm:$0xff]   ;;  %v8584_v5 = vld [vmem:[%s11328_s7 + $0xb8] sm:$0xff]  }
 0x5c1   : > { %8090 = vmatmul.mubr.msk.bf16.vlgmr.msra.gmra.mrb[40].mxu0 %vm4649_vm9, %v4624_v29  ;;  %v4562_v7 = vrot.slane %v4536_v27, 1  ;;  %v4546_v31 = vrot.slane %v4536_v27, 3  ;;  %v5006_v49 = vcombine.low %v10803_v26, %v10806_v3  ;;  %v7096_v17 = vpack.c.bf16 %v4571_v19, %v4570_v4  ;;  %v8580_v14 = vld [vmem:[%s11328_s7 + $0xa8] sm:$0xff]   ;;  %v8581_v26 = vld [vmem:[%s11328_s7 + $0xd8] sm:$0xff]   ;;  %v8582_v29 = vld [vmem:[%s11328_s7 + $0xb0] sm:$0xff]  }
 0x5c2   : > { %8094 = vmatpush3.bf16.msra.mxu0 %v8562_v30  ;;  %8101 = vmatprep.mubr.msk.bf16.mxu0 %vm8639_vm0, %v8638_v51  ;;  %v4557_v8 = vsel %vm611_vm3, %v4547_v42, 0.0  ;;  %v4573_v9 = vsel %vm4558_vm8, %v4563_v55, 0.0  ;;  %v4582_v57 = vpack.c.bf16 %v4517_v32, %v4517_v32  ;;  %v10832_v10 = vrot.slane %v7066_v40, %v10764_v34  ;;  %v8578_v30 = vld [vmem:[%s11328_s7 + $0xa0] sm:$0xff]   ;;  %v8585_v40 = vld [vmem:[%s11328_s7 + $0x108] sm:$0xff]   ;;  %v8589_v55 = vld [vmem:[%s11328_s7 + $0x118] sm:$0xff]  }
 0x5c3   : > { %8095 = vmatprep.subr.bf16.mxu0 %v8638_v51  ;;  %v4572_v60 = vsel %vm4558_vm8, %v4562_v7, 0.0  ;;  %v4556_v48 = vsel %vm611_vm3, %v4546_v31, 0.0  ;;  %v7111_v62 = vpack.c.bf16 %v10774_v12, %v4557_v8  ;;  %v7138_v63 = vpack.c.bf16 %v10769_v39, %v4573_v9  ;;  %v8583_v3 = vld [vmem:[%s11328_s7 + $0x100] sm:$0xff]   ;;  %v8588_v42 = vld [vmem:[%s11328_s7 + $0xe8] sm:$0xff]   ;;  %v8590_v7 = vld [vmem:[%s11328_s7 + $0xf0] sm:$0xff]  }
 0x5c4   : > { %v7052_v36 = vpack.c.bf16 %v4572_v60, %v4571_v19  ;;  %v7037_v44 = vpack.c.bf16 %v4556_v48, %v4555_v58  ;;  %v7067_v56 = vpack.c.bf16 %v4557_v8, %v4556_v48  ;;  %v7097_v13 = vpack.c.bf16 %v4573_v9, %v4572_v60  ;;  %v8576_v58 = vld [vmem:[%s11328_s7 + $0x78] sm:$0xff]   ;;  %v8579_v19 = vld [vmem:[%s11328_s7 + $0xd0] sm:$0xff]   ;;  %v8586_v27 = vld [vmem:[%s11328_s7 + $0xe0] sm:$0xff]  }
 0x5c5   : > { %v10835_v23 = vrot.slane %v7111_v62, %v10764_v34  ;;  %v10838_v41 = vrot.slane %v7138_v63, %v10764_v34  ;;  %v5271_v18 = vcombine.low %v4582_v57, %v8635_v2  ;;  %v10859_v50 = vrot.slane %v7096_v17, %v10764_v34  ;;  %v8591_v31 = vld [vmem:[%s11328_s7 + $0xf8] sm:$0xff]   ;;  %v8597_v8 = vld [vmem:[%s11330_s9 + $0x8] sm:$0xff]   ;;  %v8599_v17 = vld [vmem:[%s11330_s9 + $0x10] sm:$0xff]  }
 0x5c6   : > { %8096 = vmatpush3.bf16.msra.mxu0 %v8564_v21  ;;  %v10845_v0 = vrot.slane %v7052_v36, %v10764_v34  ;;  %v10848_v53 = vrot.slane %v7037_v44, %v10764_v34  ;;  %v4908_v20 = vrot.slane %v7067_v56, %v10764_v34  ;;  %v10852_v32 = vrot.slane %v7097_v13, %v10764_v34  ;;  %v8593_v21 = vld [vmem:[%s11330_s9 + $0x20] sm:$0xff]   ;;  %v8594_v9 = vld [vmem:[%s11330_s9 + $0x28] sm:$0xff]  }
 0x5c7   : > { %8097 = vmatprep.subr.bf16.mxu0 %v8638_v51  ;;  %v5278_v6 = vrot.slane %v5271_v18, %v10764_v34  ;;  %vm5562_vm5 = vcmask 392192  }
 0x5c8   : > { %v4812_v24 = vcombine.low %v4804_v52, %v10845_v0  ;;  %v4714_v59 = vcombine.low %v4706_v37, %v10848_v53  ;;  %v4909_v38 = vcombine.low %v10832_v10, %v4908_v20  ;;  %v5191_v33 = vcombine.low %v10848_v53, %v10835_v23  ;;  %v8587_v52 = vld [vmem:[%s11328_s7 + $0x110] sm:$0xff]   ;;  %v8592_v37 = vld [vmem:[%s11330_s9 + $0x18] sm:$0xff]  }
 0x5c9   : > { %v5103_v47 = vcombine.low %v10859_v50, %v10852_v32  ;;  %v5367_v45 = vcombine.low %v10845_v0, %v10838_v41  ;;  %v10871_v4 = vcombine.low %v4623_v25, %v5278_v6  ;;  %v8575_v25 = vld [vmem:[%s11328_s7 + $0xc0] sm:$0xff]  }
 0x5ca   : > { %8098 = vmatpush3.bf16.msra.mxu0 %v8566_v43  ;;  %8114 = vmatmul.mubr.msk.bf16.vlgmr.msra.gmra.mrb[8].mxu1 %vm4649_vm9, %v4812_v24 }
 0x5cb   : > { %8130 = vmatpush3.bf16.msra.mxu1 %v8567_v22  ;;  %8099 = vmatprep.subr.bf16.mxu0 %v8638_v51 }
 0x5cc   : > { %8131 = vmatprep.subr.bf16.mxu1 %v8638_v51  ;;  %8137 = vmatprep.mubr.msk.bf16.mxu1 %vm8639_vm0, %v8638_v51 }
 0x5ce   : > { %8100 = vmatpush3.bf16.msra.mxu0 %v8568_v54 }
 0x5cf   : > { %8132 = vmatpush3.bf16.msra.mxu1 %v8569_v11  ;;  %8117 = vmatprep.subr.bf16.mxu0 %v8638_v51 }
 0x5d0   : > { %8133 = vmatprep.subr.bf16.mxu1 %v8638_v51 }
 0x5d1   : > { %8102 = vmatmul.mubr.msk.bf16.vlgmr.msra.gmra.mrb[44].mxu0 %vm4649_vm9, %v4714_v59 }
 0x5d2   : > { %8118 = vmatpush3.bf16.msra.mxu0 %v8570_v16  ;;  %8125 = vmatprep.mubr.msk.bf16.mxu0 %vm8639_vm0, %v8638_v51 }
 0x5d3   : > { %8134 = vmatpush3.bf16.msra.mxu1 %v8571_v15  ;;  %8119 = vmatprep.subr.bf16.mxu0 %v8638_v51 }
 0x5d4   : > { %8135 = vmatprep.subr.bf16.mxu1 %v8638_v51 }
 0x5d6   : > { %8120 = vmatpush3.bf16.msra.mxu0 %v8572_v46 }
 0x5d7   : > { %8136 = vmatpush3.bf16.msra.mxu1 %v8573_v28  ;;  %8121 = vmatprep.subr.bf16.mxu0 %v8638_v51 }
 0x5d8   : > { %8153 = vmatprep.subr.bf16.mxu1 %v8638_v51 }
 0x5da   : > { %8122 = vmatpush3.bf16.msra.mxu0 %v8574_v35  ;;  %8138 = vmatmul.mubr.msk.bf16.vlgmr.msra.gmra.mrb[12].mxu1 %vm4649_vm9, %v5006_v49  ;;  %v8595_v49 = vld [vmem:[%s11330_s9] sm:$0xff]  }
 0x5db   : > { %8154 = vmatpush3.bf16.msra.mxu1 %v8575_v25  ;;  %8123 = vmatprep.subr.bf16.mxu0 %v8638_v51 }
 0x5dc   : > { %8155 = vmatprep.subr.bf16.mxu1 %v8638_v51  ;;  %8161 = vmatprep.mubr.msk.bf16.mxu1 %vm8639_vm0, %v8638_v51 }
 0x5de   : > { %8124 = vmatpush3.bf16.msra.mxu0 %v8576_v58 }
 0x5df   : > { %8156 = vmatpush3.bf16.msra.mxu1 %v8577_v61  ;;  %8141 = vmatprep.subr.bf16.mxu0 %v8638_v51 }
 0x5e0   : > { %8157 = vmatprep.subr.bf16.mxu1 %v8638_v51 }
 0x5e1   : > { %8126 = vmatmul.mubr.msk.bf16.vlgmr.msra.gmra.mrb[48].mxu0 %vm4649_vm9, %v4909_v38 }
 0x5e2   : > { %8142 = vmatpush3.bf16.msra.mxu0 %v8578_v30  ;;  %8149 = vmatprep.mubr.msk.bf16.mxu0 %vm8639_vm0, %v8638_v51 }
 0x5e3   : > { %8158 = vmatpush3.bf16.msra.mxu1 %v8579_v19  ;;  %8143 = vmatprep.subr.bf16.mxu0 %v8638_v51 }
 0x5e4   : > { %8159 = vmatprep.subr.bf16.mxu1 %v8638_v51 }
 0x5e6   : > { %8144 = vmatpush3.bf16.msra.mxu0 %v8580_v14 }
 0x5e7   : > { %8160 = vmatpush3.bf16.msra.mxu1 %v8581_v26  ;;  %8145 = vmatprep.subr.bf16.mxu0 %v8638_v51 }
 0x5e8   : > { %8177 = vmatprep.subr.bf16.mxu1 %v8638_v51 }
 0x5ea   : > { %8146 = vmatpush3.bf16.msra.mxu0 %v8582_v29  ;;  %8162 = vmatmul.mubr.msk.bf16.vlgmr.msra.gmra.mrb[16].mxu1 %vm4649_vm9, %v5191_v33 }
 0x5eb   : > { %8178 = vmatpush3.bf16.msra.mxu1 %v8583_v3  ;;  %8147 = vmatprep.subr.bf16.mxu0 %v8638_v51 }
 0x5ec   : > { %8179 = vmatprep.subr.bf16.mxu1 %v8638_v51  ;;  %8185 = vmatprep.mubr.msk.bf16.mxu1 %vm8639_vm0, %v8638_v51 }
 0x5ee   : > { %8148 = vmatpush3.bf16.msra.mxu0 %v8584_v5 }
 0x5ef   : > { %8180 = vmatpush3.bf16.msra.mxu1 %v8585_v40  ;;  %8165 = vmatprep.subr.bf16.mxu0 %v8638_v51 }
 0x5f0   : > { %8181 = vmatprep.subr.bf16.mxu1 %v8638_v51 }
 0x5f1   : > { %8150 = vmatmul.mubr.msk.bf16.vlgmr.msra.gmra.mrb[52].mxu0 %vm4649_vm9, %v5103_v47 }
 0x5f2   : > { %8166 = vmatpush3.bf16.msra.mxu0 %v8586_v27  ;;  %8173 = vmatprep.mubr.msk.bf16.mxu0 %vm8639_vm0, %v8638_v51 }
 0x5f3   : > { %8182 = vmatpush3.bf16.msra.mxu1 %v8587_v52  ;;  %8167 = vmatprep.subr.bf16.mxu0 %v8638_v51  ;;  %v7144_v52 = vld [vmem:[%s11329_s8] ss:$0 sm:$0xff] }
 0x5f4   : > { %8183 = vmatprep.subr.bf16.mxu1 %v8638_v51 }
 0x5f6   : > { %8168 = vmatpush3.bf16.msra.mxu0 %v8588_v42 }
 0x5f7   : > { %8184 = vmatpush3.bf16.msra.mxu1 %v8589_v55  ;;  %8169 = vmatprep.subr.bf16.mxu0 %v8638_v51 }
 0x5f8   : > { %8199 = vmatprep.subr.bf16.mxu1 %v8638_v51 }
 0x5fa   : > { %8170 = vmatpush3.bf16.msra.mxu0 %v8590_v7  ;;  %8186 = vmatmul.mubr.msk.bf16.vlgmr.msra.gmra.mrb[20].mxu1 %vm4649_vm9, %v5367_v45 }
 0x5fb   : > { %8171 = vmatprep.subr.bf16.mxu0 %v8638_v51  ;;  %8205 = vmatprep.mubr.msk.bf16.mxu1 %vm8639_vm0, %v8638_v51 }
 0x5fc   : > { %8200 = vmatpush3.bf16.msra.mxu1 %v8595_v49 }
 0x5fd   : > { %8201 = vmatprep.subr.bf16.mxu1 %v8638_v51 }
 0x5fe   : > { %8172 = vmatpush3.bf16.msra.mxu0 %v8591_v31 }
 0x5ff   : > { %8189 = vmatprep.subr.bf16.mxu0 %v8638_v51 }
 0x600   : > { %8202 = vmatpush3.bf16.msra.mxu1 %v8597_v8 }
 0x601   : > { %8174 = vmatmul.mubr.msk.bf16.vlgmr.msra.gmra.mrb[56].mxu0 %vm4649_vm9, %v10871_v4  ;;  %8203 = vmatprep.subr.bf16.mxu1 %v8638_v51 }
 0x602   : > { %8195 = vmatprep.mubr.msk.bf16.mxu0 %vm8639_vm0, %v8638_v51  ;;  %8190 = vmatpush3.bf16.msra.mxu0 %v8592_v37 }
 0x603   : > { %8191 = vmatprep.subr.bf16.mxu0 %v8638_v51 }
 0x604   : > { %8204 = vmatpush3.bf16.msra.mxu1 %v8599_v17 }
 0x605   : > { %8219 = vmatprep.subr.bf16.mxu1 %v8638_v51 }
 0x606   : > { %8192 = vmatpush3.bf16.msra.mxu0 %v8593_v21 }
 0x607   : > { %8193 = vmatprep.subr.bf16.mxu0 %v8638_v51 }
 0x60a   : > { %8194 = vmatpush3.bf16.msra.mxu0 %v8594_v9 }
 0x60b   : > { %8209 = vmatprep.subr.bf16.mxu0 %v8638_v51 }
 0x694   : > { %v4687_v57 = vpop.f32.mrb[40].mxu0 }
 0x695   : > { %v8091_v60 = vpop.f32.mrb[41].mxu0 }
 0x696   : > { %v4690_v48 = vpop.f32.mrb[42].mxu0 }
 0x697   : > { %v8092_v62 = vpop.f32.mrb[43].mxu0 }
 0x69d   : > { %v4874_v63 = vpop.f32.mrb[8].mxu1 }
 0x69e   : > { %v8115_v36 = vpop.f32.mrb[9].mxu1 }
 0x69f   : > { %v4877_v44 = vpop.f32.mrb[10].mxu1 }
 0x6a0   : > { %v8116_v56 = vpop.f32.mrb[11].mxu1 }
 0x6a4   : > { %v4776_v13 = vpop.f32.mrb[44].mxu0 }
 0x6a5   : > { %v4777_v10 = vadd.f32 %v4776_v13, %v4687_v57  ;;  %v8103_v23 = vpop.f32.mrb[45].mxu0 }
 0x6a6   : > { %v4779_v41 = vpop.f32.mrb[46].mxu0 }
 0x6a7   : > { %v4780_v18 = vadd.f32 %v4779_v41, %v4690_v48  ;;  %v8104_v43 = vpop.f32.mrb[47].mxu0  ;;  %v4881_v0 = vadd.f32 %v4874_v63, %v4777_v10 }
 0x6a9   : > { %v4882_v53 = vadd.f32 %v4877_v44, %v4780_v18 }
 0x6ad   : > { %v5068_v20 = vpop.f32.mrb[12].mxu1 }
 0x6ae   : > { %v8139_v32 = vpop.f32.mrb[13].mxu1 }
 0x6af   : > { %v5071_v22 = vpop.f32.mrb[14].mxu1  ;;  %v8596_v32 = vld [vmem:[%s11330_s9 + $0x30] sm:$0xff]  }
 0x6b0   : > { %v8140_v50 = vpop.f32.mrb[15].mxu1 }
 0x6b4   : > { %v4971_v6 = vpop.f32.mrb[48].mxu0 }
 0x6b5   : > { %v4978_v24 = vadd.f32 %v4971_v6, %v4881_v0  ;;  %v8127_v59 = vpop.f32.mrb[49].mxu0 }
 0x6b6   : > { %v4974_v38 = vpop.f32.mrb[50].mxu0 }
 0x6b7   : > { %v4979_v33 = vadd.f32 %v4974_v38, %v4882_v53  ;;  %v8128_v47 = vpop.f32.mrb[51].mxu0  ;;  %v5075_v45 = vadd.f32 %v5068_v20, %v4978_v24 }
 0x6b9   : > { %v5076_v4 = vadd.f32 %v5071_v22, %v4979_v33 }
 0x6bd   : > { %v5253_v54 = vpop.f32.mrb[16].mxu1 }
 0x6be   : > { %v8163_v11 = vpop.f32.mrb[17].mxu1 }
 0x6bf   : > { %v5256_v16 = vpop.f32.mrb[18].mxu1 }
 0x6c0   : > { %v8164_v15 = vpop.f32.mrb[19].mxu1 }
 0x6c4   : > { %v5165_v46 = vpop.f32.mrb[52].mxu0 }
 0x6c5   : > { %v5172_v28 = vadd.f32 %v5165_v46, %v5075_v45  ;;  %v8151_v35 = vpop.f32.mrb[53].mxu0 }
 0x6c6   : > { %v5168_v25 = vpop.f32.mrb[54].mxu0  ;;  %v8598_v35 = vld [vmem:[%s11330_s9 + $0x38] sm:$0xff]  }
 0x6c7   : > { %v5173_v58 = vadd.f32 %v5168_v25, %v5076_v4  ;;  %v8152_v61 = vpop.f32.mrb[55].mxu0  ;;  %v5260_v30 = vadd.f32 %v5253_v54, %v5172_v28 }
 0x6c9   : > { %v5261_v19 = vadd.f32 %v5256_v16, %v5173_v58 }
 0x6cd   : > { %v5429_v14 = vpop.f32.mrb[20].mxu1 }
 0x6ce   : > { %v8187_v26 = vpop.f32.mrb[21].mxu1 }
 0x6cf   : > { %v5432_v29 = vpop.f32.mrb[22].mxu1 }
 0x6d0   : > { %v8188_v3 = vpop.f32.mrb[23].mxu1 }
 0x6d4   : > { %v5341_v5 = vpop.f32.mrb[56].mxu0 }
 0x6d5   : > { %v5348_v40 = vadd.f32 %v5341_v5, %v5260_v30  ;;  %v8175_v27 = vpop.f32.mrb[57].mxu0 }
 0x6d6   : > { %v5344_v42 = vpop.f32.mrb[58].mxu0 }
 0x6d7   : > { %v5436_v55 = vadd.f32 %v5429_v14, %v5348_v40  ;;  %v5349_v7 = vadd.f32 %v5344_v42, %v5261_v19  ;;  %v8176_v31 = vpop.f32.mrb[59].mxu0 }
 0x6d8   : > { %v8600_v31 = vld [vmem:[%s11330_s9 + $0x40] sm:$0xff]  }
 0x6d9   : > { %v5445_v37 = vadd.f32 %v7144_v52, %v5436_v55  ;;  %v5437_v49 = vadd.f32 %v5432_v29, %v5349_v7 }
 0x6db   : > { %v5447_v21 = vmax.f32 %v5445_v37, 0.0  ;;  %v5446_v8 = vadd.f32 %v7144_v52, %v5437_v49  ;;  %v8601_v37 = vld [vmem:[%s11330_s9 + $0x48] sm:$0xff]  }
 0x6dd   : > { %v5451_v9 = vcombine.high %v5447_v21, %v5447_v21  ;;  %v5455_v17 = vrot.slane %v5447_v21, 4  ;;  %v5448_v57 = vmax.f32 %v5446_v8, 0.0  ;;  %v5503_v60 = vpack.c.bf16 %v5447_v21, %v5447_v21 }
 0x6df   : > { %v5456_v48 = vsel %vm4518_vm7, %v5455_v17, %v5447_v21  ;;  %v11033_v62 = vcombine.high %v5448_v57, %v5448_v57  ;;  %v5459_v63 = vrot.slane %v5448_v57, 4  ;;  %v5527_v36 = vcombine.low %v8635_v2, %v5503_v60 }
 0x6e0   : > { %v5463_v44 = vrot.slane %v5456_v48, 4  ;;  %v7151_v56 = vpack.c.bf16 %v5448_v57, %v5451_v9  ;;  %v5476_v13 = vrot.slane %v5451_v9, 3  ;;  %v5488_v10 = vrot.slane %v5451_v9, 1 }
 0x6e1   : > { %v5460_v23 = vsel %vm4518_vm7, %v5459_v63, %v5448_v57  ;;  %v5535_v41 = vrot.slane %v5527_v36, %v10764_v34  ;;  %v5478_v18 = vrot.slane %v11033_v62, 3  ;;  %v7192_v20 = vpack.c.bf16 %v5451_v9, %v5447_v21 }
 0x6e2   : > { %v5465_v43 = vrot.slane %v5460_v23, 4  ;;  %v11040_v0 = vrot.slane %v7151_v56, %v10764_v34  ;;  %v5467_v53 = vsel %vm4518_vm7, %v5463_v44, %v5447_v21  ;;  %v5484_v50 = vsel %vm611_vm3, %v5476_v13, 0.0  ;;  %v8603_v44 = vld [vmem:[%s11330_s9 + $0x50] sm:$0xff]   ;;  %v8605_v23 = vld [vmem:[%s11330_s9 + $0x58] sm:$0xff]  }
 0x6e3   : > { %v5475_v22 = vrot.slane %v5467_v53, 3  ;;  %v5487_v6 = vrot.slane %v5467_v53, 1  ;;  %v5496_v24 = vsel %vm4558_vm8, %v5488_v10, 0.0  ;;  %v5486_v33 = vsel %vm611_vm3, %v5478_v18, 0.0  ;;  %v8607_v18 = vld [vmem:[%s11330_s9 + $0x78] sm:$0xff]  }
 0x6e4   : > { %v5543_v59 = vcombine.low %v5535_v41, %v11040_v0  ;;  %v5469_v38 = vsel %vm4518_vm7, %v5465_v43, %v5448_v57  ;;  %v7193_v47 = vpack.c.bf16 %v11033_v62, %v5448_v57  ;;  %v11075_v61 = vrot.slane %v7192_v20, %v10764_v34  ;;  %v8606_v41 = vld [vmem:[%s11330_s9 + $0x70] sm:$0xff]   ;;  %v8610_v53 = vld [vmem:[%s11330_s9 + $0x98] sm:$0xff]   ;;  %v8611_v20 = vld [vmem:[%s11330_s9 + $0x88] sm:$0xff]  }
 0x6e5   : > { %v5477_v45 = vrot.slane %v5469_v38, 3  ;;  %v5483_v4 = vsel %vm611_vm3, %v5475_v22, 0.0  ;;  %v5489_v54 = vrot.slane %v5469_v38, 1  ;;  %v5495_v11 = vsel %vm4558_vm8, %v5487_v6, 0.0  ;;  %v8608_v43 = vld [vmem:[%s11330_s9 + $0x90] sm:$0xff]   ;;  %v8613_v22 = vld [vmem:[%s11330_s9 + $0xa8] sm:$0xff]  }
 0x6e6   : > { %8196 = vmatmul.mubr.msk.bf16.vlgmr.msra.gmra.mrb[60].mxu0 %vm5562_vm5, %v5543_v59  ;;  %v7156_v16 = vpack.c.bf16 %v5483_v4, %v10774_v12  ;;  %v7168_v15 = vpack.c.bf16 %v5495_v11, %v10769_v39  ;;  %v7180_v46 = vpack.c.bf16 %v5484_v50, %v5483_v4  ;;  %v11063_v28 = vrot.slane %v7193_v47, %v10764_v34  ;;  %v8615_v6 = vld [vmem:[%s11330_s9 + $0xb0] sm:$0xff]   ;;  %v8617_v59 = vld [vmem:[%s11330_s9 + $0xb8] sm:$0xff]  }
 0x6e7   : > { %8210 = vmatpush3.bf16.msra.mxu0 %v8596_v32  ;;  %v5485_v25 = vsel %vm611_vm3, %v5477_v45, 0.0  ;;  %8215 = vmatprep.mubr.msk.bf16.mxu0 %vm8639_vm0, %v8638_v51  ;;  %v5497_v58 = vsel %vm4558_vm8, %v5489_v54, 0.0  ;;  %v5490_v30 = vrot.slane %v11033_v62, 1  ;;  %v7204_v29 = vpack.c.bf16 %v5496_v24, %v5495_v11  ;;  %v8612_v32 = vld [vmem:[%s11330_s9 + $0xa0] sm:$0xff]   ;;  %v8618_v38 = vld [vmem:[%s11330_s9 + $0xd0] sm:$0xff]  }
 0x6e8   : > { %8211 = vmatprep.subr.bf16.mxu0 %v8638_v51  ;;  %v7157_v19 = vpack.c.bf16 %v5485_v25, %v5484_v50  ;;  %v5618_v14 = vrot.slane %v7156_v16, %v10764_v34  ;;  %v7169_v26 = vpack.c.bf16 %v5497_v58, %v5496_v24  ;;  %v5707_v3 = vrot.slane %v7168_v15, %v10764_v34  ;;  %v8614_v50 = vld [vmem:[%s11330_s9 + $0xc0] sm:$0xff]   ;;  %v8616_v24 = vld [vmem:[%s11330_s9 + $0xc8] sm:$0xff]  }
 0x6e9   : > { %v7181_v5 = vpack.c.bf16 %v5486_v33, %v5485_v25  ;;  %v5893_v40 = vcombine.low %v11075_v61, %v11063_v28  ;;  %v5498_v27 = vsel %vm4558_vm8, %v5490_v30, 0.0  ;;  %v5796_v55 = vrot.slane %v7180_v46, %v10764_v34 }
 0x6ea   : > { %v11086_v52 = vrot.slane %v7157_v19, %v10764_v34  ;;  %v11089_v42 = vrot.slane %v7169_v26, %v10764_v34  ;;  %v7205_v7 = vpack.c.bf16 %v5498_v27, %v5497_v58  ;;  %v7216_v49 = vpack.c.bf16 %v10774_v12, %v5486_v33 }
 0x6eb   : > { %8212 = vmatpush3.bf16.msra.mxu0 %v8598_v35  ;;  %v5803_v1 = vrot.slane %v7181_v5, %v10764_v34  ;;  %v5506_v21 = vpack.c.bf16 %v11033_v62, %v11033_v62  ;;  %v7237_v8 = vpack.c.bf16 %v10769_v39, %v5498_v27  ;;  %v5974_v57 = vrot.slane %v7204_v29, %v10764_v34  ;;  %v8602_v62 = vld [vmem:[%s11330_s9 + $0x60] sm:$0xff]  }
 0x6ec   : > { %8213 = vmatprep.subr.bf16.mxu0 %v8638_v51  ;;  %v5626_v9 = vcombine.low %v5618_v14, %v11086_v52  ;;  %v5715_v17 = vcombine.low %v5707_v3, %v11089_v42  ;;  %v5981_v60 = vrot.slane %v7205_v7, %v10764_v34  ;;  %v6061_v63 = vrot.slane %v7216_v49, %v10764_v34 }
 0x6ed   : > { %v5804_v48 = vcombine.low %v5796_v55, %v5803_v1  ;;  %v6134_v12 = vcombine.low %v5506_v21, %v8635_v2  ;;  %v11111_v36 = vrot.slane %v7237_v8, %v10764_v34  ;;  %vm6350_vm3 = vcmask 517120  }
 0x6ee   : > { %8206 = vmatmul.mubr.msk.bf16.vlgmr.msra.gmra.mrb[24].mxu1 %vm5562_vm5, %v5626_v9  ;;  %v5982_v39 = vcombine.low %v5974_v57, %v5981_v60  ;;  %v6062_v56 = vcombine.low %v11086_v52, %v6061_v63 }
 0x6ef   : > { %8214 = vmatpush3.bf16.msra.mxu0 %v8600_v31  ;;  %8220 = vmatpush3.bf16.msra.mxu1 %v8601_v37  ;;  %v6141_v2 = vrot.slane %v6134_v12, %v10764_v34  ;;  %v6222_v13 = vcombine.low %v11089_v42, %v11111_v36  ;;  %v8604_v34 = vld [vmem:[%s11330_s9 + $0x68] sm:$0xff]  }
 0x6f0   : > { %8229 = vmatprep.subr.bf16.mxu0 %v8638_v51  ;;  %8221 = vmatprep.subr.bf16.mxu1 %v8638_v51 }
 0x6f1   : > { %8225 = vmatprep.mubr.msk.bf16.mxu1 %vm8639_vm0, %v8638_v51  ;;  %v6142_v10 = vcombine.low %v11040_v0, %v6141_v2  ;;  %v8609_v0 = vld [vmem:[%s11330_s9 + $0x80] sm:$0xff]  }
 0x6f2   : > { %8216 = vmatmul.mubr.msk.bf16.vlgmr.msra.gmra.mrb[64].mxu0 %vm5562_vm5, %v5715_v17 }
 0x6f3   : > { %8230 = vmatpush3.bf16.msra.mxu0 %v8602_v62  ;;  %8222 = vmatpush3.bf16.msra.mxu1 %v8603_v44 }
 0x6f4   : > { %8231 = vmatprep.subr.bf16.mxu0 %v8638_v51  ;;  %8223 = vmatprep.subr.bf16.mxu1 %v8638_v51 }
 0x6f5   : > { %8235 = vmatprep.mubr.msk.bf16.mxu0 %vm8639_vm0, %v8638_v51 }
 0x6f7   : > { %8232 = vmatpush3.bf16.msra.mxu0 %v8604_v34  ;;  %8224 = vmatpush3.bf16.msra.mxu1 %v8605_v23 }
 0x6f8   : > { %8233 = vmatprep.subr.bf16.mxu0 %v8638_v51  ;;  %8239 = vmatprep.subr.bf16.mxu1 %v8638_v51 }
 0x6fa   : > { %8226 = vmatmul.mubr.msk.bf16.vlgmr.msra.gmra.mrb[28].mxu1 %vm5562_vm5, %v5804_v48 }
 0x6fb   : > { %8234 = vmatpush3.bf16.msra.mxu0 %v8606_v41  ;;  %8240 = vmatpush3.bf16.msra.mxu1 %v8607_v18 }
 0x6fc   : > { %8249 = vmatprep.subr.bf16.mxu0 %v8638_v51  ;;  %8241 = vmatprep.subr.bf16.mxu1 %v8638_v51 }
 0x6fd   : > { %8245 = vmatprep.mubr.msk.bf16.mxu1 %vm8639_vm0, %v8638_v51 }
 0x6fe   : > { %8236 = vmatmul.mubr.msk.bf16.vlgmr.msra.gmra.mrb[68].mxu0 %vm5562_vm5, %v5893_v40 }
 0x6ff   : > { %8250 = vmatpush3.bf16.msra.mxu0 %v8608_v43  ;;  %8242 = vmatpush3.bf16.msra.mxu1 %v8609_v0 }
 0x700   : > { %8251 = vmatprep.subr.bf16.mxu0 %v8638_v51  ;;  %8243 = vmatprep.subr.bf16.mxu1 %v8638_v51 }
 0x701   : > { %8255 = vmatprep.mubr.msk.bf16.mxu0 %vm8639_vm0, %v8638_v51 }
 0x703   : > { %8252 = vmatpush3.bf16.msra.mxu0 %v8610_v53  ;;  %8244 = vmatpush3.bf16.msra.mxu1 %v8611_v20 }
 0x704   : > { %8253 = vmatprep.subr.bf16.mxu0 %v8638_v51  ;;  %8259 = vmatprep.subr.bf16.mxu1 %v8638_v51 }
 0x706   : > { %8246 = vmatmul.mubr.msk.bf16.vlgmr.msra.gmra.mrb[32].mxu1 %vm5562_vm5, %v5982_v39 }
 0x707   : > { %8254 = vmatpush3.bf16.msra.mxu0 %v8612_v32  ;;  %8260 = vmatpush3.bf16.msra.mxu1 %v8613_v22 }
 0x708   : > { %8269 = vmatprep.subr.bf16.mxu0 %v8638_v51  ;;  %8261 = vmatprep.subr.bf16.mxu1 %v8638_v51 }
 0x709   : > { %8265 = vmatprep.mubr.msk.bf16.mxu1 %vm8639_vm0, %v8638_v51 }
 0x70a   : > { %8256 = vmatmul.mubr.msk.bf16.vlgmr.msra.gmra.mrb[72].mxu0 %vm5562_vm5, %v6062_v56 }
 0x70b   : > { %8270 = vmatpush3.bf16.msra.mxu0 %v8614_v50  ;;  %8262 = vmatpush3.bf16.msra.mxu1 %v8615_v6 }
 0x70c   : > { %8271 = vmatprep.subr.bf16.mxu0 %v8638_v51  ;;  %8263 = vmatprep.subr.bf16.mxu1 %v8638_v51 }
 0x70d   : > { %8275 = vmatprep.mubr.msk.bf16.mxu0 %vm8639_vm0, %v8638_v51  ;;  %vm6479_vm0 = vcmask 25600  }
 0x70f   : > { %8272 = vmatpush3.bf16.msra.mxu0 %v8616_v24  ;;  %8264 = vmatpush3.bf16.msra.mxu1 %v8617_v59 }
 0x710   : > { %8273 = vmatprep.subr.bf16.mxu0 %v8638_v51 }
 0x712   : > { %8266 = vmatmul.mubr.msk.bf16.vlgmr.msra.gmra.mrb[36].mxu1 %vm5562_vm5, %v6142_v10 }
 0x713   : > { %8274 = vmatpush3.bf16.msra.mxu0 %v8618_v38 }
 0x716   : > { %8276 = vmatmul.mubr.msk.bf16.vlgmr.msra.gmra.mrb[76].mxu0 %vm5562_vm5, %v6222_v13  ;;  %v7242_v13 = vld [vmem:[%s11331_s10] ss:$0 sm:$0xff] }
 0x7b9   : > { %v5600_v33 = vpop.f32.mrb[60].mxu0 }
 0x7ba   : > { %v8197_v47 = vpop.f32.mrb[61].mxu0 }
 0x7bb   : > { %v5603_v45 = vpop.f32.mrb[62].mxu0 }
 0x7bc   : > { %v8198_v4 = vpop.f32.mrb[63].mxu0 }
 0x7bd   : > { %v6308_v4 = vld [vmem:[%s11332_s11] sm:$0xff] }
 0x7c1   : > { %v5682_v54 = vpop.f32.mrb[24].mxu1 }
 0x7c2   : > { %v5683_v11 = vadd.f32 %v5682_v54, %v5600_v33  ;;  %v8207_v16 = vpop.f32.mrb[25].mxu1 }
 0x7c3   : > { %v5685_v15 = vpop.f32.mrb[26].mxu1  ;;  %v6310_v16 = vld [vmem:[%s11332_s11 + $0x10] sm:$0xff] }
 0x7c4   : > { %v5686_v46 = vadd.f32 %v5685_v15, %v5603_v45  ;;  %v8208_v28 = vpop.f32.mrb[27].mxu1  ;;  %v6309_v45 = vld [vmem:[%s11332_s11 + $0x8] sm:$0xff] }
 0x7c5   : > { %v5771_v35 = vpop.f32.mrb[64].mxu0 }
 0x7c6   : > { %v5778_v51 = vadd.f32 %v5771_v35, %v5683_v11  ;;  %v8217_v25 = vpop.f32.mrb[65].mxu0  ;;  %v6312_v11 = vld [vmem:[%s11332_s11 + $0x20] sm:$0xff] }
 0x7c7   : > { %v5774_v58 = vpop.f32.mrb[66].mxu0 }
 0x7c8   : > { %v5779_v61 = vadd.f32 %v5774_v58, %v5686_v46  ;;  %v8218_v30 = vpop.f32.mrb[67].mxu0  ;;  %v6314_v58 = vld [vmem:[%s11332_s11 + $0x30] sm:$0xff] }
 0x7cd   : > { %v5860_v19 = vpop.f32.mrb[28].mxu1 }
 0x7ce   : > { %v5867_v14 = vadd.f32 %v5860_v19, %v5778_v51  ;;  %v8227_v26 = vpop.f32.mrb[29].mxu1 }
 0x7cf   : > { %v5863_v29 = vpop.f32.mrb[30].mxu1 }
 0x7d0   : > { %v5868_v3 = vadd.f32 %v5863_v29, %v5779_v61  ;;  %v8228_v5 = vpop.f32.mrb[31].mxu1  ;;  %v6311_v61 = vld [vmem:[%s11332_s11 + $0x18] sm:$0xff]  ;;  %v6316_v29 = vld [vmem:[%s11332_s11 + $0x40] sm:$0x3] }
 0x7d1   : > { %v5949_v40 = vpop.f32.mrb[68].mxu0 }
 0x7d2   : > { %v5956_v27 = vadd.f32 %v5949_v40, %v5867_v14  ;;  %v8237_v52 = vpop.f32.mrb[69].mxu0 }
 0x7d3   : > { %v5952_v42 = vpop.f32.mrb[70].mxu0 }
 0x7d4   : > { %v5957_v55 = vadd.f32 %v5952_v42, %v5868_v3  ;;  %v8238_v7 = vpop.f32.mrb[71].mxu0  ;;  %v6313_v3 = vld [vmem:[%s11332_s11 + $0x28] sm:$0xff]  ;;  %v6315_v42 = vld [vmem:[%s11332_s11 + $0x38] sm:$0xff] }
 0x7d9   : > { %v6038_v31 = vpop.f32.mrb[32].mxu1 }
 0x7da   : > { %v6045_v37 = vadd.f32 %v6038_v31, %v5956_v27  ;;  %v8247_v1 = vpop.f32.mrb[33].mxu1 }
 0x7db   : > { %v6041_v49 = vpop.f32.mrb[34].mxu1  ;;  %v8641_v1 = vmov 0  }
 0x7dc   : > { %v6046_v21 = vadd.f32 %v6041_v49, %v5957_v55  ;;  %v8248_v8 = vpop.f32.mrb[35].mxu1  ;;  %8426 = vset.pattern.permute.xlu1 %v8641_v1  ;;  %8425 = vset.pattern.permute.xlu0 %v8641_v1  ;;  %v6355_v49 = vld [vmem:[%s11333_s12 + $0x8] sm:$0xff] }
 0x7dd   : > { %v6118_v9 = vpop.f32.mrb[72].mxu0  ;;  %v6382_v8 = vstv %s6372_s17 }
 0x7de   : > { %v6125_v17 = vadd.f32 %v6118_v9, %v6045_v37  ;;  %v8257_v57 = vpop.f32.mrb[73].mxu0 }
 0x7df   : > { %v6121_v60 = vpop.f32.mrb[74].mxu0 }
 0x7e0   : > { %v6126_v48 = vadd.f32 %v6121_v60, %v6046_v21  ;;  %v8258_v63 = vpop.f32.mrb[75].mxu0  ;;  %v6354_v21 = vld [vmem:[%s11333_s12] sm:$0xff] }
 0x7e5   : > { %v6198_v12 = vpop.f32.mrb[36].mxu1 }
 0x7e6   : > { %v6205_v36 = vadd.f32 %v6198_v12, %v6125_v17  ;;  %v8267_v39 = vpop.f32.mrb[37].mxu1 }
 0x7e7   : > { %v6201_v62 = vpop.f32.mrb[38].mxu1 }
 0x7e8   : > { %v6206_v44 = vadd.f32 %v6201_v62, %v6126_v48  ;;  %v8268_v56 = vpop.f32.mrb[39].mxu1  ;;  %v6356_v48 = vld [vmem:[%s11333_s12 + $0x10] sm:$0xff] }
 0x7e9   : > { %v6278_v2 = vpop.f32.mrb[76].mxu0  ;;  %v6358_v56 = vld [vmem:[%s11333_s12 + $0x20] sm:$0xff] }
 0x7ea   : > { %v6285_v10 = vadd.f32 %v6278_v2, %v6205_v36  ;;  %v8277_v34 = vpop.f32.mrb[77].mxu0 }
 0x7eb   : > { %v6281_v23 = vpop.f32.mrb[78].mxu0 }
 0x7ec   : > { %v6294_v41 = vadd.f32 %v7242_v13, %v6285_v10  ;;  %v6286_v18 = vadd.f32 %v6281_v23, %v6206_v44  ;;  %v8278_v43 = vpop.f32.mrb[79].mxu0 }
 0x7ed   : > { %v6359_v43 = vld [vmem:[%s11333_s12 + $0x28] sm:$0xff] }
 0x7ee   : > { %v6296_v0 = vmax.f32 %v6294_v41, 0.0  ;;  %v6295_v53 = vadd.f32 %v7242_v13, %v6286_v18  ;;  %v6357_v13 = vld [vmem:[%s11333_s12 + $0x18] sm:$0xff] }
 0x7f0   : > { %v6297_v20 = vmax.f32 %v6295_v53, 0.0  ;;  %v6298_v32 = vsel %vm4649_vm9, %v6296_v0, 0.0 }
 0x7f2   : > { %v6299_v22 = vsel %vm4649_vm9, %v6297_v20, 0.0 }
 0x7f3   : > { %v6300_v50 = vadd.f32 %v6299_v22, %v6298_v32 }
 0x7f5   : > { %v6301_v6 = vrot.slane %v6300_v50, 4 }
 0x7f7   : > { %v6302_v24 = vadd.f32 %v6301_v6, %v6300_v50  ;;  %v6360_v50 = vld [vmem:[%s11333_s12 + $0x30] sm:$0xff] }
 0x7f9   : > { %v6303_v59 = vrot.slane %v6302_v24, 2 }
 0x7fb   : > { %v6304_v38 = vadd.f32 %v6303_v59, %v6302_v24 }
 0x7fd   : > { %v6305_v33 = vrot.slane %v6304_v38, 1 }
 0x7ff   : > { %v6306_v47 = vadd.f32 %v6305_v33, %v6304_v38  ;;  %v6361_v33 = vld [vmem:[%s11333_s12 + $0x38] sm:$0xff] }
 0x801   : > { %v6307_v54 = vmul.f32 0.0625, %v6306_v47 }
 0x803   : > { %v6318_v15 = vmul.f32 %v6309_v45, %v6307_v54  ;;  %v6317_v46 = vmul.f32 %v6308_v4, %v6307_v54  ;;  %v6321_v51 = vmul.f32 %v6312_v11, %v6307_v54  ;;  %v6319_v25 = vmul.f32 %v6310_v16, %v6307_v54  ;;  %v6362_v11 = vld [vmem:[%s11333_s12 + $0x40] sm:$0x3] }
 0x804   : > { %v6323_v14 = vmul.f32 %v6314_v58, %v6307_v54  ;;  %v6320_v26 = vmul.f32 %v6311_v61, %v6307_v54  ;;  %v6325_v27 = vmul.f32 %v6316_v29, %v6307_v54  ;;  %v6322_v52 = vmul.f32 %v6313_v3, %v6307_v54  ;;  %v6403_v29 = vld [vmem:[%s11334_s13 + $0x10] sm:$0xff] }
 0x805   : > { %v6329_v28 = vsel %vm4649_vm9, %v6318_v15, 0.0  ;;  %v6326_v35 = vsel %vm4649_vm9, %v6317_v46, 0.0  ;;  %v6338_v30 = vsel %vm4649_vm9, %v6321_v51, 0.0  ;;  %v6332_v19 = vsel %vm4649_vm9, %v6319_v25, 0.0 }
 0x806   : > { %6330 = vadd.xlane.f32.xlu1 %v6329_v28  ;;  %6327 = vadd.xlane.f32.xlu0 %v6326_v35  ;;  %v6344_v5 = vsel %vm4649_vm9, %v6323_v14, 0.0  ;;  %v6335_v40 = vsel %vm4649_vm9, %v6320_v26, 0.0  ;;  %v6351_v55 = vsel %vm6350_vm3, %v6325_v27, 0.0  ;;  %v6341_v7 = vsel %vm4649_vm9, %v6322_v52, 0.0 }
 0x807   : > { %v6324_v31 = vmul.f32 %v6315_v42, %v6307_v54  ;;  %v6405_v42 = vld [vmem:[%s11334_s13 + $0x20] sm:$0xff] }
 0x809   : > { %v6347_v37 = vsel %vm4649_vm9, %v6324_v31, 0.0 }
 0x80a   : > { %6339 = vadd.xlane.f32.xlu1 %v6338_v30  ;;  %6333 = vadd.xlane.f32.xlu0 %v6332_v19  ;;  %v6402_v30 = vld [vmem:[%s11334_s13 + $0x8] sm:$0xff]  ;;  %v6401_v19 = vld [vmem:[%s11334_s13] sm:$0xff] }
 0x80e   : > { %6345 = vadd.xlane.f32.xlu1 %v6344_v5  ;;  %6336 = vadd.xlane.f32.xlu0 %v6335_v40  ;;  %v6404_v40 = vld [vmem:[%s11334_s13 + $0x18] sm:$0xff] }
 0x812   : > { %6352 = vadd.xlane.f32.xlu1 %v6351_v55  ;;  %6342 = vadd.xlane.f32.xlu0 %v6341_v7 }
 0x816   : > { %6348 = vadd.xlane.f32.xlu0 %v6347_v37  ;;  %v6406_v37 = vld [vmem:[%s11334_s13 + $0x28] sm:$0xff] }
 0x893   : > { %v6331_v9 = vpop.xlane.xlu1 %6330  ;;  %v6328_v17 = vpop.xlane.xlu0 %6327 }
 0x894   : > { %v6364_v57 = vadd.f32 %v6355_v49, %v6331_v9  ;;  %v6363_v60 = vadd.f32 %v6354_v21, %v6328_v17  ;;  %v6407_v9 = vld [vmem:[%s11334_s13 + $0x30] sm:$0xff] }
 0x896   : > { %v6384_v63 = vmul.f32 %v6382_v8, %v6364_v57  ;;  %v6383_v12 = vmul.f32 %v6382_v8, %v6363_v60  ;;  %vm6374_vm10 = vcmp.ge.f32.partialorder %v6364_v57, 0.0  ;;  %vm6373_vm11 = vcmp.ge.f32.partialorder %v6363_v60, 0.0 }
 0x897   : > { %v6334_v36 = vpop.xlane.xlu0 %6333  ;;  %v6340_v2 = vpop.xlane.xlu1 %6339 }
 0x898   : > { %v6365_v39 = vadd.f32 %v6356_v48, %v6334_v36  ;;  %v6393_v62 = vsel %vm6374_vm10, %v6364_v57, %v6384_v63  ;;  %v6392_v44 = vsel %vm6373_vm11, %v6363_v60, %v6383_v12  ;;  %v6367_v23 = vadd.f32 %v6358_v56, %v6340_v2 }
 0x899   : > { %6417 = vperm.xlu1 %8426, %v6393_v62   ;;  %6412 = vperm.xlu0 %8425, %v6392_v44  }
 0x89a   : > { %v6385_v10 = vmul.f32 %v6382_v8, %v6365_v39  ;;  %vm6375_vm12 = vcmp.ge.f32.partialorder %v6365_v39, 0.0  ;;  %v6387_v20 = vmul.f32 %v6382_v8, %v6367_v23  ;;  %vm6377_vm14 = vcmp.ge.f32.partialorder %v6367_v23, 0.0 }
 0x89b   : > { %v6337_v34 = vpop.xlane.xlu0 %6336  ;;  %v6346_v6 = vpop.xlane.xlu1 %6345 }
 0x89c   : > { %v6366_v41 = vadd.f32 %v6357_v13, %v6337_v34  ;;  %v6394_v18 = vsel %vm6375_vm12, %v6365_v39, %v6385_v10  ;;  %v6369_v24 = vadd.f32 %v6360_v50, %v6346_v6  ;;  %v6396_v38 = vsel %vm6377_vm14, %v6367_v23, %v6387_v20  ;;  %v6408_v39 = vld [vmem:[%s11334_s13 + $0x38] sm:$0xff]  ;;  %v6409_v34 = vld [vmem:[%s11334_s13 + $0x40] sm:$0x3] }
 0x89d   : > { %6422 = vperm.xlu1 %8426, %v6394_v18   ;;  %v6491_v20 = vstv %s6490_s24 }
 0x89e   : > { %v6386_v0 = vmul.f32 %v6382_v8, %v6366_v41  ;;  %vm6376_vm13 = vcmp.ge.f32.partialorder %v6366_v41, 0.0  ;;  %v6389_v45 = vmul.f32 %v6382_v8, %v6369_v24  ;;  %vm6379_vm1 = vcmp.ge.f32.partialorder %v6369_v24, 0.0 }
 0x89f   : > { %v6343_v53 = vpop.xlane.xlu0 %6342  ;;  %v6353_v16 = vpop.xlane.xlu1 %6352  ;;  %8619 = vrcp.f32 %v6491_v20 }
 0x8a0   : > { %v6368_v32 = vadd.f32 %v6359_v43, %v6343_v53  ;;  %v6395_v22 = vsel %vm6376_vm13, %v6366_v41, %v6386_v0  ;;  %v6371_v15 = vadd.f32 %v6362_v11, %v6353_v16  ;;  %v6398_v28 = vsel %vm6379_vm1, %v6369_v24, %v6389_v45 }
 0x8a1   : > { %6427 = vperm.xlu1 %8426, %v6395_v22  }
 0x8a2   : > { %v6388_v59 = vmul.f32 %v6382_v8, %v6368_v32  ;;  %vm6378_vm15 = vcmp.ge.f32.partialorder %v6368_v32, 0.0  ;;  %v6391_v35 = vmul.f32 %v6382_v8, %v6371_v15  ;;  %vm6381_vm6 = vcmp.ge.f32.partialorder %v6371_v15, 0.0 }
 0x8a3   : > { %v6349_v47 = vpop.xlane.xlu0 %6348 }
 0x8a4   : > { %v6370_v4 = vadd.f32 %v6361_v33, %v6349_v47  ;;  %v6397_v54 = vsel %vm6378_vm15, %v6368_v32, %v6388_v59  ;;  %v6400_v25 = vsel %vm6381_vm6, %v6371_v15, %v6391_v35  ;;  %v6495_v15 = vstv %s6494_s30 }
 0x8a5   : > { %6432 = vperm.xlu1 %8426, %v6396_v38   ;;  %v6488_v38 = vld [vmem:[%s11335_s14] sm:$0x1] }
 0x8a6   : > { %v6390_v46 = vmul.f32 %v6382_v8, %v6370_v4  ;;  %vm6380_vm2 = vcmp.ge.f32.partialorder %v6370_v4, 0.0 }
 0x8a8   : > { %v6399_v51 = vsel %vm6380_vm2, %v6370_v4, %v6390_v46 }
 0x8a9   : > { %6437 = vperm.xlu1 %8426, %v6397_v54   ;;  %v8620_v47 = vpop.eup %8619 }
 0x8ad   : > { %6442 = vperm.xlu1 %8426, %v6398_v28  }
 0x8b1   : > { %6447 = vperm.xlu1 %8426, %v6399_v51  }
 0x8b5   : > { %6452 = vperm.xlu1 %8426, %v6400_v25  }
 0x918   : > { %v6418_v58 = vpop.permute.xlu1 %6417  ;;  %v6413_v14 = vpop.permute.xlu0 %6412 }
 0x919   : > { %v6456_v3 = vmul.f32 %v6418_v58, %v6402_v30  ;;  %v6455_v5 = vmul.f32 %v6413_v14, %v6401_v19 }
 0x91b   : > { %v6465_v55 = vsel %vm966_vm4, %v6456_v3, 0.0  ;;  %v6464_v7 = vsel %vm966_vm4, %v6455_v5, 0.0 }
 0x91c   : > { %v6423_v61 = vpop.permute.xlu1 %6422  ;;  %v6466_v8 = vadd.f32 %v6465_v55, %v6464_v7 }
 0x91d   : > { %v6457_v52 = vmul.f32 %v6423_v61, %v6403_v29 }
 0x91f   : > { %v6467_v49 = vsel %vm966_vm4, %v6457_v52, 0.0 }
 0x920   : > { %v6428_v26 = vpop.permute.xlu1 %6427  ;;  %v6468_v60 = vadd.f32 %v6467_v49, %v6466_v8 }
 0x921   : > { %v6458_v31 = vmul.f32 %v6428_v26, %v6404_v40 }
 0x923   : > { %v6469_v17 = vsel %vm966_vm4, %v6458_v31, 0.0 }
 0x924   : > { %v6433_v27 = vpop.permute.xlu1 %6432  ;;  %v6470_v36 = vadd.f32 %v6469_v17, %v6468_v60 }
 0x925   : > { %v6459_v21 = vmul.f32 %v6433_v27, %v6405_v42 }
 0x927   : > { %v6471_v63 = vsel %vm966_vm4, %v6459_v21, 0.0 }
 0x928   : > { %v6438_v1 = vpop.permute.xlu1 %6437  ;;  %v6472_v44 = vadd.f32 %v6471_v63, %v6470_v36 }
 0x929   : > { %v6460_v57 = vmul.f32 %v6438_v1, %v6406_v37 }
 0x92b   : > { %v6473_v62 = vsel %vm966_vm4, %v6460_v57, 0.0 }
 0x92c   : > { %v6443_v48 = vpop.permute.xlu1 %6442  ;;  %v6474_v10 = vadd.f32 %v6473_v62, %v6472_v44 }
 0x92d   : > { %v6461_v12 = vmul.f32 %v6443_v48, %v6407_v9 }
 0x92f   : > { %v6475_v2 = vsel %vm966_vm4, %v6461_v12, 0.0 }
 0x930   : > { %v6448_v56 = vpop.permute.xlu1 %6447  ;;  %v6476_v41 = vadd.f32 %v6475_v2, %v6474_v10 }
 0x931   : > { %v6462_v13 = vmul.f32 %v6448_v56, %v6408_v39 }
 0x933   : > { %v6477_v23 = vsel %vm966_vm4, %v6462_v13, 0.0  ;;  %vm6504_vm4 = vcmask 24576  }
 0x934   : > { %v6453_v18 = vpop.permute.xlu1 %6452  ;;  %v6478_v0 = vadd.f32 %v6477_v23, %v6476_v41 }
 0x935   : > { %v6463_v43 = vmul.f32 %v6453_v18, %v6409_v34 }
 0x937   : > { %v6480_v53 = vsel %vm6479_vm0, %v6463_v43, 0.0 }
 0x938   : > { %v6481_v32 = vadd.f32 %v6480_v53, %v6478_v0 }
 0x93a   : > { %v6482_v22 = vrot.slane %v6481_v32, 4 }
 0x93c   : > { %v6483_v50 = vadd.f32 %v6482_v22, %v6481_v32 }
 0x93e   : > { %v6484_v6 = vrot.slane %v6483_v50, 2 }
 0x940   : > { %v6485_v24 = vadd.f32 %v6484_v6, %v6483_v50 }
 0x942   : > { %v6486_v59 = vrot.slane %v6485_v24, 1 }
 0x944   : > { %v6487_v33 = vadd.f32 %v6486_v59, %v6485_v24 }
 0x946   : > { %v6489_v45 = vadd.f32 %v6488_v38, %v6487_v33 }
 0x948   : > { %v6493_v4 = vmul.f32 %v8620_v47, %v6489_v45 }
 0x94a   : > { %v7243_v54 = vmul.f32 -1.442695, %v6493_v4  ;;  %vm6496_vm7 = vcmp.ge.f32.partialorder %v6493_v4, %v6495_v15 }
 0x94c   : > { %8621 = vpow2.f32 %v7243_v54 }
 0x956   : > { %v8622_v11 = vpop.eup %8621 }
 0x957   : > { %v6500_v16 = vadd.f32 1.0, %v8622_v11 }
 0x959   : > { %8623 = vrcp.f32 %v6500_v16 }
 0x963   : > { %v8624_v46 = vpop.eup %8623 }
 0x964   : > { %v6503_v28 = vsel %vm6496_vm7, %v8624_v46, 0.0 }
 0x965   : > { %6505 = vst.msk [vmem:[%s574_s15] sm:$0x1] %vm6504_vm4, %v6503_v28 }
 0x966 PF: > { %s31_s1 = sadd.s32 1, %s8631_s1  }
 0x967   : > { %p28_p4 = scmp.ge.s32.totalorder %s31_s1, 4  }
 0x969   :  { %30 = sbr.rel (!%p28_p4) target bundleno = 7 (0x7), region = 154 }

</bundles_post_ra>
